<compile_context>
chip_gen: v6e
topology: v6e:2x2x1
jax: 0.10.0
libtpu: 0.0.40
codegen_flags: <defaults>
</compile_context>

<pallas_src>
import math

import jax
import jax.numpy as jnp
from jax.experimental import pallas as pl
from jax.experimental.pallas import tpu as pltpu

NEG_SLOPE = 0.2   # LeakyReLU(0.2)
BN_EPS = 0.8      # BatchNorm1d(out, 0.8) -> eps=0.8
LANE = 128        # layer-5 feature-block width (lane-dense stores)


# ---------------------------------------------------------------------------
# Kernel: whole Generator forward for one 128-wide slice of the output.
# ---------------------------------------------------------------------------
def _generator_kernel(x_ref,
                      w1_ref, b1_ref,
                      w2_ref, g2_ref, be2_ref,
                      w3_ref, g3_ref, be3_ref,
                      w4_ref, g4_ref, be4_ref,
                      w5_ref, g5_ref, be5_ref,
                      o_ref):
    def leaky(y):
        return jnp.where(y > 0, y, NEG_SLOPE * y)

    def linear(h, w_ref):
        # bf16 operands into the MXU, f32 accumulation.
        return jnp.dot(h.astype(jnp.bfloat16), w_ref[...],
                       preferred_element_type=jnp.float32)

    def bn(y, g_ref, be_ref):
        # Training-mode BatchNorm1d: biased batch statistics over the batch
        # axis, folded into one scale/shift FMA per element (rsqrt -> EUP).
        mean = jnp.mean(y, axis=0, keepdims=True)
        var = jnp.mean((y - mean) * (y - mean), axis=0, keepdims=True)
        scale = g_ref[...] * jax.lax.rsqrt(var + BN_EPS)
        shift = be_ref[...] - mean * scale
        return y * scale + shift

    # Layers 1-4 (recomputed per grid step; negligible work, keeps the grid
    # axis "parallel" so v7x can shard it across both TensorCores).
    h = leaky(linear(x_ref[...], w1_ref) + b1_ref[...])          # no BN
    h = leaky(bn(linear(h, w2_ref), g2_ref, be2_ref))            # bias elided
    h = leaky(bn(linear(h, w3_ref), g3_ref, be3_ref))
    h = leaky(bn(linear(h, w4_ref), g4_ref, be4_ref))
    # Layer 5: one 128-wide block of the (padded-to-896) output features.
    y = leaky(bn(linear(h, w5_ref), g5_ref, be5_ref))
    o_ref[...] = jnp.tanh(y).astype(o_ref.dtype)


# ---------------------------------------------------------------------------
# Wrapper
# ---------------------------------------------------------------------------
@jax.jit
def _generator_forward_padded(x, kp):
    B, in_dim = x.shape
    n5_pad = kp["w5"].shape[1]
    n_blocks = n5_pad // LANE

    def const_spec(shape):
        return pl.BlockSpec(shape, lambda j: (0, 0))

    grid_spec = pltpu.PrefetchScalarGridSpec(
        num_scalar_prefetch=0,
        grid=(n_blocks,),
        in_specs=[
            const_spec((B, in_dim)),
            const_spec(kp["w1"].shape), const_spec(kp["b1"].shape),
            const_spec(kp["w2"].shape), const_spec(kp["g2"].shape),
            const_spec(kp["be2"].shape),
            const_spec(kp["w3"].shape), const_spec(kp["g3"].shape),
            const_spec(kp["be3"].shape),
            const_spec(kp["w4"].shape), const_spec(kp["g4"].shape),
            const_spec(kp["be4"].shape),
            # Only w5 / its BN params / the output are blocked along the grid.
            pl.BlockSpec((kp["w5"].shape[0], LANE), lambda j: (0, j)),
            pl.BlockSpec((1, LANE), lambda j: (0, j)),
            pl.BlockSpec((1, LANE), lambda j: (0, j)),
        ],
        out_specs=pl.BlockSpec((B, LANE), lambda j: (0, j)),
    )

    # Advisory cost estimate for XLA's scheduler.
    layer_dims = [kp["w1"].shape, kp["w2"].shape, kp["w3"].shape,
                  kp["w4"].shape]
    flops_1to4 = 2 * B * sum(i * o for i, o in layer_dims)
    flops_5 = 2 * B * kp["w5"].shape[0] * LANE
    flops = n_blocks * (flops_1to4 + flops_5)
    trans = n_blocks * (sum(o for _, o in layer_dims[1:]) + LANE + B * LANE)
    operands = (x,
                kp["w1"], kp["b1"],
                kp["w2"], kp["g2"], kp["be2"],
                kp["w3"], kp["g3"], kp["be3"],
                kp["w4"], kp["g4"], kp["be4"],
                kp["w5"], kp["g5"], kp["be5"])
    bytes_accessed = (sum(int(a.size) * jnp.dtype(a.dtype).itemsize
                          for a in operands) + B * n5_pad * 4)

    return pl.pallas_call(
        _generator_kernel,
        out_shape=jax.ShapeDtypeStruct((B, n5_pad), jnp.float32),
        grid_spec=grid_spec,
        compiler_params=pltpu.CompilerParams(
            dimension_semantics=("parallel",),
            vmem_limit_bytes=16 << 20),
        cost_estimate=pl.CostEstimate(flops=int(flops),
                                      transcendentals=int(trans),
                                      bytes_accessed=int(bytes_accessed)),
    )(*operands)


def generator_forward(x, kp, n_out):
    """x: (B, input_dim) f32.  kp: preprocessed kernel params.  -> (B, n_out)."""
    return _generator_forward_padded(x, kp)[:, :n_out]


# ---------------------------------------------------------------------------
# One-time parameter preprocessing (outside the hot path).
# ---------------------------------------------------------------------------
def prepare_kernel_params(params):
    """Pad layer 5 to a lane multiple, cast weights to bf16, reshape BN rows."""
    p1, p2, p3, p4, p5 = params
    n5 = p5["w"].shape[1]
    n5_pad = ((n5 + LANE - 1) // LANE) * LANE
    pad = n5_pad - n5

    def row(v):
        return jnp.asarray(v, jnp.float32).reshape(1, -1)

    kp = dict(
        w1=p1["w"].astype(jnp.bfloat16), b1=row(p1["b"]),
        w2=p2["w"].astype(jnp.bfloat16), g2=row(p2["gamma"]), be2=row(p2["beta"]),
        w3=p3["w"].astype(jnp.bfloat16), g3=row(p3["gamma"]), be3=row(p3["beta"]),
        w4=p4["w"].astype(jnp.bfloat16), g4=row(p4["gamma"]), be4=row(p4["beta"]),
        # Zero weight columns + gamma=1 + beta=0 keep padded lanes at exactly 0.
        w5=jnp.pad(p5["w"], ((0, 0), (0, pad))).astype(jnp.bfloat16),
        g5=row(jnp.pad(p5["gamma"], (0, pad), constant_values=1.0)),
        be5=row(jnp.pad(p5["beta"], (0, pad))),
    )
    return kp, n5


# ---------------------------------------------------------------------------
# Parameter construction (deterministic, PyTorch-style uniform init).
# ---------------------------------------------------------------------------
def init_linear(key, in_f, out_f):
    k_w, k_b = jax.random.split(key)
    bound = 1.0 / math.sqrt(in_f)
    w = jax.random.uniform(k_w, (in_f, out_f), jnp.float32, -bound, bound)
    b = jax.random.uniform(k_b, (out_f,), jnp.float32, -bound, bound)
    return w, b


def build_generator_params(key, input_dim=256, img_pixels=1 * 28 * 28):
    # 256->128 (no BN), 128->256, 256->512, 512->1024, 1024->784 (all +BN).
    layer_defs = [(input_dim, 128), (128, 256), (256, 512),
                  (512, 1024), (1024, img_pixels)]
    params = []
    keys = jax.random.split(key, len(layer_defs))
    for k, (fin, fout) in zip(keys, layer_defs):
        w, b = init_linear(k, fin, fout)
        params.append(dict(w=w, b=b,
                           gamma=jnp.ones((fout,), jnp.float32),
                           beta=jnp.zeros((fout,), jnp.float32)))
    return params


# ---------------------------------------------------------------------------
# Pure-JAX references (mirror the PyTorch module incl. bias on BN layers).
# ---------------------------------------------------------------------------
def generator_ref(x, params, matmul_dtype=jnp.float32):
    use_bn = [False, True, True, True, True]
    h = x
    for i, (p, norm) in enumerate(zip(params, use_bn)):
        y = jnp.dot(h.astype(matmul_dtype), p["w"].astype(matmul_dtype),
                    preferred_element_type=jnp.float32) + p["b"]
        if norm:
            mean = jnp.mean(y, axis=0, keepdims=True)
            var = jnp.mean((y - mean) ** 2, axis=0, keepdims=True)
            y = (y - mean) / jnp.sqrt(var + BN_EPS)
            y = y * p["gamma"] + p["beta"]
        y = jnp.where(y > 0, y, NEG_SLOPE * y)
        if i == len(params) - 1:
            y = jnp.tanh(y)
        h = y
    return h


if __name__ == "__main__":
    key = jax.random.PRNGKey(0)
    k_param, k_x = jax.random.split(key)

    INPUT_DIM = 256           # args['input_dim']
    IMG_PIXELS = 1 * 28 * 28  # prod(args['img_shape']) = 784
    BATCH = 8                 # >1 so batch-norm statistics are defined

    params = build_generator_params(k_param, INPUT_DIM, IMG_PIXELS)
    kparams, n_out = prepare_kernel_params(params)   # pad/cast ONCE, off hot path
    x = jax.random.normal(k_x, (BATCH, INPUT_DIM), jnp.float32)

    out = jax.block_until_ready(generator_forward(x, kparams, n_out))
    assert out.shape == (BATCH, IMG_PIXELS), out.shape

    # Tight check against a reference that uses the same bf16 matmul operands.
    ref_bf16 = jax.block_until_ready(
        generator_ref(x, params, matmul_dtype=jnp.bfloat16))
    assert jnp.allclose(out, ref_bf16, atol=1e-2, rtol=1e-2), float(
        jnp.max(jnp.abs(out - ref_bf16)))

    # Loose semantic check against the full-f32 reference (bf16-weight error).
    ref_f32 = jax.block_until_ready(generator_ref(x, params))
    assert jnp.allclose(out, ref_f32, atol=2e-1, rtol=2e-1), float(
        jnp.max(jnp.abs(out - ref_f32)))

    # TODO(synk): forward-only — BatchNorm running statistics are not tracked.
    print("KERNEL_OK")
</pallas_src>

<mosaic_0001>
module attributes {stable_mosaic.version = 11 : i64} {
  func.func @_generator_kernel(%arg0: i32, %arg1: memref<8x256xf32, #tpu.memory_space<vmem>>, %arg2: memref<256x128xbf16, #tpu.memory_space<vmem>>, %arg3: memref<1x128xf32, #tpu.memory_space<vmem>>, %arg4: memref<128x256xbf16, #tpu.memory_space<vmem>>, %arg5: memref<1x256xf32, #tpu.memory_space<vmem>>, %arg6: memref<1x256xf32, #tpu.memory_space<vmem>>, %arg7: memref<256x512xbf16, #tpu.memory_space<vmem>>, %arg8: memref<1x512xf32, #tpu.memory_space<vmem>>, %arg9: memref<1x512xf32, #tpu.memory_space<vmem>>, %arg10: memref<512x1024xbf16, #tpu.memory_space<vmem>>, %arg11: memref<1x1024xf32, #tpu.memory_space<vmem>>, %arg12: memref<1x1024xf32, #tpu.memory_space<vmem>>, %arg13: memref<1024x128xbf16, #tpu.memory_space<vmem>>, %arg14: memref<1x128xf32, #tpu.memory_space<vmem>>, %arg15: memref<1x128xf32, #tpu.memory_space<vmem>>, %arg16: memref<8x128xf32, #tpu.memory_space<vmem>>) attributes {dimension_semantics = [#tpu.dimension_semantics<parallel>], iteration_bounds = array<i64: 7>, scalar_prefetch = 0 : i64, scratch_operands = 0 : i64, tpu.core_type = #tpu.core_type<tc>, window_params = [{pipeline_mode = #tpu.pipeline_mode<synchronous>, transform_indices = @transform_0, window_bounds = array<i64: 8, 256>}, {pipeline_mode = #tpu.pipeline_mode<synchronous>, transform_indices = @transform_1, window_bounds = array<i64: 256, 128>}, {pipeline_mode = #tpu.pipeline_mode<synchronous>, transform_indices = @transform_2, window_bounds = array<i64: 1, 128>}, {pipeline_mode = #tpu.pipeline_mode<synchronous>, transform_indices = @transform_3, window_bounds = array<i64: 128, 256>}, {pipeline_mode = #tpu.pipeline_mode<synchronous>, transform_indices = @transform_4, window_bounds = array<i64: 1, 256>}, {pipeline_mode = #tpu.pipeline_mode<synchronous>, transform_indices = @transform_5, window_bounds = array<i64: 1, 256>}, {pipeline_mode = #tpu.pipeline_mode<synchronous>, transform_indices = @transform_6, window_bounds = array<i64: 256, 512>}, {pipeline_mode = #tpu.pipeline_mode<synchronous>, transform_indices = @transform_7, window_bounds = array<i64: 1, 512>}, {pipeline_mode = #tpu.pipeline_mode<synchronous>, transform_indices = @transform_8, window_bounds = array<i64: 1, 512>}, {pipeline_mode = #tpu.pipeline_mode<synchronous>, transform_indices = @transform_9, window_bounds = array<i64: 512, 1024>}, {pipeline_mode = #tpu.pipeline_mode<synchronous>, transform_indices = @transform_10, window_bounds = array<i64: 1, 1024>}, {pipeline_mode = #tpu.pipeline_mode<synchronous>, transform_indices = @transform_11, window_bounds = array<i64: 1, 1024>}, {transform_indices = @transform_12, window_bounds = array<i64: 1024, 128>}, {transform_indices = @transform_13, window_bounds = array<i64: 1, 128>}, {transform_indices = @transform_14, window_bounds = array<i64: 1, 128>}, {transform_indices = @transform_15, window_bounds = array<i64: 8, 128>}]} {
    %c0 = arith.constant 0 : index
    %c0_0 = arith.constant 0 : index
    %0 = vector.load %arg1[%c0, %c0_0] : memref<8x256xf32, #tpu.memory_space<vmem>>, vector<8x256xf32>
    %1 = arith.truncf %0 : vector<8x256xf32> to vector<8x256xbf16>
    %c0_1 = arith.constant 0 : index
    %c0_2 = arith.constant 0 : index
    %2 = vector.load %arg2[%c0_1, %c0_2] : memref<256x128xbf16, #tpu.memory_space<vmem>>, vector<256x128xbf16>
    %cst = arith.constant dense<0.000000e+00> : vector<8x128xf32>
    %3 = tpu.matmul %1, %2, %cst {dimension_numbers = #tpu.dot_dimension_numbers<[1], [0], [0], [1], [0, 0, 1, 1], [], []>} : vector<8x256xbf16>, vector<256x128xbf16>, vector<8x128xf32> -> vector<8x128xf32>
    %c0_3 = arith.constant 0 : index
    %c0_4 = arith.constant 0 : index
    %4 = vector.load %arg3[%c0_3, %c0_4] : memref<1x128xf32, #tpu.memory_space<vmem>>, vector<1x128xf32>
    %5 = vector.broadcast %4 : vector<1x128xf32> to vector<8x128xf32>
    %6 = arith.addf %3, %5 : vector<8x128xf32>
    %cst_5 = arith.constant 0.000000e+00 : f32
    %7 = vector.broadcast %cst_5 : f32 to vector<8x128xf32>
    %8 = arith.cmpf ogt, %6, %7 : vector<8x128xf32>
    %cst_6 = arith.constant 2.000000e-01 : f32
    %9 = vector.broadcast %cst_6 : f32 to vector<8x128xf32>
    %10 = arith.mulf %9, %6 : vector<8x128xf32>
    %11 = arith.select %8, %6, %10 : vector<8x128xi1>, vector<8x128xf32>
    %12 = arith.truncf %11 : vector<8x128xf32> to vector<8x128xbf16>
    %c0_7 = arith.constant 0 : index
    %c0_8 = arith.constant 0 : index
    %13 = vector.load %arg4[%c0_7, %c0_8] : memref<128x256xbf16, #tpu.memory_space<vmem>>, vector<128x256xbf16>
    %cst_9 = arith.constant dense<0.000000e+00> : vector<8x256xf32>
    %14 = tpu.matmul %12, %13, %cst_9 {dimension_numbers = #tpu.dot_dimension_numbers<[1], [0], [0], [1], [0, 0, 1, 1], [], []>} : vector<8x128xbf16>, vector<128x256xbf16>, vector<8x256xf32> -> vector<8x256xf32>
    %cst_10 = arith.constant dense<0.000000e+00> : vector<256xf32>
    %15 = vector.multi_reduction <add>, %14, %cst_10 [0] : vector<8x256xf32> to vector<256xf32>
    %16 = vector.shape_cast %15 : vector<256xf32> to vector<1x256xf32>
    %cst_11 = arith.constant 8.000000e+00 : f32
    %17 = vector.broadcast %cst_11 : f32 to vector<1x256xf32>
    %18 = arith.divf %16, %17 : vector<1x256xf32>
    %19 = vector.broadcast %18 : vector<1x256xf32> to vector<8x256xf32>
    %20 = arith.subf %14, %19 : vector<8x256xf32>
    %21 = vector.broadcast %18 : vector<1x256xf32> to vector<8x256xf32>
    %22 = arith.subf %14, %21 : vector<8x256xf32>
    %23 = arith.mulf %20, %22 : vector<8x256xf32>
    %cst_12 = arith.constant dense<0.000000e+00> : vector<256xf32>
    %24 = vector.multi_reduction <add>, %23, %cst_12 [0] : vector<8x256xf32> to vector<256xf32>
    %25 = vector.shape_cast %24 : vector<256xf32> to vector<1x256xf32>
    %cst_13 = arith.constant 8.000000e+00 : f32
    %26 = vector.broadcast %cst_13 : f32 to vector<1x256xf32>
    %27 = arith.divf %25, %26 : vector<1x256xf32>
    %c0_14 = arith.constant 0 : index
    %c0_15 = arith.constant 0 : index
    %28 = vector.load %arg5[%c0_14, %c0_15] : memref<1x256xf32, #tpu.memory_space<vmem>>, vector<1x256xf32>
    %cst_16 = arith.constant 8.000000e-01 : f32
    %29 = vector.broadcast %cst_16 : f32 to vector<1x256xf32>
    %30 = arith.addf %27, %29 : vector<1x256xf32>
    %31 = math.rsqrt %30 : vector<1x256xf32>
    %32 = arith.mulf %28, %31 : vector<1x256xf32>
    %c0_17 = arith.constant 0 : index
    %c0_18 = arith.constant 0 : index
    %33 = vector.load %arg6[%c0_17, %c0_18] : memref<1x256xf32, #tpu.memory_space<vmem>>, vector<1x256xf32>
    %34 = arith.mulf %18, %32 : vector<1x256xf32>
    %35 = arith.subf %33, %34 : vector<1x256xf32>
    %36 = vector.broadcast %32 : vector<1x256xf32> to vector<8x256xf32>
    %37 = arith.mulf %14, %36 : vector<8x256xf32>
    %38 = vector.broadcast %35 : vector<1x256xf32> to vector<8x256xf32>
    %39 = arith.addf %37, %38 : vector<8x256xf32>
    %cst_19 = arith.constant 0.000000e+00 : f32
    %40 = vector.broadcast %cst_19 : f32 to vector<8x256xf32>
    %41 = arith.cmpf ogt, %39, %40 : vector<8x256xf32>
    %cst_20 = arith.constant 2.000000e-01 : f32
    %42 = vector.broadcast %cst_20 : f32 to vector<8x256xf32>
    %43 = arith.mulf %42, %39 : vector<8x256xf32>
    %44 = arith.select %41, %39, %43 : vector<8x256xi1>, vector<8x256xf32>
    %45 = arith.truncf %44 : vector<8x256xf32> to vector<8x256xbf16>
    %c0_21 = arith.constant 0 : index
    %c0_22 = arith.constant 0 : index
    %46 = vector.load %arg7[%c0_21, %c0_22] : memref<256x512xbf16, #tpu.memory_space<vmem>>, vector<256x512xbf16>
    %cst_23 = arith.constant dense<0.000000e+00> : vector<8x512xf32>
    %47 = tpu.matmul %45, %46, %cst_23 {dimension_numbers = #tpu.dot_dimension_numbers<[1], [0], [0], [1], [0, 0, 1, 1], [], []>} : vector<8x256xbf16>, vector<256x512xbf16>, vector<8x512xf32> -> vector<8x512xf32>
    %cst_24 = arith.constant dense<0.000000e+00> : vector<512xf32>
    %48 = vector.multi_reduction <add>, %47, %cst_24 [0] : vector<8x512xf32> to vector<512xf32>
    %49 = vector.shape_cast %48 : vector<512xf32> to vector<1x512xf32>
    %cst_25 = arith.constant 8.000000e+00 : f32
    %50 = vector.broadcast %cst_25 : f32 to vector<1x512xf32>
    %51 = arith.divf %49, %50 : vector<1x512xf32>
    %52 = vector.broadcast %51 : vector<1x512xf32> to vector<8x512xf32>
    %53 = arith.subf %47, %52 : vector<8x512xf32>
    %54 = vector.broadcast %51 : vector<1x512xf32> to vector<8x512xf32>
    %55 = arith.subf %47, %54 : vector<8x512xf32>
    %56 = arith.mulf %53, %55 : vector<8x512xf32>
    %cst_26 = arith.constant dense<0.000000e+00> : vector<512xf32>
    %57 = vector.multi_reduction <add>, %56, %cst_26 [0] : vector<8x512xf32> to vector<512xf32>
    %58 = vector.shape_cast %57 : vector<512xf32> to vector<1x512xf32>
    %cst_27 = arith.constant 8.000000e+00 : f32
    %59 = vector.broadcast %cst_27 : f32 to vector<1x512xf32>
    %60 = arith.divf %58, %59 : vector<1x512xf32>
    %c0_28 = arith.constant 0 : index
    %c0_29 = arith.constant 0 : index
    %61 = vector.load %arg8[%c0_28, %c0_29] : memref<1x512xf32, #tpu.memory_space<vmem>>, vector<1x512xf32>
    %cst_30 = arith.constant 8.000000e-01 : f32
    %62 = vector.broadcast %cst_30 : f32 to vector<1x512xf32>
    %63 = arith.addf %60, %62 : vector<1x512xf32>
    %64 = math.rsqrt %63 : vector<1x512xf32>
    %65 = arith.mulf %61, %64 : vector<1x512xf32>
    %c0_31 = arith.constant 0 : index
    %c0_32 = arith.constant 0 : index
    %66 = vector.load %arg9[%c0_31, %c0_32] : memref<1x512xf32, #tpu.memory_space<vmem>>, vector<1x512xf32>
    %67 = arith.mulf %51, %65 : vector<1x512xf32>
    %68 = arith.subf %66, %67 : vector<1x512xf32>
    %69 = vector.broadcast %65 : vector<1x512xf32> to vector<8x512xf32>
    %70 = arith.mulf %47, %69 : vector<8x512xf32>
    %71 = vector.broadcast %68 : vector<1x512xf32> to vector<8x512xf32>
    %72 = arith.addf %70, %71 : vector<8x512xf32>
    %cst_33 = arith.constant 0.000000e+00 : f32
    %73 = vector.broadcast %cst_33 : f32 to vector<8x512xf32>
    %74 = arith.cmpf ogt, %72, %73 : vector<8x512xf32>
    %cst_34 = arith.constant 2.000000e-01 : f32
    %75 = vector.broadcast %cst_34 : f32 to vector<8x512xf32>
    %76 = arith.mulf %75, %72 : vector<8x512xf32>
    %77 = arith.select %74, %72, %76 : vector<8x512xi1>, vector<8x512xf32>
    %78 = arith.truncf %77 : vector<8x512xf32> to vector<8x512xbf16>
    %c0_35 = arith.constant 0 : index
    %c0_36 = arith.constant 0 : index
    %79 = vector.load %arg10[%c0_35, %c0_36] : memref<512x1024xbf16, #tpu.memory_space<vmem>>, vector<512x1024xbf16>
    %cst_37 = arith.constant dense<0.000000e+00> : vector<8x1024xf32>
    %80 = tpu.matmul %78, %79, %cst_37 {dimension_numbers = #tpu.dot_dimension_numbers<[1], [0], [0], [1], [0, 0, 1, 1], [], []>} : vector<8x512xbf16>, vector<512x1024xbf16>, vector<8x1024xf32> -> vector<8x1024xf32>
    %cst_38 = arith.constant dense<0.000000e+00> : vector<1024xf32>
    %81 = vector.multi_reduction <add>, %80, %cst_38 [0] : vector<8x1024xf32> to vector<1024xf32>
    %82 = vector.shape_cast %81 : vector<1024xf32> to vector<1x1024xf32>
    %cst_39 = arith.constant 8.000000e+00 : f32
    %83 = vector.broadcast %cst_39 : f32 to vector<1x1024xf32>
    %84 = arith.divf %82, %83 : vector<1x1024xf32>
    %85 = vector.broadcast %84 : vector<1x1024xf32> to vector<8x1024xf32>
    %86 = arith.subf %80, %85 : vector<8x1024xf32>
    %87 = vector.broadcast %84 : vector<1x1024xf32> to vector<8x1024xf32>
    %88 = arith.subf %80, %87 : vector<8x1024xf32>
    %89 = arith.mulf %86, %88 : vector<8x1024xf32>
    %cst_40 = arith.constant dense<0.000000e+00> : vector<1024xf32>
    %90 = vector.multi_reduction <add>, %89, %cst_40 [0] : vector<8x1024xf32> to vector<1024xf32>
    %91 = vector.shape_cast %90 : vector<1024xf32> to vector<1x1024xf32>
    %cst_41 = arith.constant 8.000000e+00 : f32
    %92 = vector.broadcast %cst_41 : f32 to vector<1x1024xf32>
    %93 = arith.divf %91, %92 : vector<1x1024xf32>
    %c0_42 = arith.constant 0 : index
    %c0_43 = arith.constant 0 : index
    %94 = vector.load %arg11[%c0_42, %c0_43] : memref<1x1024xf32, #tpu.memory_space<vmem>>, vector<1x1024xf32>
    %cst_44 = arith.constant 8.000000e-01 : f32
    %95 = vector.broadcast %cst_44 : f32 to vector<1x1024xf32>
    %96 = arith.addf %93, %95 : vector<1x1024xf32>
    %97 = math.rsqrt %96 : vector<1x1024xf32>
    %98 = arith.mulf %94, %97 : vector<1x1024xf32>
    %c0_45 = arith.constant 0 : index
    %c0_46 = arith.constant 0 : index
    %99 = vector.load %arg12[%c0_45, %c0_46] : memref<1x1024xf32, #tpu.memory_space<vmem>>, vector<1x1024xf32>
    %100 = arith.mulf %84, %98 : vector<1x1024xf32>
    %101 = arith.subf %99, %100 : vector<1x1024xf32>
    %102 = vector.broadcast %98 : vector<1x1024xf32> to vector<8x1024xf32>
    %103 = arith.mulf %80, %102 : vector<8x1024xf32>
    %104 = vector.broadcast %101 : vector<1x1024xf32> to vector<8x1024xf32>
    %105 = arith.addf %103, %104 : vector<8x1024xf32>
    %cst_47 = arith.constant 0.000000e+00 : f32
    %106 = vector.broadcast %cst_47 : f32 to vector<8x1024xf32>
    %107 = arith.cmpf ogt, %105, %106 : vector<8x1024xf32>
    %cst_48 = arith.constant 2.000000e-01 : f32
    %108 = vector.broadcast %cst_48 : f32 to vector<8x1024xf32>
    %109 = arith.mulf %108, %105 : vector<8x1024xf32>
    %110 = arith.select %107, %105, %109 : vector<8x1024xi1>, vector<8x1024xf32>
    %111 = arith.truncf %110 : vector<8x1024xf32> to vector<8x1024xbf16>
    %c0_49 = arith.constant 0 : index
    %c0_50 = arith.constant 0 : index
    %112 = vector.load %arg13[%c0_49, %c0_50] : memref<1024x128xbf16, #tpu.memory_space<vmem>>, vector<1024x128xbf16>
    %cst_51 = arith.constant dense<0.000000e+00> : vector<8x128xf32>
    %113 = tpu.matmul %111, %112, %cst_51 {dimension_numbers = #tpu.dot_dimension_numbers<[1], [0], [0], [1], [0, 0, 1, 1], [], []>} : vector<8x1024xbf16>, vector<1024x128xbf16>, vector<8x128xf32> -> vector<8x128xf32>
    %cst_52 = arith.constant dense<0.000000e+00> : vector<128xf32>
    %114 = vector.multi_reduction <add>, %113, %cst_52 [0] : vector<8x128xf32> to vector<128xf32>
    %115 = vector.shape_cast %114 : vector<128xf32> to vector<1x128xf32>
    %cst_53 = arith.constant 8.000000e+00 : f32
    %116 = vector.broadcast %cst_53 : f32 to vector<1x128xf32>
    %117 = arith.divf %115, %116 : vector<1x128xf32>
    %118 = vector.broadcast %117 : vector<1x128xf32> to vector<8x128xf32>
    %119 = arith.subf %113, %118 : vector<8x128xf32>
    %120 = vector.broadcast %117 : vector<1x128xf32> to vector<8x128xf32>
    %121 = arith.subf %113, %120 : vector<8x128xf32>
    %122 = arith.mulf %119, %121 : vector<8x128xf32>
    %cst_54 = arith.constant dense<0.000000e+00> : vector<128xf32>
    %123 = vector.multi_reduction <add>, %122, %cst_54 [0] : vector<8x128xf32> to vector<128xf32>
    %124 = vector.shape_cast %123 : vector<128xf32> to vector<1x128xf32>
    %cst_55 = arith.constant 8.000000e+00 : f32
    %125 = vector.broadcast %cst_55 : f32 to vector<1x128xf32>
    %126 = arith.divf %124, %125 : vector<1x128xf32>
    %c0_56 = arith.constant 0 : index
    %c0_57 = arith.constant 0 : index
    %127 = vector.load %arg14[%c0_56, %c0_57] : memref<1x128xf32, #tpu.memory_space<vmem>>, vector<1x128xf32>
    %cst_58 = arith.constant 8.000000e-01 : f32
    %128 = vector.broadcast %cst_58 : f32 to vector<1x128xf32>
    %129 = arith.addf %126, %128 : vector<1x128xf32>
    %130 = math.rsqrt %129 : vector<1x128xf32>
    %131 = arith.mulf %127, %130 : vector<1x128xf32>
    %c0_59 = arith.constant 0 : index
    %c0_60 = arith.constant 0 : index
    %132 = vector.load %arg15[%c0_59, %c0_60] : memref<1x128xf32, #tpu.memory_space<vmem>>, vector<1x128xf32>
    %133 = arith.mulf %117, %131 : vector<1x128xf32>
    %134 = arith.subf %132, %133 : vector<1x128xf32>
    %135 = vector.broadcast %131 : vector<1x128xf32> to vector<8x128xf32>
    %136 = arith.mulf %113, %135 : vector<8x128xf32>
    %137 = vector.broadcast %134 : vector<1x128xf32> to vector<8x128xf32>
    %138 = arith.addf %136, %137 : vector<8x128xf32>
    %cst_61 = arith.constant 0.000000e+00 : f32
    %139 = vector.broadcast %cst_61 : f32 to vector<8x128xf32>
    %140 = arith.cmpf ogt, %138, %139 : vector<8x128xf32>
    %cst_62 = arith.constant 2.000000e-01 : f32
    %141 = vector.broadcast %cst_62 : f32 to vector<8x128xf32>
    %142 = arith.mulf %141, %138 : vector<8x128xf32>
    %143 = arith.select %140, %138, %142 : vector<8x128xi1>, vector<8x128xf32>
    %144 = math.tanh %143 : vector<8x128xf32>
    %c0_63 = arith.constant 0 : index
    %c0_64 = arith.constant 0 : index
    %145 = vector.load %arg16[%c0_63, %c0_64] : memref<8x128xf32, #tpu.memory_space<vmem>>, vector<8x128xf32>
    tpu.vector_store %arg16[%c0_63, %c0_64], %144 {strides = array<i32>} : memref<8x128xf32, #tpu.memory_space<vmem>>, vector<8x128xf32>,
    return
  }
  func.func @transform_0(%arg0: i32) -> (i32, i32) {
    %c0_i32 = arith.constant 0 : i32
    %c0_i32_0 = arith.constant 0 : i32
    %c0_i32_1 = arith.constant 0 : i32
    return %c0_i32, %c0_i32_0 : i32, i32
  }
  func.func @transform_1(%arg0: i32) -> (i32, i32) {
    %c0_i32 = arith.constant 0 : i32
    %c0_i32_0 = arith.constant 0 : i32
    %c0_i32_1 = arith.constant 0 : i32
    return %c0_i32, %c0_i32_0 : i32, i32
  }
  func.func @transform_2(%arg0: i32) -> (i32, i32) {
    %c0_i32 = arith.constant 0 : i32
    %c0_i32_0 = arith.constant 0 : i32
    %c0_i32_1 = arith.constant 0 : i32
    return %c0_i32, %c0_i32_0 : i32, i32
  }
  func.func @transform_3(%arg0: i32) -> (i32, i32) {
    %c0_i32 = arith.constant 0 : i32
    %c0_i32_0 = arith.constant 0 : i32
    %c0_i32_1 = arith.constant 0 : i32
    return %c0_i32, %c0_i32_0 : i32, i32
  }
  func.func @transform_4(%arg0: i32) -> (i32, i32) {
    %c0_i32 = arith.constant 0 : i32
    %c0_i32_0 = arith.constant 0 : i32
    %c0_i32_1 = arith.constant 0 : i32
    return %c0_i32, %c0_i32_0 : i32, i32
  }
  func.func @transform_5(%arg0: i32) -> (i32, i32) {
    %c0_i32 = arith.constant 0 : i32
    %c0_i32_0 = arith.constant 0 : i32
    %c0_i32_1 = arith.constant 0 : i32
    return %c0_i32, %c0_i32_0 : i32, i32
  }
  func.func @transform_6(%arg0: i32) -> (i32, i32) {
    %c0_i32 = arith.constant 0 : i32
    %c0_i32_0 = arith.constant 0 : i32
    %c0_i32_1 = arith.constant 0 : i32
    return %c0_i32, %c0_i32_0 : i32, i32
  }
  func.func @transform_7(%arg0: i32) -> (i32, i32) {
    %c0_i32 = arith.constant 0 : i32
    %c0_i32_0 = arith.constant 0 : i32
    %c0_i32_1 = arith.constant 0 : i32
    return %c0_i32, %c0_i32_0 : i32, i32
  }
  func.func @transform_8(%arg0: i32) -> (i32, i32) {
    %c0_i32 = arith.constant 0 : i32
    %c0_i32_0 = arith.constant 0 : i32
    %c0_i32_1 = arith.constant 0 : i32
    return %c0_i32, %c0_i32_0 : i32, i32
  }
  func.func @transform_9(%arg0: i32) -> (i32, i32) {
    %c0_i32 = arith.constant 0 : i32
    %c0_i32_0 = arith.constant 0 : i32
    %c0_i32_1 = arith.constant 0 : i32
    return %c0_i32, %c0_i32_0 : i32, i32
  }
  func.func @transform_10(%arg0: i32) -> (i32, i32) {
    %c0_i32 = arith.constant 0 : i32
    %c0_i32_0 = arith.constant 0 : i32
    %c0_i32_1 = arith.constant 0 : i32
    return %c0_i32, %c0_i32_0 : i32, i32
  }
  func.func @transform_11(%arg0: i32) -> (i32, i32) {
    %c0_i32 = arith.constant 0 : i32
    %c0_i32_0 = arith.constant 0 : i32
    %c0_i32_1 = arith.constant 0 : i32
    return %c0_i32, %c0_i32_0 : i32, i32
  }
  func.func @transform_12(%arg0: i32) -> (i32, i32) {
    %c0_i32 = arith.constant 0 : i32
    %c0_i32_0 = arith.constant 0 : i32
    return %c0_i32, %arg0 : i32, i32
  }
  func.func @transform_13(%arg0: i32) -> (i32, i32) {
    %c0_i32 = arith.constant 0 : i32
    %c0_i32_0 = arith.constant 0 : i32
    return %c0_i32, %arg0 : i32, i32
  }
  func.func @transform_14(%arg0: i32) -> (i32, i32) {
    %c0_i32 = arith.constant 0 : i32
    %c0_i32_0 = arith.constant 0 : i32
    return %c0_i32, %arg0 : i32, i32
  }
  func.func @transform_15(%arg0: i32) -> (i32, i32) {
    %c0_i32 = arith.constant 0 : i32
    %c0_i32_0 = arith.constant 0 : i32
    return %c0_i32, %arg0 : i32, i32
  }
}

</mosaic_0001>

<bundles_post_ra>
// kernel: _generator_forward_padded.1
= control target key start
LH: loop header
LB: loop body
LE: loop exit
PB: predicated region body
PF: predicated region fallthrough
CT: control target
= control target key end

     0   :  { %s7304_s0 = inlined_call_operand.hbm [shape: f32[8,256], index: 0, kind: input, shape index: {}]   ;;  %s7305_s1 = inlined_call_operand.hbm [shape: bf16[256,128], index: 1, kind: input, shape index: {}]   ;;  %s7306_s2 = inlined_call_operand.hbm [shape: f32[1,128], index: 2, kind: input, shape index: {}]   ;;  %s7307_s3 = inlined_call_operand.hbm [shape: bf16[128,256], index: 3, kind: input, shape index: {}]   ;;  %s7308_s4 = inlined_call_operand.hbm [shape: f32[1,256], index: 4, kind: input, shape index: {}]   ;;  %s7309_s5 = inlined_call_operand.hbm [shape: f32[1,256], index: 5, kind: input, shape index: {}]   ;;  %s7310_s6 = inlined_call_operand.hbm [shape: bf16[256,512], index: 6, kind: input, shape index: {}]   ;;  %s7311_s7 = inlined_call_operand.hbm [shape: f32[1,512], index: 7, kind: input, shape index: {}]   ;;  %s7312_s8 = inlined_call_operand.hbm [shape: f32[1,512], index: 8, kind: input, shape index: {}]   ;;  %s7313_s9 = inlined_call_operand.hbm [shape: bf16[512,1024], index: 9, kind: input, shape index: {}]   ;;  %s7314_s10 = inlined_call_operand.hbm [shape: f32[1,1024], index: 10, kind: input, shape index: {}]   ;;  %s7315_s11 = inlined_call_operand.hbm [shape: f32[1,1024], index: 11, kind: input, shape index: {}]   ;;  %s7316_s12 = inlined_call_operand.hbm [shape: bf16[1024,896], index: 12, kind: input, shape index: {}]   ;;  %s7317_s13 = inlined_call_operand.hbm [shape: f32[1,896], index: 13, kind: input, shape index: {}]   ;;  %s7318_s14 = inlined_call_operand.hbm [shape: f32[1,896], index: 14, kind: input, shape index: {}]   ;;  %s7319_s15 = inlined_call_operand.hbm [shape: f32[8,896], index: 15, kind: output, shape index: {}]  }
   0x1   :  { %7349 = sst [smem:[#allocation45_spill]] %s7304_s0 }
   0x2   :  { %7350 = sst [smem:[#allocation46_spill]] %s7305_s1 }
   0x3   :  { %7351 = sst [smem:[#allocation47_spill]] %s7307_s3 }
   0x4   :  { %7352 = sst [smem:[#allocation48_spill]] %s7309_s5 }
   0x5   :  { %7353 = sst [smem:[#allocation49_spill]] %s7311_s7 }
   0x6   :  { %7354 = sst [smem:[#allocation50_spill]] %s7315_s11 }
   0x7   :  { %7355 = sst [smem:[#allocation51_spill]] %s7319_s15 }
   0x8   :  { %20 = vsyncpa [#allocation3], 0 }
   0x9   :  { %21 = vsyncpa [#allocation6], 0 }
   0xa   :  { %22 = vsyncpa [#allocation9], 0 }
   0xb   :  { %23 = vsyncpa [#allocation12], 0 }
   0xc   :  { %24 = vsyncpa [#allocation15], 0 }
   0xd   :  { %25 = vsyncpa [#allocation18], 0 }
   0xe   :  { %26 = vsyncpa [#allocation21], 0 }
   0xf   :  { %27 = vsyncpa [#allocation4], 0 }
  0x10   :  { %29 = vsyncpa [#allocation4 + $0x1], 0  ;;  %s6628_s18 = smov 0   ;;  %s6630_s19 = smov 0  }
  0x11   :  { %s6632_s20 = smov 0   ;;  %s6634_s21 = smov 0  }
  0x12 LB: > { %7356 = sst [smem:[#allocation35_spill]] %s6507_s18  ;;  %s6521_s22 = smov [#allocation2]   ;;  %s6519_s21 = sphi %s6634_s21, %s7415_s21   ;;  %s6515_s20 = sphi %s6632_s20, %s7418_s20   ;;  %s6511_s19 = sphi %s6630_s19, %s7417_s19   ;;  %s6507_s18 = sphi %s6628_s18, %s7416_s18  }
  0x13   : > { %7357 = sst [smem:[#allocation36_spill]] %s6511_s19  ;;  %s409_s23 = sshll.u32 %s6521_s22, 4  ;;  %s410_s23 = int_to_ptr.vmem [resolvable:$true] %s409_s23 }
  0x14   : > { %7358 = sst [smem:[#allocation37_spill]] %s6515_s20  ;;  %s6649_s24 = sadd.s32 4294967295, %s6519_s21  }
  0x15   : > { %7359 = sst [smem:[#allocation38_spill]] %s6649_s24  ;;  %p5047_p0 = scmp.ge.s32.totalorder %s6519_s21, 1 }
  0x16   : > { %p7334_p1 = scmp.eq.s32.totalorder %s6649_s24, 0  ;;  %p396_p2 = scmp.lt.s32.totalorder %s6519_s21, 8 }
  0x17   : > { %s5046_s27 = sadd.s32 4294967294, %s6519_s21   ;;  %s6668_s28 = sadd.s32 1, %s6519_s21  }
  0x18   : > { %p6654_p3 = pnand %p5047_p0, %p396_p2  ;;  %7363 = sst [smem:[#allocation40_spill]] %s6668_s28 }
  0x19   : > { %s291_s29 = ssub.s32 %s6519_s21, %s6668_s28  ;;  %s6042_s16 = scalar_lea.vmem %s410_s23, 256 }
  0x1a   : > { %s7360_s25 = scalar_select %p6654_p3, 1, 0 }
  0x1b   : > { %p5667_p4 = pneg %p6654_p3  ;;  %p6043_p7 = scmp.ne.s32.totalorder %s410_s23, %s6042_s16 }
  0x1c   : > { %7361 = sst [smem:[#allocation39_spill]] %s7360_s25  ;;  %p6050_p10 = scmp.lt.s32.totalorder %s410_s23, %s410_s23 }
  0x1d   : > { %p6662_p5 = pnand %p5667_p4, %p7334_p1  ;;  %p6051_p11 = scmp.lt.s32.totalorder %s6042_s16, %s6042_s16 }
  0x1f   : > { %s7362_s26 = scalar_select %p6662_p5, 1, 0 }
  0x20   : > { %p6674_p6 = pneg %p6662_p5  ;;  %p6052_p12 = por %p6051_p11, %p6050_p10 }
  0x22   : > { %s7364_s30 = scalar_select %p6674_p6, 1, 0 }
  0x23   : > { %p6045_p8 = pnand %p6043_p7, %p6674_p6 }
  0x25   : > { %p6046_p9 = pneg %p6045_p8 }
  0x27   : > { %p6053_p13 = pnand %p6052_p12, %p6046_p9 }
  0x29   : > { %6056 = shalt.err (!%p6053_p13)
}
  0x2a   : > { %s7365_s0 = sld [smem:[#allocation45_spill]]  ;;  %p292_p0 = scmp.eq.s32.totalorder %s291_s29, 0 }
  0x2b   : > { %s294_s16 = sadd.s32 1, %s6515_s20  ;;  %p301_p2 = scmp.ne.s32.totalorder %s6515_s20, %s6511_s19 }
  0x2c   : > { %p302_p4 = scmp.eq.s32.totalorder %s6519_s21, 0  ;;  %p307_p8 = scmp.ne.s32.totalorder %s6511_s19, %s6507_s18 }
  0x2d   : > { %s6690_s28 = scalar_select %p292_p0, %s6515_s20, %s294_s16  }
  0x2e   : > { %p6692_p7 = por %p302_p4, %p301_p2  ;;  %p383_p9 = scmp.eq.s32.totalorder %s6649_s24, 6 }
  0x2f   : > { %7366 = sst [smem:[#allocation41_spill]] %s6690_s28  ;;  %p389_p10 = scmp.eq.s32.totalorder %s5046_s27, 6 }
  0x30   : > { %5670 = dma.hbm_to_vmem [thread:$0]  (!%p6662_p5), %s7365_s0, 256, %s410_s23, [#allocation3]  }
  0x31   : > { %p6701_p11 = por %p7334_p1, %p307_p8  ;;  %p6705_p12 = por %p383_p9, %p301_p2 }
  0x32   : > { %p6709_p13 = por %p389_p10, %p307_p8  ;;  %p5730_p0 = scmp.lt.s32.totalorder %s6519_s21, 7 }
  0x33   : > { %s7368_s22 = scalar_select %p6701_p11, 1, 0 }
  0x34   : > { %s7370_s23 = scalar_select %p6705_p12, 1, 0 }
  0x35   : > { %7369 = sst [smem:[#allocation42_spill]] %s7368_s22  ;;  %s549_s16 = sand.u32 1, %s6519_s21  }
  0x36   : > { %7371 = sst [smem:[#allocation43_spill]] %s7370_s23  ;;  %s6716_s0 = sand.u32 1, %s6515_s20  }
  0x37   : > { %s7372_s29 = scalar_select %p6709_p13, 1, 0 }
  0x38   : > { %s5061_s28 = sshll.u32 %s6716_s0, 9  ;;  %s5062_s27 = sshll.u32 %s6519_s21, 6 }
  0x39   : > { %7373 = sst [smem:[#allocation44_spill]] %s7372_s29  ;;  %s6723_s19 = scalar_lea.hbm %s7316_s12, %s5062_s27 }
  0x3a   : > { %s553_s23 = scalar_lea.vmem [#allocation22], %s5061_s28  ;;  %p6729_p2 = pnand %p5730_p0, %p6692_p7 }
  0x3b   : > { %s559_s22 = sshll.u32 %s553_s23, 4  ;;  %s6522_s20 = smov [#allocation5]   ;;  %s6725_s22 = int_to_ptr.vmem [resolvable:$true] %s559_s22 }
  0x3c   : > { %s7374_s29 = scalar_select %p6729_p2, 1, 0 }
  0x3d   : > { %s6733_s24 = sshll.u32 %s6522_s20, 4  ;;  %s6735_s25 = scalar_lea.sflag [#allocation3], %s549_s16  ;;  %s420_s24 = int_to_ptr.vmem [resolvable:$true] %s6733_s24 }
  0x3e   : > { %s6057_s15 = scalar_lea.hbm %s6723_s19, 8192  ;;  %p6741_p8 = pneg %p6729_p2 }
  0x3f   : > { %p6058_p4 = scmp.ne.s32.totalorder %s6723_s19, %s6057_s15  ;;  %s6062_s23 = scalar_lea.hbm %s7316_s12, 57344 }
  0x40   : > { %s7375_s18 = scalar_select %p6741_p8, 1, 0 }
  0x41   : > { %p6060_p9 = pnand %p6741_p8, %p6058_p4  ;;  %p6063_p10 = scmp.lt.s32.totalorder %s6723_s19, %s7316_s12 }
  0x42   : > { %p6064_p0 = scmp.lt.s32.totalorder %s6062_s23, %s6057_s15 }
  0x43   : > { %p6061_p7 = pneg %p6060_p9 }
  0x44   : > { %p6065_p1 = por %p6064_p0, %p6063_p10 }
  0x46   : > { %p6066_p13 = pnand %p6065_p1, %p6061_p7 }
  0x48   : > { %6069 = shalt.err (!%p6066_p13)
}
  0x49   : > { %s6070_s16 = scalar_lea.vmem %s6725_s22, 8192  ;;  %s6523_s11 = smov [#allocation22]  }
  0x4a   : > { %p6071_p12 = scmp.ne.s32.totalorder %s6725_s22, %s6070_s16  ;;  %s6075_s28 = sshll.u32 %s6523_s11, 4  ;;  %s6076_s28 = int_to_ptr.vmem [resolvable:$false] %s6075_s28 }
  0x4b   : > { %s6077_s17 = scalar_lea.vmem %s6076_s28, 16384  ;;  %p6078_p11 = scmp.lt.s32.totalorder %s6725_s22, %s6076_s28 }
  0x4c   : > { %p6073_p4 = pnand %p6071_p12, %p6741_p8  ;;  %p6079_p3 = scmp.lt.s32.totalorder %s6077_s17, %s6070_s16 }
  0x4e   : > { %p6074_p9 = pneg %p6073_p4  ;;  %p6080_p5 = por %p6079_p3, %p6078_p11 }
  0x50   : > { %p6081_p6 = pnand %p6080_p5, %p6074_p9 }
  0x52   : > { %6084 = shalt.err (!%p6081_p6)
}
  0x53   : > { %s6524_s15 = smov 448   ;;  %s6525_s23 = smov 64  }
  0x54   : > { %s6526_s27 = smov 4   ;;  %s6096_s11 = scalar_lea.vmem %s420_s24, 2048 }
  0x55   : > { %5707 = dma.hbm_to_vmem [thread:$0]  (!%p6729_p2), %s6723_s19, 8192, %s6725_s22, %s6735_s25, %s6524_s15, %s6525_s23, %s6526_s27  }
  0x56   : > { %p6097_p1 = scmp.ne.s32.totalorder %s420_s24, %s6096_s11  ;;  %p7376_p12 = scmp.ne.s32.totalorder %s7364_s30, 0 }
  0x57   : > { %p6104_p3 = scmp.lt.s32.totalorder %s420_s24, %s420_s24  ;;  %p6105_p5 = scmp.lt.s32.totalorder %s6096_s11, %s6096_s11 }
  0x58   : > { %p6099_p13 = pnand %p6097_p1, %p7376_p12 }
  0x59   : > { %p6106_p6 = por %p6105_p5, %p6104_p3 }
  0x5a   : > { %p6100_p7 = pneg %p6099_p13 }
  0x5c   : > { %p6107_p11 = pnand %p6106_p6, %p6100_p7 }
  0x5e   : > { %6110 = shalt.err (!%p6107_p11)
}
  0x5f   : > { %p7377_p10 = scmp.ne.s32.totalorder %s7362_s26, 0  ;;  %s7378_s1 = sld [smem:[#allocation46_spill]] }
  0x60   : > { %s6527_s28 = smov [#allocation8]  }
  0x61   : > { %s443_s19 = sshll.u32 %s6527_s28, 4  ;;  %s444_s19 = int_to_ptr.vmem [resolvable:$true] %s443_s19 }
  0x62   : > { %s6122_s22 = scalar_lea.vmem %s444_s19, 2048  ;;  %p6130_p1 = scmp.lt.s32.totalorder %s444_s19, %s444_s19 }
  0x63   : > { %p6123_p0 = scmp.ne.s32.totalorder %s444_s19, %s6122_s22  ;;  %p6131_p13 = scmp.lt.s32.totalorder %s6122_s22, %s6122_s22 }
  0x65   : > { %5673 = dma.hbm_to_vmem [thread:$0]  (!%p7377_p10), %s7378_s1, 2048, %s420_s24, [#allocation6], %s6525_s23, %s6525_s23, %s6526_s27  }
  0x66   : > { %p6125_p4 = pnand %p6123_p0, %p7376_p12  ;;  %p6132_p3 = por %p6131_p13, %p6130_p1 }
  0x68   : > { %p6126_p9 = pneg %p6125_p4 }
  0x6a   : > { %p6133_p7 = pnand %p6132_p3, %p6126_p9 }
  0x6c   : > { %6136 = shalt.err (!%p6133_p7)
}
  0x6d   : > { %s6528_s17 = smov 128   ;;  %s6529_s15 = smov 8  }
  0x6e   : > { %s7379_s3 = sld [smem:[#allocation47_spill]]  ;;  %s6530_s23 = smov [#allocation11]  }
  0x6f   : > { %s468_s27 = sshll.u32 %s6530_s23, 4  ;;  %s6531_s20 = smov [#allocation14]   ;;  %s469_s27 = int_to_ptr.vmem [resolvable:$true] %s468_s27 }
  0x70   : > { %s492_s16 = sshll.u32 %s6531_s20, 4  ;;  %s6148_s28 = scalar_lea.vmem %s469_s27, 32  ;;  %s493_s16 = int_to_ptr.vmem [resolvable:$true] %s492_s16 }
  0x71   : > { %p6149_p5 = scmp.ne.s32.totalorder %s469_s27, %s6148_s28  ;;  %p6156_p0 = scmp.lt.s32.totalorder %s469_s27, %s469_s27 }
  0x72   : > { %p6157_p4 = scmp.lt.s32.totalorder %s6148_s28, %s6148_s28 }
  0x73   : > { %p6151_p6 = pnand %p6149_p5, %p7376_p12 }
  0x74   : > { %5679 = dma.hbm_to_vmem [thread:$0]  (!%p7377_p10), %s7379_s3, 2048, %s444_s19, [#allocation9], %s6528_s17, %s6528_s17, %s6529_s15  }
  0x75   : > { %p6152_p11 = pneg %p6151_p6  ;;  %p6158_p9 = por %p6157_p4, %p6156_p0 }
  0x77   : > { %p6159_p1 = pnand %p6158_p9, %p6152_p11 }
  0x79   : > { %6162 = shalt.err (!%p6159_p1)
}
  0x7a   : > { %s7380_s5 = sld [smem:[#allocation48_spill]]  ;;  %s6174_s17 = scalar_lea.vmem %s493_s16, 64 }
  0x7b   : > { %p6175_p13 = scmp.ne.s32.totalorder %s493_s16, %s6174_s17  ;;  %p6182_p2 = scmp.lt.s32.totalorder %s493_s16, %s493_s16 }
  0x7c   : > { %p6183_p5 = scmp.lt.s32.totalorder %s6174_s17, %s6174_s17 }
  0x7d   : > { %p6177_p3 = pnand %p6175_p13, %p7376_p12 }
  0x7e   : > { %p6184_p6 = por %p6183_p5, %p6182_p2 }
  0x7f   : > { %p6178_p7 = pneg %p6177_p3 }
  0x80   : > { %5685 = dma.hbm_to_vmem [thread:$0]  (!%p7377_p10), %s7380_s5, 32, %s469_s27, [#allocation12]  }
  0x81   : > { %p6185_p8 = pnand %p6184_p6, %p6178_p7 }
  0x83   : > { %6188 = shalt.err (!%p6185_p8)
}
  0x84   : > { %s7381_s7 = sld [smem:[#allocation49_spill]]  ;;  %s6532_s24 = smov [#allocation17]  }
  0x85   : > { %s513_s23 = sshll.u32 %s6532_s24, 4  ;;  %s514_s23 = int_to_ptr.vmem [resolvable:$true] %s513_s23 }
  0x86   : > { %s6200_s27 = scalar_lea.vmem %s514_s23, 32768  ;;  %p6208_p9 = scmp.lt.s32.totalorder %s514_s23, %s514_s23 }
  0x87   : > { %p6201_p11 = scmp.ne.s32.totalorder %s514_s23, %s6200_s27  ;;  %p6209_p1 = scmp.lt.s32.totalorder %s6200_s27, %s6200_s27 }
  0x89   : > { %p6203_p0 = pnand %p6201_p11, %p7376_p12  ;;  %p6210_p2 = por %p6209_p1, %p6208_p9 }
  0x8a   : > { %5691 = dma.hbm_to_vmem [thread:$0]  (!%p7377_p10), %s7381_s7, 64, %s493_s16, [#allocation15]  }
  0x8b   : > { %p6204_p4 = pneg %p6203_p0 }
  0x8d   : > { %p6211_p13 = pnand %p6210_p2, %p6204_p4 }
  0x8f   : > { %6214 = shalt.err (!%p6211_p13)
}
  0x90   : > { %s6533_s20 = smov 512   ;;  %s6534_s16 = smov 32  }
  0x91   : > { %5697 = dma.hbm_to_vmem [thread:$0]  (!%p7377_p10), %s7313_s9, 32768, %s514_s23, [#allocation18], %s6533_s20, %s6533_s20, %s6534_s16  }
  0x92   : > { %s5063_s19 = sshll.u32 %s6519_s21, 4  ;;  %s572_s17 = scalar_lea.vmem [#allocation23], %s6716_s0 }
  0x93   : > { %s579_s15 = sshll.u32 %s572_s17, 4  ;;  %s577_s27 = scalar_lea.hbm %s7317_s13, %s5063_s19  ;;  %s580_s15 = int_to_ptr.vmem [resolvable:$true] %s579_s15 }
  0x94   : > { %s6215_s1 = scalar_lea.hbm %s577_s27, 16  ;;  %p7382_p3 = scmp.ne.s32.totalorder %s7375_s18, 0 }
  0x95   : > { %p6216_p8 = scmp.ne.s32.totalorder %s577_s27, %s6215_s1  ;;  %s6220_s7 = scalar_lea.hbm %s7317_s13, 112 }
  0x96   : > { %p6221_p6 = scmp.lt.s32.totalorder %s577_s27, %s7317_s13  ;;  %p6222_p11 = scmp.lt.s32.totalorder %s6220_s7, %s6215_s1 }
  0x97   : > { %p6218_p7 = pnand %p6216_p8, %p7382_p3 }
  0x98   : > { %p6223_p0 = por %p6222_p11, %p6221_p6 }
  0x99   : > { %p6219_p5 = pneg %p6218_p7 }
  0x9b   : > { %p6224_p4 = pnand %p6223_p0, %p6219_p5 }
  0x9d   : > { %6227 = shalt.err (!%p6224_p4)
}
  0x9e   : > { %s6228_s20 = scalar_lea.vmem %s580_s15, 16  ;;  %s6535_s16 = smov [#allocation23]  }
  0x9f   : > { %p6229_p9 = scmp.ne.s32.totalorder %s580_s15, %s6228_s20  ;;  %s6233_s22 = sshll.u32 %s6535_s16, 4  ;;  %s6234_s22 = int_to_ptr.vmem [resolvable:$false] %s6233_s22 }
  0xa0   : > { %s6235_s17 = scalar_lea.vmem %s6234_s22, 32  ;;  %p6236_p13 = scmp.lt.s32.totalorder %s580_s15, %s6234_s22 }
  0xa1   : > { %p6231_p1 = pnand %p6229_p9, %p7382_p3  ;;  %p6237_p8 = scmp.lt.s32.totalorder %s6235_s17, %s6228_s20 }
  0xa3   : > { %p6232_p2 = pneg %p6231_p1  ;;  %p6238_p7 = por %p6237_p8, %p6236_p13 }
  0xa5   : > { %p6239_p10 = pnand %p6238_p7, %p6232_p2 }
  0xa7   : > { %6242 = shalt.err (!%p6239_p10)
}
  0xa8   : > { %p7383_p12 = scmp.ne.s32.totalorder %s7374_s29, 0  ;;  %s6536_s1 = smov [#allocation7]  }
  0xa9   : > { %s433_s3 = sshll.u32 %s6536_s1, 4  ;;  %s6537_s5 = smov [#allocation10]   ;;  %s434_s3 = int_to_ptr.vmem [resolvable:$true] %s433_s3 }
  0xaa   : > { %5710 = dma.hbm_to_vmem [thread:$0]  (!%p7383_p12), %s577_s27, 16, %s580_s15, %s6735_s25  }
  0xab   : > { %s457_s7 = sshll.u32 %s6537_s5, 4  ;;  %s6254_s11 = scalar_lea.vmem %s434_s3, 16  ;;  %s458_s7 = int_to_ptr.vmem [resolvable:$true] %s457_s7 }
  0xac   : > { %p6255_p5 = scmp.ne.s32.totalorder %s434_s3, %s6254_s11  ;;  %p7384_p6 = scmp.ne.s32.totalorder %s7364_s30, 0 }
  0xad   : > { %s6261_s24 = scalar_lea.vmem %s434_s3, 32  ;;  %p6262_p4 = scmp.lt.s32.totalorder %s434_s3, %s434_s3 }
  0xae   : > { %p6257_p11 = pnand %p6255_p5, %p7384_p6  ;;  %p6263_p9 = scmp.lt.s32.totalorder %s6261_s24, %s6254_s11 }
  0xb0   : > { %p6258_p0 = pneg %p6257_p11  ;;  %p6264_p10 = por %p6263_p9, %p6262_p4 }
  0xb2   : > { %p6265_p1 = pnand %p6264_p10, %p6258_p0 }
  0xb4   : > { %6268 = shalt.err (!%p6265_p1)
}
  0xb5   : > { %p7385_p2 = scmp.ne.s32.totalorder %s7362_s26, 0  ;;  %s6280_s28 = scalar_lea.vmem %s458_s7, 32 }
  0xb6   : > { %p6281_p13 = scmp.ne.s32.totalorder %s458_s7, %s6280_s28  ;;  %p6288_p5 = scmp.lt.s32.totalorder %s458_s7, %s458_s7 }
  0xb7   : > { %5676 = dma.hbm_to_vmem [thread:$0]  (!%p7385_p2), %s7306_s2, 16, %s434_s3, [#allocation6]  }
  0xb8   : > { %p6283_p8 = pnand %p6281_p13, %p7384_p6  ;;  %p6289_p11 = scmp.lt.s32.totalorder %s6280_s28, %s6280_s28 }
  0xba   : > { %p6284_p7 = pneg %p6283_p8  ;;  %p6290_p12 = por %p6289_p11, %p6288_p5 }
  0xbc   : > { %p6291_p3 = pnand %p6290_p12, %p6284_p7 }
  0xbe   : > { %6294 = shalt.err (!%p6291_p3)
}
  0xbf   : > { %5682 = dma.hbm_to_vmem [thread:$0]  (!%p7385_p2), %s7308_s4, 32, %s458_s7, [#allocation9]  }
  0xc0   : > { %s6538_s16 = smov [#allocation13]  }
  0xc1   : > { %s478_s22 = sshll.u32 %s6538_s16, 4  ;;  %s479_s22 = int_to_ptr.vmem [resolvable:$true] %s478_s22 }
  0xc2   : > { %s6306_s17 = scalar_lea.vmem %s479_s22, 8192  ;;  %p6314_p10 = scmp.lt.s32.totalorder %s479_s22, %s479_s22 }
  0xc3   : > { %p6307_p0 = scmp.ne.s32.totalorder %s479_s22, %s6306_s17  ;;  %p6315_p1 = scmp.lt.s32.totalorder %s6306_s17, %s6306_s17 }
  0xc5   : > { %p6309_p4 = pnand %p6307_p0, %p7384_p6  ;;  %p6316_p13 = por %p6315_p1, %p6314_p10 }
  0xc7   : > { %p6310_p9 = pneg %p6309_p4 }
  0xc9   : > { %p6317_p12 = pnand %p6316_p13, %p6310_p9 }
  0xcb   : > { %6320 = shalt.err (!%p6317_p12)
}
  0xcc   : > { %s6539_s1 = smov 256   ;;  %s6540_s3 = smov 16  }
  0xcd   : > { %5688 = dma.hbm_to_vmem [thread:$0]  (!%p7385_p2), %s7310_s6, 8192, %s479_s22, [#allocation12], %s6539_s1, %s6539_s1, %s6540_s3  }
  0xce   : > { %s6541_s11 = smov [#allocation16]   ;;  %s6542_s15 = smov [#allocation19]  }
  0xcf   : > { %s503_s24 = sshll.u32 %s6541_s11, 4  ;;  %s527_s27 = sshll.u32 %s6542_s15, 4  ;;  %s504_s24 = int_to_ptr.vmem [resolvable:$true] %s503_s24  ;;  %s528_s27 = int_to_ptr.vmem [resolvable:$true] %s527_s27 }
  0xd0   : > { %s6332_s28 = scalar_lea.vmem %s504_s24, 64  ;;  %p6340_p5 = scmp.lt.s32.totalorder %s504_s24, %s504_s24 }
  0xd1   : > { %p6333_p3 = scmp.ne.s32.totalorder %s504_s24, %s6332_s28  ;;  %p6341_p11 = scmp.lt.s32.totalorder %s6332_s28, %s6332_s28 }
  0xd3   : > { %p6335_p8 = pnand %p6333_p3, %p7384_p6  ;;  %p6342_p0 = por %p6341_p11, %p6340_p5 }
  0xd5   : > { %p6336_p7 = pneg %p6335_p8 }
  0xd7   : > { %p6343_p4 = pnand %p6342_p0, %p6336_p7 }
  0xd9   : > { %6346 = shalt.err (!%p6343_p4)
}
  0xda   : > { %5694 = dma.hbm_to_vmem [thread:$0]  (!%p7385_p2), %s7312_s8, 64, %s504_s24, [#allocation15]  }
  0xdb   : > { %s6358_s16 = scalar_lea.vmem %s528_s27, 128  ;;  %p6366_p13 = scmp.lt.s32.totalorder %s528_s27, %s528_s27 }
  0xdc   : > { %p6359_p9 = scmp.ne.s32.totalorder %s528_s27, %s6358_s16  ;;  %p6367_p12 = scmp.lt.s32.totalorder %s6358_s16, %s6358_s16 }
  0xde   : > { %p6361_p10 = pnand %p6359_p9, %p7384_p6  ;;  %p6368_p3 = por %p6367_p12, %p6366_p13 }
  0xe0   : > { %p6362_p1 = pneg %p6361_p10 }
  0xe2   : > { %p6369_p8 = pnand %p6368_p3, %p6362_p1 }
  0xe4   : > { %6372 = shalt.err (!%p6369_p8)
}
  0xe5   : > { %5700 = dma.hbm_to_vmem [thread:$0]  (!%p7385_p2), %s7314_s10, 128, %s528_s27, [#allocation18]  }
  0xe6   : > { %s6543_s1 = smov [#allocation20]   ;;  %s6860_s11 = scalar_lea.hbm %s7318_s14, %s5063_s19 }
  0xe7   : > { %s538_s3 = sshll.u32 %s6543_s1, 4  ;;  %s539_s3 = int_to_ptr.vmem [resolvable:$true] %s538_s3 }
  0xe8   : > { %s6384_s24 = scalar_lea.vmem %s539_s3, 128  ;;  %p6392_p0 = scmp.lt.s32.totalorder %s539_s3, %s539_s3 }
  0xe9   : > { %p6385_p7 = scmp.ne.s32.totalorder %s539_s3, %s6384_s24  ;;  %p6393_p4 = scmp.lt.s32.totalorder %s6384_s24, %s6384_s24 }
  0xeb   : > { %p6387_p5 = pnand %p6385_p7, %p7384_p6  ;;  %p6394_p9 = por %p6393_p4, %p6392_p0 }
  0xed   : > { %p6388_p11 = pneg %p6387_p5 }
  0xef   : > { %p6395_p10 = pnand %p6394_p9, %p6388_p11 }
  0xf1   : > { %6398 = shalt.err (!%p6395_p10)
}
  0xf2   : > { %s7386_s28 = sld [smem:[#allocation50_spill]]  ;;  %s589_s19 = scalar_lea.vmem [#allocation24], %s6716_s0 }
  0xf3   : > { %s596_s30 = sshll.u32 %s589_s19, 4  ;;  %s6399_s23 = scalar_lea.hbm %s6860_s11, 16  ;;  %s597_s30 = int_to_ptr.vmem [resolvable:$true] %s596_s30 }
  0xf4   : > { %p6400_p6 = scmp.ne.s32.totalorder %s6860_s11, %s6399_s23  ;;  %p7387_p1 = scmp.ne.s32.totalorder %s7375_s18, 0 }
  0xf5   : > { %s6404_s26 = scalar_lea.hbm %s7318_s14, 112  ;;  %p6405_p3 = scmp.lt.s32.totalorder %s6860_s11, %s7318_s14 }
  0xf6   : > { %p6402_p13 = pnand %p6400_p6, %p7387_p1  ;;  %p6406_p8 = scmp.lt.s32.totalorder %s6404_s26, %s6399_s23 }
  0xf8   : > { %5703 = dma.hbm_to_vmem [thread:$0]  (!%p7385_p2), %s7386_s28, 128, %s539_s3, [#allocation21]  }
  0xf9   : > { %p6403_p12 = pneg %p6402_p13  ;;  %p6407_p7 = por %p6406_p8, %p6405_p3 }
  0xfb   : > { %p6408_p5 = pnand %p6407_p7, %p6403_p12 }
  0xfd   : > { %6411 = shalt.err (!%p6408_p5)
}
  0xfe   : > { %s6412_s0 = scalar_lea.vmem %s597_s30, 16  ;;  %s6544_s1 = smov [#allocation24]  }
  0xff   : > { %p6413_p2 = scmp.ne.s32.totalorder %s597_s30, %s6412_s0  ;;  %s6417_s3 = sshll.u32 %s6544_s1, 4  ;;  %s6418_s3 = int_to_ptr.vmem [resolvable:$false] %s6417_s3 }
 0x100   : > { %s6419_s5 = scalar_lea.vmem %s6418_s3, 32  ;;  %p6420_p4 = scmp.lt.s32.totalorder %s597_s30, %s6418_s3 }
 0x101   : > { %p6415_p11 = pnand %p6413_p2, %p7387_p1  ;;  %p6421_p9 = scmp.lt.s32.totalorder %s6419_s5, %s6412_s0 }
 0x103   : > { %p6416_p0 = pneg %p6415_p11  ;;  %p6422_p10 = por %p6421_p9, %p6420_p4 }
 0x105   : > { %p6423_p6 = pnand %p6422_p10, %p6416_p0 }
 0x107   : > { %6426 = shalt.err (!%p6423_p6)
}
 0x108   : > { %p7388_p13 = scmp.ne.s32.totalorder %s7374_s29, 0  ;;  %s7389_s7 = sld [smem:[#allocation39_spill]] }
 0x10a   : > { %5713 = dma.hbm_to_vmem [thread:$0]  (!%p7388_p13), %s6860_s11, 16, %s597_s30, %s6735_s25  }
 0x10e   : > { %p7390_p12 = scmp.ne.s32.totalorder %s7389_s7, 0 }
 0x10f   : > { %s7391_s18 = sld [smem:[#allocation38_spill]] (!%p7390_p12) }
 0x110   : > { %605 = sbr.rel (%p7390_p12) target bundleno = 1895 (0x767), region = 80 }
 0x115   : > { %p7392_p1 = scmp.eq.s32.totalorder %s7391_s18, 0 }
 0x117   : > { %6470 = dma.done.wait (%p7392_p1), [#allocation3], 256   ;;  %p7393_p3 = pmov %p7392_p1 }
 0x118   : > { %p7394_p8 = pmov %p7392_p1 }
 0x119   : > { %6472 = vsyncadd (%p7393_p3), [#allocation3], 4294967040 }
 0x11a   : > { %6474 = dma.done.wait (%p7394_p8), [#allocation6], 2064   ;;  %p7395_p7 = pmov %p7392_p1 }
 0x11b   : > { %p7396_p5 = pmov %p7392_p1 }
 0x11c   : > { %6476 = vsyncadd (%p7395_p7), [#allocation6], 4294965232 }
 0x11d   : > { %6478 = dma.done.wait (%p7396_p5), [#allocation9], 2080   ;;  %p7397_p2 = pmov %p7392_p1 }
 0x11e   : > { %p7398_p11 = pmov %p7392_p1 }
 0x11f   : > { %6480 = vsyncadd (%p7397_p2), [#allocation9], 4294965216 }
 0x120   : > { %6482 = dma.done.wait (%p7398_p11), [#allocation12], 8224   ;;  %p7399_p0 = pmov %p7392_p1 }
 0x122   : > { %6484 = vsyncadd (%p7399_p0), [#allocation12], 4294959072  ;;  %p7400_p4 = pmov %p7399_p0 }
 0x123   : > { %p7401_p9 = pmov %p7399_p0 }
 0x124   : > { %6486 = dma.done.wait (%p7400_p4), [#allocation15], 128  }
 0x125   : > { %6488 = vsyncadd (%p7401_p9), [#allocation15], 4294967168  ;;  %p7402_p10 = pmov %p7399_p0 }
 0x126   : > { %p7403_p6 = pmov %p7399_p0 }
 0x127   : > { %6490 = dma.done.wait (%p7402_p10), [#allocation18], 32896  }
 0x128   : > { %6492 = vsyncadd (%p7403_p6), [#allocation18], 4294934400  ;;  %p7404_p13 = pmov %p7399_p0 }
 0x129   : > { %p7405_p12 = pmov %p7399_p0 }
 0x12a   : > { %6494 = dma.done.wait (%p7404_p13), [#allocation21], 128  }
 0x12b   : > { %6496 = vsyncadd (%p7405_p12), [#allocation21], 4294967168  ;;  %s7406_s25 = sld [smem:[#allocation36_spill]]  ;;  %s655_s11 = sand.u32 1, %s7391_s18  }
 0x12c   : > { %s7407_s29 = sld [smem:[#allocation42_spill]]  ;;  %s656_s27 = scalar_lea.sflag [#allocation3], %s655_s11 }
 0x131   : > { %s6919_s24 = sand.u32 1, %s7406_s25  }
 0x132   : > { %s5078_s15 = sshll.u32 %s6919_s24, 9  ;;  %p7408_p1 = scmp.ne.s32.totalorder %s7407_s29, 0 }
 0x133   : > { %s6922_s28 = scalar_lea.vmem [#allocation22], %s5078_s15 }
 0x134   : > { %6498 = dma.done.wait (%p7408_p1), %s656_s27, 8224  }
 0x135   : > { %6500 = vsyncadd (%p7408_p1), %s656_s27, 4294959072  ;;  %v5799_v0 = vld [vmem:[#allocation5 + $0x78] sm:$0xff]   ;;  %v5801_v2 = vld [vmem:[#allocation5 + $0x70] sm:$0xff]   ;;  %v6545_v36 = vmov 0   ;;  %s667_s19 = scalar_lea.vmem [#allocation23], %s6919_s24  ;;  %s675_s30 = scalar_lea.vmem [#allocation24], %s6919_s24 }
 0x136   : > { %v5800_v1 = vld [vmem:[#allocation5 + $0x38] sm:$0xff]   ;;  %5501 = vmatprep.subr.bf16.mxu0 %v5799_v0  ;;  %v5802_v3 = vld [vmem:[#allocation5 + $0x30] sm:$0xff]   ;;  %v5803_v4 = vld [vmem:[#allocation5 + $0x68] sm:$0xff]   ;;  %1042 = vmatprep.mubr.bf16.mxu1 %v6545_v36  ;;  %s7409_s23 = sld [smem:[#allocation43_spill]]  ;;  %s5079_s20 = sshll.u32 %s6919_s24, 3 }
 0x137   : > { %5502 = vmatpush3.bf16.msra.mxu0 %v5800_v1  ;;  %v5804_v5 = vld [vmem:[#allocation5 + $0x28] sm:$0xff]   ;;  %v5805_v6 = vld [vmem:[#allocation5 + $0x60] sm:$0xff]   ;;  %v5807_v8 = vld [vmem:[#allocation5 + $0x58] sm:$0xff]   ;;  %s5498_s16 = sshll.u32 %s7391_s18, 7  ;;  %s729_s26 = scalar_lea.vmem [#allocation25], %s5079_s20 }
 0x138   : > { %5503 = vmatprep.subr.bf16.mxu0 %v5801_v2  ;;  %v5806_v7 = vld [vmem:[#allocation5 + $0x20] sm:$0xff]   ;;  %v5808_v9 = vld [vmem:[#allocation5 + $0x18] sm:$0xff]   ;;  %v5809_v10 = vld [vmem:[#allocation5 + $0x50] sm:$0xff]   ;;  %s4828_s22 = sshll.u32 %s729_s26, 4  ;;  %s7410_s1 = sld [smem:[#allocation51_spill]]  ;;  %s4829_s22 = int_to_ptr.vmem [resolvable:$true] %s4828_s22 }
 0x139   : > { %v732_v11 = vld [vmem:[#allocation2 + $0x8] sm:$0xff]  ;;  %v5818_v15 = vld [vmem:[#allocation8 + $0x64] ss:$8 sps:$4 sm:$0xff]   ;;  %v5820_v19 = vld [vmem:[#allocation8 + $0x60] ss:$8 sps:$4 sm:$0xff]   ;;  %s4815_s5 = scalar_lea.sflag [#allocation4], %s6919_s24 }
 0x13a   : > { %v734_v12 = vpack.c.bf16 %v732_v11, %v732_v11  ;;  %v5815_v13 = vld [vmem:[#allocation8 + $0x74] ss:$8 sps:$4 sm:$0xff]   ;;  %v5817_v14 = vld [vmem:[#allocation8 + $0x70] ss:$8 sps:$4 sm:$0xff]   ;;  %v5811_v17 = vld [vmem:[#allocation5 + $0x48] sm:$0xff]   ;;  %s6427_s7 = scalar_lea.vmem %s4829_s22, 128 }
 0x13b   : > { %5504 = vmatpush3.bf16.msra.mxu0 %v5802_v3  ;;  %v5810_v16 = vld [vmem:[#allocation5 + $0x10] sm:$0xff]   ;;  %1010 = vmatprep.subr.bf16.mxu1 %v5815_v13  ;;  %v5812_v18 = vld [vmem:[#allocation5 + $0x8] sm:$0xff]   ;;  %v5813_v20 = vld [vmem:[#allocation5 + $0x40] sm:$0xff]   ;;  %p6428_p3 = scmp.ne.s32.totalorder %s4829_s22, %s6427_s7  ;;  %s6547_s25 = smov [#allocation25]  }
 0x13c   : > { %5505 = vmatprep.subr.bf16.mxu0 %v5803_v4  ;;  %902 = vmatprep.mubr.bf16.mxu0 %v734_v12  ;;  %v5821_v21 = vld [vmem:[#allocation8 + $0x54] ss:$8 sps:$4 sm:$0xff]   ;;  %v5823_v22 = vld [vmem:[#allocation8 + $0x50] ss:$8 sps:$4 sm:$0xff]   ;;  %v5824_v23 = vld [vmem:[#allocation8 + $0x44] ss:$8 sps:$4 sm:$0xff]  }
 0x13d   : > { %1011 = vmatpush1.bf16.msra.mxu1 %v5817_v14  ;;  %v5814_v24 = vld [vmem:[#allocation5] sm:$0xff]   ;;  %v731_v25 = vld [vmem:[#allocation2] sm:$0xff]  ;;  %v5841_v47 = vld [vmem:[#allocation13 + $0xe4] ss:$16 sps:$4 sm:$0xff]   ;;  %p7411_p8 = scmp.ne.s32.totalorder %s7409_s23, 0  ;;  %s6431_s29 = sshll.u32 %s6547_s25, 4  ;;  %s6432_s29 = int_to_ptr.vmem [resolvable:$false] %s6431_s29 }
 0x13e   : > { %1012 = vmatprep.subr.bf16.mxu1 %v5818_v15  ;;  %v5826_v26 = vld [vmem:[#allocation8 + $0x40] ss:$8 sps:$4 sm:$0xff]   ;;  %v5827_v27 = vld [vmem:[#allocation8 + $0x34] ss:$8 sps:$4 sm:$0xff]   ;;  %v733_v28 = vpack.c.bf16 %v731_v25, %v731_v25  ;;  %v5829_v29 = vld [vmem:[#allocation8 + $0x30] ss:$8 sps:$4 sm:$0xff]   ;;  %s7268_s3 = scalar_lea.hbm %s7410_s1, %s5498_s16  ;;  %p6434_p2 = scmp.lt.s32.totalorder %s4829_s22, %s6432_s29 }
 0x13f   : > { %5506 = vmatpush3.bf16.msra.mxu0 %v5804_v5  ;;  %v5830_v30 = vld [vmem:[#allocation8 + $0x24] ss:$8 sps:$4 sm:$0xff]   ;;  %v5832_v31 = vld [vmem:[#allocation8 + $0x20] ss:$8 sps:$4 sm:$0xff]   ;;  %v5833_v32 = vld [vmem:[#allocation8 + $0x14] ss:$8 sps:$4 sm:$0xff]   ;;  %p6429_p7 = pnand %p6428_p3, %p7411_p8 }
 0x140   : > { %5507 = vmatprep.subr.bf16.mxu0 %v5805_v6  ;;  %v5835_v33 = vld [vmem:[#allocation8 + $0x10] ss:$8 sps:$4 sm:$0xff]   ;;  %v5836_v34 = vld [vmem:[#allocation8 + $0x4] ss:$8 sps:$4 sm:$0xff]   ;;  %v5838_v35 = vld [vmem:[#allocation8] ss:$8 sps:$4 sm:$0xff]  }
 0x141   : > { %1013 = vmatpush1.bf16.msra.mxu1 %v5820_v19  ;;  %v5080_v38 = vld [vmem:[#allocation7] ss:$0 sm:$0xff]  ;;  %v5844_v48 = vld [vmem:[#allocation13 + $0xec] ss:$16 sps:$4 sm:$0xff]   ;;  %v5839_v49 = vld [vmem:[#allocation13 + $0xe0] ss:$16 sps:$4 sm:$0xff]   ;;  %p6430_p5 = pneg %p6429_p7 }
 0x142   : > { %1014 = vmatprep.subr.bf16.mxu1 %v5821_v21  ;;  %v5842_v50 = vld [vmem:[#allocation13 + $0xe8] ss:$16 sps:$4 sm:$0xff]   ;;  %v5847_v51 = vld [vmem:[#allocation13 + $0xc4] ss:$16 sps:$4 sm:$0xff]   ;;  %v5850_v52 = vld [vmem:[#allocation13 + $0xcc] ss:$16 sps:$4 sm:$0xff]  }
 0x143   : > { %5508 = vmatpush3.bf16.msra.mxu0 %v5806_v7  ;;  %v5845_v53 = vld [vmem:[#allocation13 + $0xc0] ss:$16 sps:$4 sm:$0xff]   ;;  %v5848_v54 = vld [vmem:[#allocation13 + $0xc8] ss:$16 sps:$4 sm:$0xff]   ;;  %v5853_v55 = vld [vmem:[#allocation13 + $0xa4] ss:$16 sps:$4 sm:$0xff]  }
 0x144   : > { %5509 = vmatprep.subr.bf16.mxu0 %v5807_v8  ;;  %v5856_v56 = vld [vmem:[#allocation13 + $0xac] ss:$16 sps:$4 sm:$0xff]   ;;  %v5851_v57 = vld [vmem:[#allocation13 + $0xa0] ss:$16 sps:$4 sm:$0xff]   ;;  %v5854_v58 = vld [vmem:[#allocation13 + $0xa8] ss:$16 sps:$4 sm:$0xff]  }
 0x145   : > { %1015 = vmatpush1.bf16.msra.mxu1 %v5823_v22  ;;  %v5859_v59 = vld [vmem:[#allocation13 + $0x84] ss:$16 sps:$4 sm:$0xff]   ;;  %v5862_v60 = vld [vmem:[#allocation13 + $0x8c] ss:$16 sps:$4 sm:$0xff]   ;;  %v5857_v61 = vld [vmem:[#allocation13 + $0x80] ss:$16 sps:$4 sm:$0xff]  }
 0x146   : > { %1016 = vmatprep.subr.bf16.mxu1 %v5824_v23  ;;  %v5860_v62 = vld [vmem:[#allocation13 + $0x88] ss:$16 sps:$4 sm:$0xff]   ;;  %v5865_v63 = vld [vmem:[#allocation13 + $0x64] ss:$16 sps:$4 sm:$0xff]   ;;  %v5868_v0 = vld [vmem:[#allocation13 + $0x6c] ss:$16 sps:$4 sm:$0xff]  }
 0x147   : > { %5510 = vmatpush3.bf16.msra.mxu0 %v5808_v9  ;;  %v5863_v1 = vld [vmem:[#allocation13 + $0x60] ss:$16 sps:$4 sm:$0xff]   ;;  %v5866_v2 = vld [vmem:[#allocation13 + $0x68] ss:$16 sps:$4 sm:$0xff]   ;;  %v5871_v3 = vld [vmem:[#allocation13 + $0x44] ss:$16 sps:$4 sm:$0xff]  }
 0x148   : > { %5511 = vmatprep.subr.bf16.mxu0 %v5809_v10  ;;  %v5874_v4 = vld [vmem:[#allocation13 + $0x4c] ss:$16 sps:$4 sm:$0xff]   ;;  %v5869_v5 = vld [vmem:[#allocation13 + $0x40] ss:$16 sps:$4 sm:$0xff]   ;;  %v5872_v6 = vld [vmem:[#allocation13 + $0x48] ss:$16 sps:$4 sm:$0xff]  }
 0x149   : > { %1017 = vmatpush1.bf16.msra.mxu1 %v5826_v26  ;;  %v5877_v7 = vld [vmem:[#allocation13 + $0x24] ss:$16 sps:$4 sm:$0xff]   ;;  %v5880_v8 = vld [vmem:[#allocation13 + $0x2c] ss:$16 sps:$4 sm:$0xff]   ;;  %v5875_v9 = vld [vmem:[#allocation13 + $0x20] ss:$16 sps:$4 sm:$0xff]  }
 0x14a   : > { %1018 = vmatprep.subr.bf16.mxu1 %v5827_v27  ;;  %v5878_v10 = vld [vmem:[#allocation13 + $0x28] ss:$16 sps:$4 sm:$0xff]   ;;  %v5883_v11 = vld [vmem:[#allocation13 + $0x4] ss:$16 sps:$4 sm:$0xff]   ;;  %v5886_v12 = vld [vmem:[#allocation13 + $0xc] ss:$16 sps:$4 sm:$0xff]  }
 0x14b   : > { %5512 = vmatpush3.bf16.msra.mxu0 %v5810_v16  ;;  %v5881_v13 = vld [vmem:[#allocation13] ss:$16 sps:$4 sm:$0xff]   ;;  %v5884_v14 = vld [vmem:[#allocation13 + $0x8] ss:$16 sps:$4 sm:$0xff]   ;;  %v5889_v15 = vld [vmem:[#allocation13 + $0x1e4] ss:$16 sps:$4 sm:$0xff]  }
 0x14c   : > { %5513 = vmatprep.subr.bf16.mxu0 %v5811_v17  ;;  %v5892_v16 = vld [vmem:[#allocation13 + $0x1ec] ss:$16 sps:$4 sm:$0xff]   ;;  %v5887_v17 = vld [vmem:[#allocation13 + $0x1e0] ss:$16 sps:$4 sm:$0xff]   ;;  %v5895_v19 = vld [vmem:[#allocation13 + $0x1c4] ss:$16 sps:$4 sm:$0xff]  }
 0x14d   : > { %1019 = vmatpush1.bf16.msra.mxu1 %v5829_v29  ;;  %v5893_v21 = vld [vmem:[#allocation13 + $0x1c0] ss:$16 sps:$4 sm:$0xff]   ;;  %v5896_v22 = vld [vmem:[#allocation13 + $0x1c8] ss:$16 sps:$4 sm:$0xff]   ;;  %v5901_v23 = vld [vmem:[#allocation13 + $0x1a4] ss:$16 sps:$4 sm:$0xff]  }
 0x14e   : > { %1020 = vmatprep.subr.bf16.mxu1 %v5830_v30  ;;  %v5899_v25 = vld [vmem:[#allocation13 + $0x1a0] ss:$16 sps:$4 sm:$0xff]   ;;  %v5902_v26 = vld [vmem:[#allocation13 + $0x1a8] ss:$16 sps:$4 sm:$0xff]   ;;  %v5907_v27 = vld [vmem:[#allocation13 + $0x184] ss:$16 sps:$4 sm:$0xff]  }
 0x14f   : > { %5514 = vmatpush3.bf16.msra.mxu0 %v5812_v18  ;;  %v5890_v18 = vld [vmem:[#allocation13 + $0x1e8] ss:$16 sps:$4 sm:$0xff]   ;;  %v5905_v29 = vld [vmem:[#allocation13 + $0x180] ss:$16 sps:$4 sm:$0xff]   ;;  %v5922_v36 = vld [vmem:[#allocation13 + $0x14c] ss:$16 sps:$4 sm:$0xff]  }
 0x150   : > { %5515 = vmatprep.subr.bf16.mxu0 %v5813_v20  ;;  %v5898_v20 = vld [vmem:[#allocation13 + $0x1cc] ss:$16 sps:$4 sm:$0xff]   ;;  %v5908_v30 = vld [vmem:[#allocation13 + $0x188] ss:$16 sps:$4 sm:$0xff]   ;;  %s6433_s18 = scalar_lea.vmem %s6432_s29, 256 }
 0x151   : > { %1021 = vmatpush1.bf16.msra.mxu1 %v5832_v31  ;;  %v5913_v31 = vld [vmem:[#allocation13 + $0x164] ss:$16 sps:$4 sm:$0xff]   ;;  %p6435_p11 = scmp.lt.s32.totalorder %s6433_s18, %s6427_s7 }
 0x152   : > { %1022 = vmatprep.subr.bf16.mxu1 %v5833_v32  ;;  %v5916_v32 = vld [vmem:[#allocation13 + $0x16c] ss:$16 sps:$4 sm:$0xff]  }
 0x153   : > { %5516 = vmatpush3.bf16.msra.mxu0 %v5814_v24  ;;  %v5904_v24 = vld [vmem:[#allocation13 + $0x1ac] ss:$16 sps:$4 sm:$0xff]   ;;  %p6436_p0 = por %p6435_p11, %p6434_p2 }
 0x154   : > { %1548 = vmatprep.subr.bf16.mxu0 %v5841_v47 }
 0x155   : > { %1023 = vmatpush1.bf16.msra.mxu1 %v5835_v33  ;;  %v5911_v33 = vld [vmem:[#allocation13 + $0x160] ss:$16 sps:$4 sm:$0xff]   ;;  %p6437_p4 = pnand %p6436_p0, %p6430_p5 }
 0x156   : > { %903 = vmatmul.mubr.bf16.vlgmr.msra.gmra.mxu0 %v733_v28  ;;  %1024 = vmatprep.subr.bf16.mxu1 %v5836_v34  ;;  %v5910_v28 = vld [vmem:[#allocation13 + $0x18c] ss:$16 sps:$4 sm:$0xff]   ;;  %v5914_v34 = vld [vmem:[#allocation13 + $0x168] ss:$16 sps:$4 sm:$0xff]  }
 0x157   : > { %1549 = vmatpush1.bf16.msra.mxu0 %v5839_v49 }
 0x158   : > { %1550 = vmatprep.subr.bf16.mxu0 %v5847_v51 }
 0x159   : > { %1025 = vmatpush1.bf16.msra.mxu1 %v5838_v35  ;;  %v5919_v35 = vld [vmem:[#allocation13 + $0x144] ss:$16 sps:$4 sm:$0xff]  }
 0x15a   : > { %1589 = vmatprep.subr.bf16.mxu1 %v5844_v48 }
 0x15b   : > { %1551 = vmatpush1.bf16.msra.mxu0 %v5845_v53 }
 0x15c   : > { %1552 = vmatprep.subr.bf16.mxu0 %v5853_v55 }
 0x15f   : > { %1553 = vmatpush1.bf16.msra.mxu0 %v5851_v57 }
 0x160   : > { %1554 = vmatprep.subr.bf16.mxu0 %v5859_v59 }
 0x163   : > { %1555 = vmatpush1.bf16.msra.mxu0 %v5857_v61 }
 0x164   : > { %1556 = vmatprep.subr.bf16.mxu0 %v5865_v63 }
 0x167   : > { %1557 = vmatpush1.bf16.msra.mxu0 %v5863_v1 }
 0x168   : > { %1558 = vmatprep.subr.bf16.mxu0 %v5871_v3 }
 0x16b   : > { %1559 = vmatpush1.bf16.msra.mxu0 %v5869_v5 }
 0x16c   : > { %1560 = vmatprep.subr.bf16.mxu0 %v5877_v7 }
 0x16f   : > { %1561 = vmatpush1.bf16.msra.mxu0 %v5875_v9 }
 0x170   : > { %1562 = vmatprep.subr.bf16.mxu0 %v5883_v11 }
 0x173   : > { %1563 = vmatpush1.bf16.msra.mxu0 %v5881_v13 }
 0x174   : > { %1564 = vmatprep.subr.bf16.mxu0 %v5889_v15 }
 0x177   : > { %1565 = vmatpush2.bf16.msra.mxu0 %v5887_v17 }
 0x178   : > { %1566 = vmatprep.subr.bf16.mxu0 %v5895_v19 }
 0x17b   : > { %1567 = vmatpush2.bf16.msra.mxu0 %v5893_v21  ;;  %v6546_v21 = vmov 1966171168  }
 0x17c   : > { %1568 = vmatprep.subr.bf16.mxu0 %v5901_v23  ;;  %v1095_v23 = vlaneseq }
 0x17f   : > { %1569 = vmatpush2.bf16.msra.mxu0 %v5899_v25  ;;  %v6938_v25 = vshrl.u32 %v1095_v23, 7 }
 0x180   : > { %1570 = vmatprep.subr.bf16.mxu0 %v5907_v27 }
 0x183   : > { %1571 = vmatpush2.bf16.msra.mxu0 %v5905_v29 }
 0x184   : > { %1572 = vmatprep.subr.bf16.mxu0 %v5913_v31  ;;  %v1084_v31 = vld [vmem:[#allocation10] sm:$0x3] }
 0x187   : > { %1573 = vmatpush2.bf16.msra.mxu0 %v5911_v33  ;;  %v6946_v33 = vsub.s32 0, %v6938_v25 }
 0x188   : > { %1574 = vmatprep.subr.bf16.mxu0 %v5919_v35 }
 0x216   : > { %v5517_v37 = vpop.f32.mrf.mxu0 }
 0x218   : > { %v5518_v39 = vpop.f32.mrf.mxu0 }
 0x219   : > { %v5519_v40 = vadd.f32 %v5518_v39, %v5517_v37  ;;  %v5917_v37 = vld [vmem:[#allocation13 + $0x140] ss:$16 sps:$4 sm:$0xff]   ;;  %v5925_v39 = vld [vmem:[#allocation13 + $0x124] ss:$16 sps:$4 sm:$0xff]  }
 0x21a   : > { %v5520_v41 = vpop.f32.mrf.mxu0  ;;  %1575 = vmatpush2.bf16.msra.mxu0 %v5917_v37 }
 0x21b   : > { %v905_v42 = vadd.f32 %v5519_v40, %v5080_v38  ;;  %v5920_v38 = vld [vmem:[#allocation13 + $0x148] ss:$16 sps:$4 sm:$0xff]   ;;  %v5928_v40 = vld [vmem:[#allocation13 + $0x12c] ss:$16 sps:$4 sm:$0xff]   ;;  %v5923_v41 = vld [vmem:[#allocation13 + $0x120] ss:$16 sps:$4 sm:$0xff]   ;;  %1576 = vmatprep.subr.bf16.mxu0 %v5925_v39 }
 0x21c   : > { %v5521_v43 = vpop.f32.mrf.mxu0 }
 0x21d   : > { %v911_v44 = vmul.f32 0.2, %v905_v42  ;;  %vm910_vm0 = vcmp.gt.f32.partialorder %v905_v42, 0.0  ;;  %v5931_v43 = vld [vmem:[#allocation13 + $0x104] ss:$16 sps:$4 sm:$0xff]  }
 0x21e   : > { %1577 = vmatpush2.bf16.msra.mxu0 %v5923_v41 }
 0x21f   : > { %v912_v45 = vsel %vm910_vm0, %v905_v42, %v911_v44  ;;  %v5926_v42 = vld [vmem:[#allocation13 + $0x128] ss:$16 sps:$4 sm:$0xff]   ;;  %v5929_v44 = vld [vmem:[#allocation13 + $0x100] ss:$16 sps:$4 sm:$0xff]   ;;  %1578 = vmatprep.subr.bf16.mxu0 %v5931_v43 }
 0x220   : > { %v913_v46 = vpack.c.bf16 %v912_v45, %v912_v45  ;;  %v5932_v45 = vld [vmem:[#allocation13 + $0x108] ss:$16 sps:$4 sm:$0xff]  }
 0x222   : > { %1043 = vmatmul.mubr.bf16.vlgmr.msra.gmra.mxu1 %v913_v46  ;;  %v5934_v46 = vld [vmem:[#allocation13 + $0x10c] ss:$16 sps:$4 sm:$0xff]   ;;  %1579 = vmatpush2.bf16.msra.mxu0 %v5929_v44 }
 0x223   : > { %1590 = vmatpush1.bf16.msra.mxu1 %v5842_v50 }
 0x224   : > { %1591 = vmatprep.subr.bf16.mxu1 %v5850_v52 }
 0x227   : > { %1592 = vmatpush1.bf16.msra.mxu1 %v5848_v54 }
 0x228   : > { %1593 = vmatprep.subr.bf16.mxu1 %v5856_v56 }
 0x22b   : > { %1594 = vmatpush1.bf16.msra.mxu1 %v5854_v58 }
 0x22c   : > { %1595 = vmatprep.subr.bf16.mxu1 %v5862_v60 }
 0x22f   : > { %1596 = vmatpush1.bf16.msra.mxu1 %v5860_v62 }
 0x230   : > { %1597 = vmatprep.subr.bf16.mxu1 %v5868_v0 }
 0x233   : > { %1598 = vmatpush1.bf16.msra.mxu1 %v5866_v2 }
 0x234   : > { %1599 = vmatprep.subr.bf16.mxu1 %v5874_v4 }
 0x237   : > { %1600 = vmatpush1.bf16.msra.mxu1 %v5872_v6 }
 0x238   : > { %1601 = vmatprep.subr.bf16.mxu1 %v5880_v8 }
 0x23b   : > { %1602 = vmatpush1.bf16.msra.mxu1 %v5878_v10 }
 0x23c   : > { %1603 = vmatprep.subr.bf16.mxu1 %v5886_v12 }
 0x23f   : > { %1604 = vmatpush1.bf16.msra.mxu1 %v5884_v14 }
 0x240   : > { %1605 = vmatprep.subr.bf16.mxu1 %v5892_v16 }
 0x243   : > { %1606 = vmatpush2.bf16.msra.mxu1 %v5890_v18 }
 0x244   : > { %1607 = vmatprep.subr.bf16.mxu1 %v5898_v20 }
 0x247   : > { %1608 = vmatpush2.bf16.msra.mxu1 %v5896_v22  ;;  %v1093_v22 = vunpack.c.l.s4 %v6546_v21  ;;  %v1998_v21 = vld [vmem:[#allocation17 + $0x520] sm:$0xff] }
 0x248   : > { %1609 = vmatprep.subr.bf16.mxu1 %v5904_v24 }
 0x249   : > { %v1094_v24 = vunpack.c.0.s8 %v1093_v22 }
 0x24b   : > { %1610 = vmatpush2.bf16.msra.mxu1 %v5902_v26  ;;  %v6941_v27 = vsub.s32 %v1094_v24, %v6938_v25 }
 0x24c   : > { %1611 = vmatprep.subr.bf16.mxu1 %v5910_v28 }
 0x24f   : > { %1612 = vmatpush2.bf16.msra.mxu1 %v5908_v30 }
 0x250   : > { %1613 = vmatprep.subr.bf16.mxu1 %v5916_v32 }
 0x253   : > { %1614 = vmatpush2.bf16.msra.mxu1 %v5914_v34  ;;  %v6949_v34 = vsub.s32 1, %v6938_v25 }
 0x254   : > { %1615 = vmatprep.subr.bf16.mxu1 %v5922_v36 }
 0x257   : > { %1616 = vmatpush2.bf16.msra.mxu1 %v5920_v38 }
 0x258   : > { %1617 = vmatprep.subr.bf16.mxu1 %v5928_v40 }
 0x25b   : > { %1618 = vmatpush2.bf16.msra.mxu1 %v5926_v42  ;;  %v1108_v42 = vld [vmem:[#allocation11] sm:$0x3] }
 0x25c   : > { %1619 = vmatprep.subr.bf16.mxu1 %v5934_v46 }
 0x25f   : > { %1620 = vmatpush2.bf16.msra.mxu1 %v5932_v45 }
 0x2e2   : > { %v6928_v47 = vpop.f32.mrf.mxu1 }
 0x2e3   : > { %v1051_v48 = vrot.slane %v6928_v47, 4 }
 0x2e4   : > { %v6931_v49 = vpop.f32.mrf.mxu1 }
 0x2e5   : > { %v1052_v50 = vadd.f32 %v1051_v48, %v6928_v47  ;;  %v1057_v51 = vrot.slane %v6931_v49, 4 }
 0x2e6   : > { %v1048_v52 = vpop.f32.mrf.mxu1 }
 0x2e7   : > { %v1053_v53 = vrot.slane %v1052_v50, 2  ;;  %v1058_v54 = vadd.f32 %v1057_v51, %v6931_v49 }
 0x2e8   : > { %v1049_v55 = vpop.f32.mrf.mxu1 }
 0x2e9   : > { %v1054_v56 = vadd.f32 %v1053_v53, %v1052_v50  ;;  %v1059_v57 = vrot.slane %v1058_v54, 2 }
 0x2eb   : > { %v1055_v58 = vrot.slane %v1054_v56, 1  ;;  %v1060_v59 = vadd.f32 %v1059_v57, %v1058_v54 }
 0x2ed   : > { %v1056_v60 = vadd.f32 %v1055_v58, %v1054_v56  ;;  %v1061_v61 = vrot.slane %v1060_v59, 1 }
 0x2ef   : > { %v1064_v62 = vmul.f32 0.125, %v1056_v60  ;;  %v1062_v63 = vadd.f32 %v1061_v61, %v1060_v59  ;;  %v2018_v59 = vld [vmem:[#allocation17 + $0x5c0] sm:$0xff] }
 0x2f0   : > { %v2022_v61 = vld [vmem:[#allocation17 + $0x5e0] sm:$0xff] }
 0x2f1   : > { %v1066_v0 = vsub.f32 %v6928_v47, %v1064_v62  ;;  %v1065_v1 = vmul.f32 0.125, %v1062_v63  ;;  %v5361_v63 = vcombine.low %v2018_v59, %v2022_v61 }
 0x2f3   : > { %v1068_v2 = vmul.f32 %v1066_v0, %v1066_v0  ;;  %v1067_v3 = vsub.f32 %v6931_v49, %v1065_v1  ;;  %v5362_v0 = vcombine.high %v2018_v59, %v2022_v61  ;;  %v1954_v61 = vld [vmem:[#allocation17 + $0x3c0] sm:$0xff] }
 0x2f5   : > { %v1070_v4 = vrot.slane %v1068_v2, 4  ;;  %v1069_v5 = vmul.f32 %v1067_v3, %v1067_v3  ;;  %3411 = vmatprep.subr.bf16.mxu1 %v5362_v0  ;;  %v2010_v3 = vld [vmem:[#allocation17 + $0x580] sm:$0xff] }
 0x2f7   : > { %v1071_v6 = vadd.f32 %v1070_v4, %v1068_v2  ;;  %v1076_v7 = vrot.slane %v1069_v5, 4  ;;  %v1886_v2 = vld [vmem:[#allocation17 + $0x1a0] sm:$0xff] }
 0x2f9   : > { %v1072_v8 = vrot.slane %v1071_v6, 2  ;;  %v1077_v9 = vadd.f32 %v1076_v7, %v1069_v5  ;;  %v2014_v5 = vld [vmem:[#allocation17 + $0x5a0] sm:$0xff] }
 0x2fa   : > { %v5353_v7 = vcombine.low %v2010_v3, %v2014_v5 }
 0x2fb   : > { %v1073_v10 = vadd.f32 %v1072_v8, %v1071_v6  ;;  %v1078_v11 = vrot.slane %v1077_v9, 2  ;;  %v5354_v8 = vcombine.high %v2010_v3, %v2014_v5  ;;  %v1946_v5 = vld [vmem:[#allocation17 + $0x380] sm:$0xff] }
 0x2fd   : > { %v1074_v12 = vrot.slane %v1073_v10, 1  ;;  %v1079_v13 = vadd.f32 %v1078_v11, %v1077_v9  ;;  %v1874_v9 = vld [vmem:[#allocation17 + $0x140] sm:$0xff] }
 0x2fe   : > { %v2002_v11 = vld [vmem:[#allocation17 + $0x540] sm:$0xff] }
 0x2ff   : > { %v1075_v14 = vadd.f32 %v1074_v12, %v1073_v10  ;;  %v1080_v15 = vrot.slane %v1079_v13, 1  ;;  %v1878_v10 = vld [vmem:[#allocation17 + $0x160] sm:$0xff] }
 0x300   : > { %v5218_v12 = vcombine.high %v1874_v9, %v1878_v10 }
 0x301   : > { %v1082_v16 = vmul.f32 0.125, %v1075_v14  ;;  %v1081_v17 = vadd.f32 %v1080_v15, %v1079_v13  ;;  %v2006_v13 = vld [vmem:[#allocation17 + $0x560] sm:$0xff]  ;;  %v5217_v14 = vcombine.low %v1874_v9, %v1878_v10 }
 0x302   : > { %v5345_v15 = vcombine.low %v2002_v11, %v2006_v13  ;;  %v2078_v9 = vld [vmem:[#allocation17 + $0x7a0] sm:$0xff] }
 0x303   : > { %v1085_v18 = vadd.f32 0.8, %v1082_v16  ;;  %v1083_v19 = vmul.f32 0.125, %v1081_v17  ;;  %v5346_v16 = vcombine.high %v2002_v11, %v2006_v13  ;;  %v1866_v17 = vld [vmem:[#allocation17 + $0x100] sm:$0xff] }
 0x304   : > { %v1938_v13 = vld [vmem:[#allocation17 + $0x340] sm:$0xff] }
 0x305   : > { %v1086_v20 = vadd.f32 0.8, %v1083_v19  ;;  %5999 = vrsqrt.f32 %v1085_v18  ;;  %v1870_v18 = vld [vmem:[#allocation17 + $0x120] sm:$0xff] }
 0x306   : > { %v1994_v19 = vld [vmem:[#allocation17 + $0x500] sm:$0xff]  ;;  %v5209_v22 = vcombine.low %v1866_v17, %v1870_v18 }
 0x307   : > { %6001 = vrsqrt.f32 %v1086_v20  ;;  %v5210_v20 = vcombine.high %v1866_v17, %v1870_v18  ;;  %v5337_v23 = vcombine.low %v1994_v19, %v1998_v21  ;;  %v5338_v24 = vcombine.high %v1994_v19, %v1998_v21  ;;  %v2070_v17 = vld [vmem:[#allocation17 + $0x760] sm:$0xff] }
 0x308   : > { %v1930_v21 = vld [vmem:[#allocation17 + $0x300] sm:$0xff] }
 0x312   : > { %v6000_v26 = vpop.eup %5999 }
 0x314   : > { %v6002_v28 = vpop.eup %6001 }
 0x315   : > { %v1091_v29 = vcombine.low %v6000_v26, %v6002_v28  ;;  %v1858_v26 = vld [vmem:[#allocation17 + $0xc0] sm:$0xff] }
 0x316   : > { %v1862_v28 = vld [vmem:[#allocation17 + $0xe0] sm:$0xff] }
 0x317   : > { %v1098_v30 = vrot.slane %v1091_v29, %v6941_v27  ;;  %v1986_v29 = vld [vmem:[#allocation17 + $0x4c0] sm:$0xff] }
 0x319   : > { %v1105_v32 = vrot.slane %v1098_v30, %v6941_v27  ;;  %v5202_v30 = vcombine.high %v1858_v26, %v1862_v28 }
 0x31b   : > { %v1107_v35 = vmul.f32 %v1105_v32, %v1084_v31  ;;  %v1990_v31 = vld [vmem:[#allocation17 + $0x4e0] sm:$0xff]  ;;  %v5201_v32 = vcombine.low %v1858_v26, %v1862_v28 }
 0x31c   : > { %v2062_v26 = vld [vmem:[#allocation17 + $0x720] sm:$0xff] }
 0x31d   : > { %v1113_v36 = vrot.slane %v1107_v35, %v6946_v33  ;;  %v1117_v37 = vrot.slane %v1107_v35, %v6949_v34  ;;  %v5329_v35 = vcombine.low %v1986_v29, %v1990_v31 }
 0x31f   : > { %v1120_v38 = vmul.f32 %v1113_v36, %v1064_v62  ;;  %v1121_v39 = vmul.f32 %v1117_v37, %v1065_v1  ;;  %v1141_v45 = vmul.f32 %v1113_v36, %v6928_v47  ;;  %v1142_v46 = vmul.f32 %v1117_v37, %v6931_v49  ;;  %v1890_v47 = vld [vmem:[#allocation17 + $0x1c0] sm:$0xff] }
 0x320   : > { %v1894_v49 = vld [vmem:[#allocation17 + $0x1e0] sm:$0xff]  ;;  %v5330_v36 = vcombine.high %v1986_v29, %v1990_v31 }
 0x321   : > { %v1124_v40 = vcombine.low %v1120_v38, %v1121_v39  ;;  %v5234_v60 = vcombine.high %v1890_v47, %v1894_v49  ;;  %v5233_v62 = vcombine.low %v1890_v47, %v1894_v49  ;;  %v1882_v1 = vld [vmem:[#allocation17 + $0x180] sm:$0xff] }
 0x322   : > { %v5226_v4 = vcombine.high %v1882_v1, %v1886_v2  ;;  %v5225_v6 = vcombine.low %v1882_v1, %v1886_v2  ;;  %v1850_v37 = vld [vmem:[#allocation17 + $0x80] sm:$0xff] }
 0x323   : > { %v1131_v41 = vrot.slane %v1124_v40, %v6941_v27  ;;  %3370 = vmatprep.subr.bf16.mxu0 %v5234_v60  ;;  %v1854_v38 = vld [vmem:[#allocation17 + $0xa0] sm:$0xff] }
 0x324   : > { %v1978_v39 = vld [vmem:[#allocation17 + $0x480] sm:$0xff]  ;;  %v5194_v40 = vcombine.high %v1850_v37, %v1854_v38 }
 0x325   : > { %v1138_v43 = vrot.slane %v1131_v41, %v6941_v27  ;;  %v1982_v41 = vld [vmem:[#allocation17 + $0x4a0] sm:$0xff] }
 0x326   : > { %v1966_v47 = vld [vmem:[#allocation17 + $0x420] sm:$0xff] }
 0x327   : > { %v1140_v44 = vsub.f32 %v1108_v42, %v1138_v43  ;;  %v5193_v42 = vcombine.low %v1850_v37, %v1854_v38  ;;  %v5321_v43 = vcombine.low %v1978_v39, %v1982_v41  ;;  %v2086_v1 = vld [vmem:[#allocation17 + $0x7e0] sm:$0xff] }
 0x328   : > { %v1922_v31 = vld [vmem:[#allocation17 + $0x2c0] sm:$0xff] }
 0x329   : > { %v1147_v48 = vrot.slane %v1140_v44, %v6946_v33  ;;  %v1151_v50 = vrot.slane %v1140_v44, %v6949_v34  ;;  %v5322_v44 = vcombine.high %v1978_v39, %v1982_v41  ;;  %v2054_v37 = vld [vmem:[#allocation17 + $0x6e0] sm:$0xff] }
 0x32a   : > { %v1914_v41 = vld [vmem:[#allocation17 + $0x280] sm:$0xff] }
 0x32b   : > { %v1155_v51 = vadd.f32 %v1151_v50, %v1142_v46  ;;  %v1154_v52 = vadd.f32 %v1147_v48, %v1141_v45  ;;  %v1842_v45 = vld [vmem:[#allocation17 + $0x40] sm:$0xff] }
 0x32c   : > { %v1846_v46 = vld [vmem:[#allocation17 + $0x60] sm:$0xff] }
 0x32d   : > { %vm1157_vm1 = vcmp.gt.f32.partialorder %v1155_v51, 0.0  ;;  %v1159_v53 = vmul.f32 0.2, %v1155_v51  ;;  %vm1156_vm2 = vcmp.gt.f32.partialorder %v1154_v52, 0.0  ;;  %v1158_v54 = vmul.f32 0.2, %v1154_v52 }
 0x32e   : > { %v1970_v48 = vld [vmem:[#allocation17 + $0x440] sm:$0xff]  ;;  %v5186_v50 = vcombine.high %v1842_v45, %v1846_v46 }
 0x32f   : > { %v1161_v55 = vsel %vm1157_vm1, %v1155_v51, %v1159_v53  ;;  %v1160_v56 = vsel %vm1156_vm2, %v1154_v52, %v1158_v54  ;;  %v1974_v51 = vld [vmem:[#allocation17 + $0x460] sm:$0xff]  ;;  %v5185_v52 = vcombine.low %v1842_v45, %v1846_v46 }
 0x330   : > { %v1163_v57 = vpack.c.bf16 %v1161_v55, %v1161_v55  ;;  %v1162_v58 = vpack.c.bf16 %v1160_v56, %v1160_v56  ;;  %v5313_v53 = vcombine.low %v1970_v48, %v1974_v51  ;;  %v5314_v54 = vcombine.high %v1970_v48, %v1974_v51  ;;  %v1834_v55 = vld [vmem:[#allocation17] sm:$0xff] }
 0x331   : > { %v1838_v56 = vld [vmem:[#allocation17 + $0x20] sm:$0xff] }
 0x332   : > { %1580 = vmatprep.mubr.bf16.mxu0 %v1163_v57  ;;  %1621 = vmatprep.mubr.bf16.mxu1 %v1163_v57  ;;  %v1962_v57 = vld [vmem:[#allocation17 + $0x400] sm:$0xff]  ;;  %v5177_v49 = vcombine.low %v1834_v55, %v1838_v56 }
 0x333   : > { %1581 = vmatmul.mubr.bf16.vlgmr.msra.gmra.mxu0 %v1162_v58  ;;  %1622 = vmatmul.mubr.bf16.vlgmr.msra.gmra.mxu1 %v1162_v58  ;;  %v5178_v58 = vcombine.high %v1834_v55, %v1838_v56  ;;  %v5305_v59 = vcombine.low %v1962_v57, %v1966_v47  ;;  %v5306_v60 = vcombine.high %v1962_v57, %v1966_v47  ;;  %v2046_v45 = vld [vmem:[#allocation17 + $0x6a0] sm:$0xff] }
 0x334   : > { %3371 = vmatpush1.bf16.msra.mxu0 %v5233_v62  ;;  %3412 = vmatpush1.bf16.msra.mxu1 %v5361_v63  ;;  %v1958_v62 = vld [vmem:[#allocation17 + $0x3e0] sm:$0xff] }
 0x335   : > { %3372 = vmatprep.subr.bf16.mxu0 %v5226_v4  ;;  %3413 = vmatprep.subr.bf16.mxu1 %v5354_v8  ;;  %v2082_v63 = vld [vmem:[#allocation17 + $0x7c0] sm:$0xff]  ;;  %v5298_v0 = vcombine.high %v1954_v61, %v1958_v62  ;;  %v5297_v2 = vcombine.low %v1954_v61, %v1958_v62 }
 0x336   : > { %v5425_v3 = vcombine.low %v2082_v63, %v2086_v1  ;;  %v5426_v4 = vcombine.high %v2082_v63, %v2086_v1  ;;  %v1906_v51 = vld [vmem:[#allocation17 + $0x240] sm:$0xff]  ;;  %v6959_v1 = vld [vmem:[#allocation17 + $0x1c8] sm:$0xff] }
 0x337   : > { %v2038_v55 = vld [vmem:[#allocation17 + $0x660] sm:$0xff] }
 0x338   : > { %3373 = vmatpush1.bf16.msra.mxu0 %v5225_v6  ;;  %3414 = vmatpush1.bf16.msra.mxu1 %v5353_v7  ;;  %v1950_v6 = vld [vmem:[#allocation17 + $0x3a0] sm:$0xff] }
 0x339   : > { %3374 = vmatprep.subr.bf16.mxu0 %v5218_v12  ;;  %3415 = vmatprep.subr.bf16.mxu1 %v5346_v16  ;;  %v2074_v7 = vld [vmem:[#allocation17 + $0x780] sm:$0xff]  ;;  %v5290_v8 = vcombine.high %v1946_v5, %v1950_v6  ;;  %v5289_v10 = vcombine.low %v1946_v5, %v1950_v6  ;;  %v6967_v5 = vld [vmem:[#allocation17 + $0x5e8] sm:$0xff] }
 0x33a   : > { %v5417_v11 = vcombine.low %v2074_v7, %v2078_v9  ;;  %v5418_v12 = vcombine.high %v2074_v7, %v2078_v9  ;;  %v1898_v47 = vld [vmem:[#allocation17 + $0x200] sm:$0xff] }
 0x33b   : > { %v2030_v62 = vld [vmem:[#allocation17 + $0x620] sm:$0xff] }
 0x33c   : > { %3375 = vmatpush1.bf16.msra.mxu0 %v5217_v14  ;;  %3416 = vmatpush1.bf16.msra.mxu1 %v5345_v15  ;;  %v1942_v14 = vld [vmem:[#allocation17 + $0x360] sm:$0xff] }
 0x33d   : > { %3376 = vmatprep.subr.bf16.mxu0 %v5210_v20  ;;  %3417 = vmatprep.subr.bf16.mxu1 %v5338_v24  ;;  %v2066_v15 = vld [vmem:[#allocation17 + $0x740] sm:$0xff]  ;;  %v5282_v16 = vcombine.high %v1938_v13, %v1942_v14  ;;  %v5281_v18 = vcombine.low %v1938_v13, %v1942_v14 }
 0x33e   : > { %v5409_v19 = vcombine.low %v2066_v15, %v2070_v17  ;;  %v5410_v20 = vcombine.high %v2066_v15, %v2070_v17 }
 0x340   : > { %3377 = vmatpush1.bf16.msra.mxu0 %v5209_v22  ;;  %3418 = vmatpush1.bf16.msra.mxu1 %v5337_v23  ;;  %v1934_v22 = vld [vmem:[#allocation17 + $0x320] sm:$0xff] }
 0x341   : > { %3378 = vmatprep.subr.bf16.mxu0 %v5202_v30  ;;  %3419 = vmatprep.subr.bf16.mxu1 %v5330_v36  ;;  %v2058_v23 = vld [vmem:[#allocation17 + $0x700] sm:$0xff]  ;;  %v5274_v24 = vcombine.high %v1930_v21, %v1934_v22  ;;  %v5273_v28 = vcombine.low %v1930_v21, %v1934_v22 }
 0x342   : > { %v5401_v29 = vcombine.low %v2058_v23, %v2062_v26  ;;  %v5402_v30 = vcombine.high %v2058_v23, %v2062_v26 }
 0x344   : > { %3379 = vmatpush1.bf16.msra.mxu0 %v5201_v32  ;;  %3420 = vmatpush1.bf16.msra.mxu1 %v5329_v35  ;;  %v1926_v32 = vld [vmem:[#allocation17 + $0x2e0] sm:$0xff] }
 0x345   : > { %3380 = vmatprep.subr.bf16.mxu0 %v5194_v40  ;;  %3421 = vmatprep.subr.bf16.mxu1 %v5322_v44  ;;  %v2050_v35 = vld [vmem:[#allocation17 + $0x6c0] sm:$0xff]  ;;  %v5266_v36 = vcombine.high %v1922_v31, %v1926_v32  ;;  %v5265_v38 = vcombine.low %v1922_v31, %v1926_v32 }
 0x346   : > { %v5393_v39 = vcombine.low %v2050_v35, %v2054_v37  ;;  %v5394_v40 = vcombine.high %v2050_v35, %v2054_v37 }
 0x348   : > { %3381 = vmatpush1.bf16.msra.mxu0 %v5193_v42  ;;  %3422 = vmatpush1.bf16.msra.mxu1 %v5321_v43  ;;  %v1918_v42 = vld [vmem:[#allocation17 + $0x2a0] sm:$0xff] }
 0x349   : > { %3382 = vmatprep.subr.bf16.mxu0 %v5186_v50  ;;  %3423 = vmatprep.subr.bf16.mxu1 %v5314_v54  ;;  %v2042_v43 = vld [vmem:[#allocation17 + $0x680] sm:$0xff]  ;;  %v5258_v44 = vcombine.high %v1914_v41, %v1918_v42  ;;  %v5257_v46 = vcombine.low %v1914_v41, %v1918_v42 }
 0x34a   : > { %v5385_v48 = vcombine.low %v2042_v43, %v2046_v45  ;;  %v5386_v50 = vcombine.high %v2042_v43, %v2046_v45 }
 0x34c   : > { %3383 = vmatpush1.bf16.msra.mxu0 %v5185_v52  ;;  %3424 = vmatpush1.bf16.msra.mxu1 %v5313_v53  ;;  %v1910_v52 = vld [vmem:[#allocation17 + $0x260] sm:$0xff] }
 0x34d   : > { %3384 = vmatprep.subr.bf16.mxu0 %v5178_v58  ;;  %3425 = vmatprep.subr.bf16.mxu1 %v5306_v60  ;;  %v2034_v53 = vld [vmem:[#allocation17 + $0x640] sm:$0xff]  ;;  %v5250_v54 = vcombine.high %v1906_v51, %v1910_v52  ;;  %v5249_v56 = vcombine.low %v1906_v51, %v1910_v52 }
 0x34e   : > { %v5377_v57 = vcombine.low %v2034_v53, %v2038_v55  ;;  %v5378_v58 = vcombine.high %v2034_v53, %v2038_v55 }
 0x350   : > { %3385 = vmatpush1.bf16.msra.mxu0 %v5177_v49  ;;  %3426 = vmatpush1.bf16.msra.mxu1 %v5305_v59  ;;  %v1902_v49 = vld [vmem:[#allocation17 + $0x220] sm:$0xff] }
 0x351   : > { %3386 = vmatprep.subr.bf16.mxu0 %v5298_v0  ;;  %3427 = vmatprep.subr.bf16.mxu1 %v5426_v4  ;;  %v2026_v59 = vld [vmem:[#allocation17 + $0x600] sm:$0xff]  ;;  %v5241_v60 = vcombine.low %v1898_v47, %v1902_v49  ;;  %v5242_v61 = vcombine.high %v1898_v47, %v1902_v49 }
 0x352   : > { %v5369_v63 = vcombine.low %v2026_v59, %v2030_v62  ;;  %v5370_v0 = vcombine.high %v2026_v59, %v2030_v62 }
 0x354   : > { %3387 = vmatpush2.bf16.msra.mxu0 %v5297_v2  ;;  %3428 = vmatpush2.bf16.msra.mxu1 %v5425_v3  ;;  %v6961_v2 = vld [vmem:[#allocation17 + $0x1e8] sm:$0xff] }
 0x355   : > { %3388 = vmatprep.subr.bf16.mxu0 %v5290_v8  ;;  %3429 = vmatprep.subr.bf16.mxu1 %v5418_v12  ;;  %v6963_v3 = vld [vmem:[#allocation17 + $0x5c8] sm:$0xff]  ;;  %v5236_v4 = vcombine.high %v6959_v1, %v6961_v2  ;;  %v5235_v6 = vcombine.low %v6959_v1, %v6961_v2 }
 0x356   : > { %v5363_v7 = vcombine.low %v6963_v3, %v6967_v5  ;;  %v5364_v8 = vcombine.high %v6963_v3, %v6967_v5 }
 0x358   : > { %3389 = vmatpush2.bf16.msra.mxu0 %v5289_v10  ;;  %3430 = vmatpush2.bf16.msra.mxu1 %v5417_v11 }
 0x359   : > { %3390 = vmatprep.subr.bf16.mxu0 %v5282_v16  ;;  %3431 = vmatprep.subr.bf16.mxu1 %v5410_v20 }
 0x35c   : > { %3391 = vmatpush2.bf16.msra.mxu0 %v5281_v18  ;;  %3432 = vmatpush2.bf16.msra.mxu1 %v5409_v19 }
 0x35d   : > { %3392 = vmatprep.subr.bf16.mxu0 %v5274_v24  ;;  %3433 = vmatprep.subr.bf16.mxu1 %v5402_v30 }
 0x360   : > { %3393 = vmatpush2.bf16.msra.mxu0 %v5273_v28  ;;  %3434 = vmatpush2.bf16.msra.mxu1 %v5401_v29 }
 0x361   : > { %3394 = vmatprep.subr.bf16.mxu0 %v5266_v36  ;;  %3435 = vmatprep.subr.bf16.mxu1 %v5394_v40 }
 0x364   : > { %3395 = vmatpush2.bf16.msra.mxu0 %v5265_v38  ;;  %3436 = vmatpush2.bf16.msra.mxu1 %v5393_v39 }
 0x365   : > { %3396 = vmatprep.subr.bf16.mxu0 %v5258_v44  ;;  %3437 = vmatprep.subr.bf16.mxu1 %v5386_v50 }
 0x368   : > { %3397 = vmatpush2.bf16.msra.mxu0 %v5257_v46  ;;  %3438 = vmatpush2.bf16.msra.mxu1 %v5385_v48 }
 0x369   : > { %3398 = vmatprep.subr.bf16.mxu0 %v5250_v54  ;;  %3439 = vmatprep.subr.bf16.mxu1 %v5378_v58 }
 0x36c   : > { %3399 = vmatpush2.bf16.msra.mxu0 %v5249_v56  ;;  %3440 = vmatpush2.bf16.msra.mxu1 %v5377_v57 }
 0x36d   : > { %3400 = vmatprep.subr.bf16.mxu0 %v5242_v61  ;;  %3441 = vmatprep.subr.bf16.mxu1 %v5370_v0 }
 0x370   : > { %3401 = vmatpush2.bf16.msra.mxu0 %v5241_v60  ;;  %3442 = vmatpush2.bf16.msra.mxu1 %v5369_v63 }
 0x371   : > { %3452 = vmatprep.subr.bf16.mxu0 %v5236_v4  ;;  %3493 = vmatprep.subr.bf16.mxu1 %v5364_v8 }
 0x3f3   : > { %v6975_v9 = vpop.f32.mrf.mxu0  ;;  %v6977_v10 = vpop.f32.mrf.mxu1 }
 0x3f4   : > { %v1630_v11 = vrot.slane %v6975_v9, 4  ;;  %v1642_v12 = vrot.slane %v6977_v10, 4 }
 0x3f5   : > { %v6981_v13 = vpop.f32.mrf.mxu0  ;;  %v6983_v14 = vpop.f32.mrf.mxu1 }
 0x3f6   : > { %v1631_v15 = vadd.f32 %v1630_v11, %v6975_v9  ;;  %v1643_v16 = vadd.f32 %v1642_v12, %v6977_v10  ;;  %v1636_v17 = vrot.slane %v6981_v13, 4  ;;  %v1648_v18 = vrot.slane %v6983_v14, 4 }
 0x3f7   : > { %v1586_v19 = vpop.f32.mrf.mxu0  ;;  %v1627_v20 = vpop.f32.mrf.mxu1 }
 0x3f8   : > { %v1632_v21 = vrot.slane %v1631_v15, 2  ;;  %v1644_v22 = vrot.slane %v1643_v16, 2  ;;  %v1637_v23 = vadd.f32 %v1636_v17, %v6981_v13  ;;  %v1649_v24 = vadd.f32 %v1648_v18, %v6983_v14 }
 0x3f9   : > { %v1587_v26 = vpop.f32.mrf.mxu0  ;;  %v1628_v28 = vpop.f32.mrf.mxu1 }
 0x3fa   : > { %v1633_v29 = vadd.f32 %v1632_v21, %v1631_v15  ;;  %v1645_v30 = vadd.f32 %v1644_v22, %v1643_v16  ;;  %v1638_v31 = vrot.slane %v1637_v23, 2  ;;  %v1650_v32 = vrot.slane %v1649_v24, 2 }
 0x3fc   : > { %v1634_v35 = vrot.slane %v1633_v29, 1  ;;  %v1646_v36 = vrot.slane %v1645_v30, 1  ;;  %v1639_v37 = vadd.f32 %v1638_v31, %v1637_v23  ;;  %v1651_v38 = vadd.f32 %v1650_v32, %v1649_v24 }
 0x3fe   : > { %v1635_v39 = vadd.f32 %v1634_v35, %v1633_v29  ;;  %v1647_v40 = vadd.f32 %v1646_v36, %v1645_v30  ;;  %v1640_v41 = vrot.slane %v1639_v37, 1  ;;  %v1652_v42 = vrot.slane %v1651_v38, 1 }
 0x400   : > { %v6991_v43 = vmul.f32 0.125, %v1635_v39  ;;  %v6993_v44 = vmul.f32 0.125, %v1647_v40  ;;  %v1641_v45 = vadd.f32 %v1640_v41, %v1639_v37  ;;  %v1653_v46 = vadd.f32 %v1652_v42, %v1651_v38 }
 0x402   : > { %v1658_v48 = vsub.f32 %v6975_v9, %v6991_v43  ;;  %v1660_v50 = vsub.f32 %v6977_v10, %v6993_v44  ;;  %v6999_v51 = vmul.f32 0.125, %v1641_v45  ;;  %v7001_v52 = vmul.f32 0.125, %v1653_v46 }
 0x404   : > { %v1662_v53 = vmul.f32 %v1658_v48, %v1658_v48  ;;  %v1664_v54 = vmul.f32 %v1660_v50, %v1660_v50  ;;  %v1659_v55 = vsub.f32 %v6981_v13, %v6999_v51  ;;  %v1661_v56 = vsub.f32 %v6983_v14, %v7001_v52 }
 0x406   : > { %v1666_v57 = vrot.slane %v1662_v53, 4  ;;  %v1678_v58 = vrot.slane %v1664_v54, 4  ;;  %v1663_v47 = vmul.f32 %v1659_v55, %v1659_v55  ;;  %v1665_v49 = vmul.f32 %v1661_v56, %v1661_v56 }
 0x407   : > { %v7011_v56 = vsub.s32 2, %v6938_v25 }
 0x408   : > { %v1667_v59 = vadd.f32 %v1666_v57, %v1662_v53  ;;  %v1679_v60 = vadd.f32 %v1678_v58, %v1664_v54  ;;  %v1672_v61 = vrot.slane %v1663_v47, 4  ;;  %v1684_v62 = vrot.slane %v1665_v49, 4  ;;  %v1694_v54 = vld [vmem:[#allocation14] sm:$0xf] }
 0x409   : > { %v7014_v57 = vsub.s32 3, %v6938_v25 }
 0x40a   : > { %v1668_v63 = vrot.slane %v1667_v59, 2  ;;  %v1680_v0 = vrot.slane %v1679_v60, 2  ;;  %v1673_v4 = vadd.f32 %v1672_v61, %v1663_v47  ;;  %v1685_v8 = vadd.f32 %v1684_v62, %v1665_v49 }
 0x40c   : > { %v1669_v11 = vadd.f32 %v1668_v63, %v1667_v59  ;;  %v1681_v12 = vadd.f32 %v1680_v0, %v1679_v60  ;;  %v1674_v15 = vrot.slane %v1673_v4, 2  ;;  %v1686_v16 = vrot.slane %v1685_v8, 2 }
 0x40e   : > { %v1670_v17 = vrot.slane %v1669_v11, 1  ;;  %v1682_v18 = vrot.slane %v1681_v12, 1  ;;  %v1675_v19 = vadd.f32 %v1674_v15, %v1673_v4  ;;  %v1687_v20 = vadd.f32 %v1686_v16, %v1685_v8  ;;  %v1733_v16 = vld [vmem:[#allocation16] sm:$0xf] }
 0x410   : > { %v1671_v21 = vadd.f32 %v1670_v17, %v1669_v11  ;;  %v1683_v22 = vadd.f32 %v1682_v18, %v1681_v12  ;;  %v1676_v23 = vrot.slane %v1675_v19, 1  ;;  %v1688_v24 = vrot.slane %v1687_v20, 1 }
 0x412   : > { %v1690_v26 = vmul.f32 0.125, %v1671_v21  ;;  %v1692_v28 = vmul.f32 0.125, %v1683_v22  ;;  %v1677_v29 = vadd.f32 %v1676_v23, %v1675_v19  ;;  %v1689_v30 = vadd.f32 %v1688_v24, %v1687_v20 }
 0x414   : > { %v1695_v31 = vadd.f32 0.8, %v1690_v26  ;;  %v1697_v32 = vadd.f32 0.8, %v1692_v28  ;;  %v1691_v35 = vmul.f32 0.125, %v1677_v29  ;;  %v1693_v36 = vmul.f32 0.125, %v1689_v30 }
 0x415   : > { %v1883_v29 = vld [vmem:[#allocation17 + $0x188] sm:$0xff] }
 0x416   : > { %6003 = vrsqrt.f32 %v1695_v31  ;;  %v1696_v37 = vadd.f32 0.8, %v1691_v35  ;;  %v1698_v38 = vadd.f32 0.8, %v1693_v36  ;;  %v2011_v35 = vld [vmem:[#allocation17 + $0x588] sm:$0xff] }
 0x417   : > { %6005 = vrsqrt.f32 %v1697_v32  ;;  %v1887_v32 = vld [vmem:[#allocation17 + $0x1a8] sm:$0xff] }
 0x418   : > { %6007 = vrsqrt.f32 %v1696_v37  ;;  %v2015_v36 = vld [vmem:[#allocation17 + $0x5a8] sm:$0xff] }
 0x419   : > { %6009 = vrsqrt.f32 %v1698_v38 }
 0x423   : > { %v6004_v39 = vpop.eup %6003 }
 0x424   : > { %v6006_v40 = vpop.eup %6005 }
 0x425   : > { %v6008_v41 = vpop.eup %6007 }
 0x426   : > { %v6010_v42 = vpop.eup %6009  ;;  %v1707_v45 = vcombine.low %v6004_v39, %v6008_v41 }
 0x427   : > { %v1708_v46 = vcombine.low %v6006_v40, %v6010_v42 }
 0x428   : > { %v1715_v48 = vrot.slane %v1707_v45, %v6941_v27  ;;  %v1875_v45 = vld [vmem:[#allocation17 + $0x148] sm:$0xff] }
 0x429   : > { %v1722_v50 = vrot.slane %v1708_v46, %v6941_v27  ;;  %v5228_v46 = vcombine.high %v1883_v29, %v1887_v32 }
 0x42b   : > { %v1723_v53 = vcombine.low %v1715_v48, %v1722_v50  ;;  %v5356_v48 = vcombine.high %v2011_v35, %v2015_v36  ;;  %v1879_v50 = vld [vmem:[#allocation17 + $0x168] sm:$0xff] }
 0x42c   : > { %v5219_v1 = vcombine.low %v1875_v45, %v1879_v50 }
 0x42d   : > { %v1730_v55 = vrot.slane %v1723_v53, %v6941_v27  ;;  %v2003_v53 = vld [vmem:[#allocation17 + $0x548] sm:$0xff] }
 0x42f   : > { %v1732_v58 = vmul.f32 %v1730_v55, %v1694_v54  ;;  %v2007_v54 = vld [vmem:[#allocation17 + $0x568] sm:$0xff]  ;;  %v5227_v55 = vcombine.low %v1883_v29, %v1887_v32 }
 0x430   : > { %v5347_v2 = vcombine.low %v2003_v53, %v2007_v54  ;;  %v1963_v29 = vld [vmem:[#allocation17 + $0x408] sm:$0xff] }
 0x431   : > { %v1738_v47 = vrot.slane %v1732_v58, %v6946_v33  ;;  %v1742_v49 = vrot.slane %v1732_v58, %v6949_v34  ;;  %v1746_v59 = vrot.slane %v1732_v58, %v7011_v56  ;;  %v1750_v60 = vrot.slane %v1732_v58, %v7014_v57 }
 0x432   : > { %v5355_v58 = vcombine.low %v2011_v35, %v2015_v36  ;;  %v1955_v35 = vld [vmem:[#allocation17 + $0x3c8] sm:$0xff] }
 0x433   : > { %v1755_v61 = vmul.f32 %v1738_v47, %v6991_v43  ;;  %v1756_v62 = vmul.f32 %v1742_v49, %v6999_v51  ;;  %v1757_v63 = vmul.f32 %v1746_v59, %v6993_v44  ;;  %v1758_v0 = vmul.f32 %v1750_v60, %v7001_v52  ;;  %v1959_v36 = vld [vmem:[#allocation17 + $0x3e8] sm:$0xff] }
 0x434   : > { %v1792_v19 = vmul.f32 %v1750_v60, %v6983_v14  ;;  %v1790_v43 = vmul.f32 %v1742_v49, %v6981_v13  ;;  %v1789_v51 = vmul.f32 %v1738_v47, %v6975_v9  ;;  %v1791_v44 = vmul.f32 %v1746_v59, %v6977_v10  ;;  %v1867_v59 = vld [vmem:[#allocation17 + $0x108] sm:$0xff] }
 0x435   : > { %v1763_v4 = vcombine.low %v1755_v61, %v1756_v62  ;;  %v1764_v8 = vcombine.low %v1757_v63, %v1758_v0  ;;  %v5220_v47 = vcombine.high %v1875_v45, %v1879_v50  ;;  %v5348_v49 = vcombine.high %v2003_v53, %v2007_v54  ;;  %v1871_v60 = vld [vmem:[#allocation17 + $0x128] sm:$0xff] }
 0x436   : > { %v1995_v61 = vld [vmem:[#allocation17 + $0x508] sm:$0xff]  ;;  %v5212_v3 = vcombine.high %v1867_v59, %v1871_v60 }
 0x437   : > { %v1771_v11 = vrot.slane %v1763_v4, %v6941_v27  ;;  %v1778_v12 = vrot.slane %v1764_v8, %v6941_v27  ;;  %v1999_v62 = vld [vmem:[#allocation17 + $0x528] sm:$0xff]  ;;  %v5211_v4 = vcombine.low %v1867_v59, %v1871_v60 }
 0x438   : > { %v5340_v5 = vcombine.high %v1995_v61, %v1999_v62  ;;  %v1987_v63 = vld [vmem:[#allocation17 + $0x4c8] sm:$0xff]  ;;  %v5339_v8 = vcombine.low %v1995_v61, %v1999_v62 }
 0x439   : > { %v1779_v15 = vcombine.low %v1771_v11, %v1778_v12  ;;  %v1991_v0 = vld [vmem:[#allocation17 + $0x4e8] sm:$0xff] }
 0x43a   : > { %v5332_v12 = vcombine.high %v1987_v63, %v1991_v0  ;;  %v1947_v53 = vld [vmem:[#allocation17 + $0x388] sm:$0xff] }
 0x43b   : > { %v1786_v17 = vrot.slane %v1779_v15, %v6941_v27  ;;  %v1851_v15 = vld [vmem:[#allocation17 + $0x88] sm:$0xff] }
 0x43c   : > { %v1951_v54 = vld [vmem:[#allocation17 + $0x3a8] sm:$0xff] }
 0x43d   : > { %v1788_v18 = vsub.f32 %v1733_v16, %v1786_v17  ;;  %v1855_v16 = vld [vmem:[#allocation17 + $0xa8] sm:$0xff]  ;;  %v5292_v59 = vcombine.high %v1947_v53, %v1951_v54 }
 0x43e   : > { %v1979_v17 = vld [vmem:[#allocation17 + $0x488] sm:$0xff] }
 0x43f   : > { %v1809_v52 = vrot.slane %v1788_v18, %v7014_v57  ;;  %v1801_v20 = vrot.slane %v1788_v18, %v6949_v34  ;;  %v1797_v21 = vrot.slane %v1788_v18, %v6946_v33  ;;  %v1805_v22 = vrot.slane %v1788_v18, %v7011_v56  ;;  %v1983_v18 = vld [vmem:[#allocation17 + $0x4a8] sm:$0xff] }
 0x440   : > { %v1939_v61 = vld [vmem:[#allocation17 + $0x348] sm:$0xff] }
 0x441   : > { %v1817_v23 = vadd.f32 %v1809_v52, %v1792_v19  ;;  %v1815_v24 = vadd.f32 %v1801_v20, %v1790_v43  ;;  %v1814_v26 = vadd.f32 %v1797_v21, %v1789_v51  ;;  %v1816_v28 = vadd.f32 %v1805_v22, %v1791_v44  ;;  %v1843_v52 = vld [vmem:[#allocation17 + $0x48] sm:$0xff] }
 0x442   : > { %v5331_v43 = vcombine.low %v1987_v63, %v1991_v0  ;;  %v5196_v51 = vcombine.high %v1851_v15, %v1855_v16  ;;  %v5324_v44 = vcombine.high %v1979_v17, %v1983_v18  ;;  %v1847_v20 = vld [vmem:[#allocation17 + $0x68] sm:$0xff] }
 0x443   : > { %vm1819_vm3 = vcmp.gt.f32.partialorder %v1815_v24, 0.0  ;;  %v1823_v14 = vmul.f32 0.2, %v1815_v24  ;;  %vm1821_vm4 = vcmp.gt.f32.partialorder %v1817_v23, 0.0  ;;  %v1825_v13 = vmul.f32 0.2, %v1817_v23 }
 0x444   : > { %vm1818_vm5 = vcmp.gt.f32.partialorder %v1814_v26, 0.0  ;;  %v1822_v9 = vmul.f32 0.2, %v1814_v26  ;;  %vm1820_vm6 = vcmp.gt.f32.partialorder %v1816_v28, 0.0  ;;  %v1824_v10 = vmul.f32 0.2, %v1816_v28 }
 0x445   : > { %v1827_v30 = vsel %vm1819_vm3, %v1815_v24, %v1823_v14  ;;  %v1829_v31 = vsel %vm1821_vm4, %v1817_v23, %v1825_v13  ;;  %v1971_v21 = vld [vmem:[#allocation17 + $0x448] sm:$0xff]  ;;  %v5195_v23 = vcombine.low %v1851_v15, %v1855_v16  ;;  %v5323_v24 = vcombine.low %v1979_v17, %v1983_v18 }
 0x446   : > { %v7035_v37 = vpack.c.bf16 %v1827_v30, %v1827_v30  ;;  %v7037_v38 = vpack.c.bf16 %v1829_v31, %v1829_v31  ;;  %v1826_v39 = vsel %vm1818_vm5, %v1814_v26, %v1822_v9  ;;  %v1828_v40 = vsel %vm1820_vm6, %v1816_v28, %v1824_v10  ;;  %v1975_v22 = vld [vmem:[#allocation17 + $0x468] sm:$0xff] }
 0x447   : > { %v7039_v41 = vpack.c.bf16 %v1826_v39, %v1826_v39  ;;  %v7041_v42 = vpack.c.bf16 %v1828_v40, %v1828_v40  ;;  %v5188_v26 = vcombine.high %v1843_v52, %v1847_v20  ;;  %v5316_v28 = vcombine.high %v1971_v21, %v1975_v22  ;;  %v1835_v14 = vld [vmem:[#allocation17 + $0x8] sm:$0xff] }
 0x448   : > { %3402 = vmatprep.mubr.bf16.mxu0 %v7035_v37  ;;  %3443 = vmatprep.mubr.bf16.mxu1 %v7037_v38  ;;  %v1839_v13 = vld [vmem:[#allocation17 + $0x28] sm:$0xff]  ;;  %v5187_v10 = vcombine.low %v1843_v52, %v1847_v20  ;;  %v5315_v30 = vcombine.low %v1971_v21, %v1975_v22 }
 0x449   : > { %3403 = vmatmul.mubr.bf16.vlgmr.msra.gmra.mxu0 %v7039_v41  ;;  %3444 = vmatmul.mubr.bf16.vlgmr.msra.gmra.mxu1 %v7041_v42  ;;  %v1967_v9 = vld [vmem:[#allocation17 + $0x428] sm:$0xff]  ;;  %v5180_v31 = vcombine.high %v1835_v14, %v1839_v13  ;;  %v5179_v45 = vcombine.low %v1835_v14, %v1839_v13 }
 0x44a   : > { %3453 = vmatpush1.bf16.msra.mxu0 %v5235_v6  ;;  %3494 = vmatpush1.bf16.msra.mxu1 %v5363_v7  ;;  %v1859_v6 = vld [vmem:[#allocation17 + $0xc8] sm:$0xff]  ;;  %v5308_v32 = vcombine.high %v1963_v29, %v1967_v9 }
 0x44b   : > { %3484 = vmatprep.mubr.bf16.mxu0 %v7035_v37  ;;  %3525 = vmatprep.mubr.bf16.mxu1 %v7037_v38  ;;  %v1863_v7 = vld [vmem:[#allocation17 + $0xe8] sm:$0xff] }
 0x44c   : > { %3454 = vmatprep.subr.bf16.mxu0 %v5228_v46  ;;  %3495 = vmatprep.subr.bf16.mxu1 %v5356_v48  ;;  %v5204_v11 = vcombine.high %v1859_v6, %v1863_v7  ;;  %v5203_v19 = vcombine.low %v1859_v6, %v1863_v7  ;;  %v2083_v39 = vld [vmem:[#allocation17 + $0x7c8] sm:$0xff]  ;;  %v5307_v46 = vcombine.low %v1963_v29, %v1967_v9 }
 0x44d   : > { %v2087_v40 = vld [vmem:[#allocation17 + $0x7e8] sm:$0xff]  ;;  %v5300_v48 = vcombine.high %v1955_v35, %v1959_v36 }
 0x44e   : > { %3455 = vmatpush1.bf16.msra.mxu0 %v5227_v55  ;;  %3496 = vmatpush1.bf16.msra.mxu1 %v5355_v58  ;;  %v5428_v50 = vcombine.high %v2083_v39, %v2087_v40  ;;  %v2075_v55 = vld [vmem:[#allocation17 + $0x788] sm:$0xff] }
 0x44f   : > { %3456 = vmatprep.subr.bf16.mxu0 %v5220_v47  ;;  %3497 = vmatprep.subr.bf16.mxu1 %v5348_v49  ;;  %v2079_v58 = vld [vmem:[#allocation17 + $0x7a8] sm:$0xff]  ;;  %v5299_v47 = vcombine.low %v1955_v35, %v1959_v36  ;;  %v5427_v49 = vcombine.low %v2083_v39, %v2087_v40 }
 0x450   : > { %v5420_v60 = vcombine.high %v2075_v55, %v2079_v58  ;;  %v1943_v62 = vld [vmem:[#allocation17 + $0x368] sm:$0xff] }
 0x451   : > { %v5284_v6 = vcombine.high %v1939_v61, %v1943_v62  ;;  %v1931_v63 = vld [vmem:[#allocation17 + $0x308] sm:$0xff] }
 0x452   : > { %3457 = vmatpush1.bf16.msra.mxu0 %v5219_v1  ;;  %3498 = vmatpush1.bf16.msra.mxu1 %v5347_v2  ;;  %v2067_v1 = vld [vmem:[#allocation17 + $0x748] sm:$0xff] }
 0x453   : > { %3458 = vmatprep.subr.bf16.mxu0 %v5212_v3  ;;  %3499 = vmatprep.subr.bf16.mxu1 %v5340_v5  ;;  %v2071_v2 = vld [vmem:[#allocation17 + $0x768] sm:$0xff]  ;;  %v5291_v3 = vcombine.low %v1947_v53, %v1951_v54  ;;  %v5419_v5 = vcombine.low %v2075_v55, %v2079_v58  ;;  %v1892_v55 = vld [vmem:[#allocation17 + $0x1d0] sm:$0xff] }
 0x454   : > { %v5412_v7 = vcombine.high %v2067_v1, %v2071_v2  ;;  %v1935_v0 = vld [vmem:[#allocation17 + $0x328] sm:$0xff]  ;;  %v1896_v58 = vld [vmem:[#allocation17 + $0x1f0] sm:$0xff] }
 0x455   : > { %v5276_v15 = vcombine.high %v1931_v63, %v1935_v0  ;;  %v1923_v17 = vld [vmem:[#allocation17 + $0x2c8] sm:$0xff] }
 0x456   : > { %3459 = vmatpush1.bf16.msra.mxu0 %v5211_v4  ;;  %3500 = vmatpush1.bf16.msra.mxu1 %v5339_v8  ;;  %v2059_v4 = vld [vmem:[#allocation17 + $0x708] sm:$0xff] }
 0x457   : > { %3460 = vmatprep.subr.bf16.mxu0 %v5204_v11  ;;  %3501 = vmatprep.subr.bf16.mxu1 %v5332_v12  ;;  %v2063_v8 = vld [vmem:[#allocation17 + $0x728] sm:$0xff]  ;;  %v5283_v11 = vcombine.low %v1939_v61, %v1943_v62  ;;  %v5411_v12 = vcombine.low %v2067_v1, %v2071_v2  ;;  %v5238_v61 = vcombine.high %v1892_v55, %v1896_v58  ;;  %v1884_v1 = vld [vmem:[#allocation17 + $0x190] sm:$0xff] }
 0x458   : > { %v5404_v16 = vcombine.high %v2059_v4, %v2063_v8  ;;  %v1927_v18 = vld [vmem:[#allocation17 + $0x2e8] sm:$0xff]  ;;  %v1888_v2 = vld [vmem:[#allocation17 + $0x1b0] sm:$0xff] }
 0x459   : > { %v5268_v52 = vcombine.high %v1923_v17, %v1927_v18  ;;  %v1915_v21 = vld [vmem:[#allocation17 + $0x288] sm:$0xff] }
 0x45a   : > { %3461 = vmatpush1.bf16.msra.mxu0 %v5203_v19  ;;  %3502 = vmatpush1.bf16.msra.mxu1 %v5331_v43  ;;  %v2051_v19 = vld [vmem:[#allocation17 + $0x6c8] sm:$0xff] }
 0x45b   : > { %3462 = vmatprep.subr.bf16.mxu0 %v5196_v51  ;;  %3503 = vmatprep.subr.bf16.mxu1 %v5324_v44  ;;  %v2055_v43 = vld [vmem:[#allocation17 + $0x6e8] sm:$0xff]  ;;  %v5275_v51 = vcombine.low %v1931_v63, %v1935_v0  ;;  %v5403_v44 = vcombine.low %v2059_v4, %v2063_v8  ;;  %v5230_v63 = vcombine.high %v1884_v1, %v1888_v2  ;;  %v1876_v4 = vld [vmem:[#allocation17 + $0x150] sm:$0xff] }
 0x45c   : > { %v5396_v20 = vcombine.high %v2051_v19, %v2055_v43  ;;  %v1919_v22 = vld [vmem:[#allocation17 + $0x2a8] sm:$0xff]  ;;  %v1880_v8 = vld [vmem:[#allocation17 + $0x170] sm:$0xff] }
 0x45d   : > { %v5260_v14 = vcombine.high %v1915_v21, %v1919_v22  ;;  %v1907_v29 = vld [vmem:[#allocation17 + $0x248] sm:$0xff] }
 0x45e   : > { %3463 = vmatpush1.bf16.msra.mxu0 %v5195_v23  ;;  %3504 = vmatpush1.bf16.msra.mxu1 %v5323_v24  ;;  %v2043_v23 = vld [vmem:[#allocation17 + $0x688] sm:$0xff] }
 0x45f   : > { %3464 = vmatprep.subr.bf16.mxu0 %v5188_v26  ;;  %3505 = vmatprep.subr.bf16.mxu1 %v5316_v28  ;;  %v2047_v24 = vld [vmem:[#allocation17 + $0x6a8] sm:$0xff]  ;;  %v5267_v26 = vcombine.low %v1923_v17, %v1927_v18  ;;  %v5395_v28 = vcombine.low %v2051_v19, %v2055_v43  ;;  %v5222_v17 = vcombine.high %v1876_v4, %v1880_v8  ;;  %v1868_v19 = vld [vmem:[#allocation17 + $0x110] sm:$0xff] }
 0x460   : > { %v5388_v13 = vcombine.high %v2043_v23, %v2047_v24  ;;  %v1911_v9 = vld [vmem:[#allocation17 + $0x268] sm:$0xff]  ;;  %v1872_v43 = vld [vmem:[#allocation17 + $0x130] sm:$0xff] }
 0x461   : > { %v5252_v35 = vcombine.high %v1907_v29, %v1911_v9  ;;  %v1899_v39 = vld [vmem:[#allocation17 + $0x208] sm:$0xff] }
 0x462   : > { %3465 = vmatpush1.bf16.msra.mxu0 %v5187_v10  ;;  %3506 = vmatpush1.bf16.msra.mxu1 %v5315_v30  ;;  %v2035_v10 = vld [vmem:[#allocation17 + $0x648] sm:$0xff] }
 0x463   : > { %3466 = vmatprep.subr.bf16.mxu0 %v5180_v31  ;;  %3507 = vmatprep.subr.bf16.mxu1 %v5308_v32  ;;  %v2039_v30 = vld [vmem:[#allocation17 + $0x668] sm:$0xff]  ;;  %v5259_v31 = vcombine.low %v1915_v21, %v1919_v22  ;;  %v5387_v32 = vcombine.low %v2043_v23, %v2047_v24  ;;  %v5214_v21 = vcombine.high %v1868_v19, %v1872_v43  ;;  %v1860_v23 = vld [vmem:[#allocation17 + $0xd0] sm:$0xff] }
 0x464   : > { %v5380_v36 = vcombine.high %v2035_v10, %v2039_v30  ;;  %v1903_v40 = vld [vmem:[#allocation17 + $0x228] sm:$0xff]  ;;  %v1864_v24 = vld [vmem:[#allocation17 + $0xf0] sm:$0xff] }
 0x465   : > { %v5244_v53 = vcombine.high %v1899_v39, %v1903_v40 }
 0x466   : > { %3467 = vmatpush1.bf16.msra.mxu0 %v5179_v45  ;;  %3508 = vmatpush1.bf16.msra.mxu1 %v5307_v46  ;;  %v2027_v45 = vld [vmem:[#allocation17 + $0x608] sm:$0xff] }
 0x467   : > { %3468 = vmatprep.subr.bf16.mxu0 %v5300_v48  ;;  %3509 = vmatprep.subr.bf16.mxu1 %v5428_v50  ;;  %v2031_v46 = vld [vmem:[#allocation17 + $0x628] sm:$0xff]  ;;  %v5251_v48 = vcombine.low %v1907_v29, %v1911_v9  ;;  %v5379_v50 = vcombine.low %v2035_v10, %v2039_v30  ;;  %v5206_v29 = vcombine.high %v1860_v23, %v1864_v24  ;;  %v1852_v10 = vld [vmem:[#allocation17 + $0x90] sm:$0xff] }
 0x468   : > { %v5372_v54 = vcombine.high %v2027_v45, %v2031_v46  ;;  %v1856_v30 = vld [vmem:[#allocation17 + $0xb0] sm:$0xff] }
 0x46a   : > { %3469 = vmatpush2.bf16.msra.mxu0 %v5299_v47  ;;  %3510 = vmatpush2.bf16.msra.mxu1 %v5427_v49  ;;  %v2020_v47 = vld [vmem:[#allocation17 + $0x5d0] sm:$0xff] }
 0x46b   : > { %3470 = vmatprep.subr.bf16.mxu0 %v5292_v59  ;;  %3511 = vmatprep.subr.bf16.mxu1 %v5420_v60  ;;  %v2024_v49 = vld [vmem:[#allocation17 + $0x5f0] sm:$0xff]  ;;  %v5243_v59 = vcombine.low %v1899_v39, %v1903_v40  ;;  %v5371_v60 = vcombine.low %v2027_v45, %v2031_v46  ;;  %v5198_v39 = vcombine.high %v1852_v10, %v1856_v30 }
 0x46c   : > { %v5366_v62 = vcombine.high %v2020_v47, %v2024_v49  ;;  %v1844_v45 = vld [vmem:[#allocation17 + $0x50] sm:$0xff] }
 0x46d   : > { %v1848_v46 = vld [vmem:[#allocation17 + $0x70] sm:$0xff] }
 0x46e   : > { %3471 = vmatpush2.bf16.msra.mxu0 %v5291_v3  ;;  %3512 = vmatpush2.bf16.msra.mxu1 %v5419_v5  ;;  %v2012_v3 = vld [vmem:[#allocation17 + $0x590] sm:$0xff] }
 0x46f   : > { %3472 = vmatprep.subr.bf16.mxu0 %v5284_v6  ;;  %3513 = vmatprep.subr.bf16.mxu1 %v5412_v7  ;;  %v2016_v5 = vld [vmem:[#allocation17 + $0x5b0] sm:$0xff]  ;;  %v5237_v6 = vcombine.low %v1892_v55, %v1896_v58  ;;  %v5365_v7 = vcombine.low %v2020_v47, %v2024_v49  ;;  %v5190_v55 = vcombine.high %v1844_v45, %v1848_v46 }
 0x470   : > { %v5358_v0 = vcombine.high %v2012_v3, %v2016_v5  ;;  %v1836_v47 = vld [vmem:[#allocation17 + $0x10] sm:$0xff] }
 0x471   : > { %v1840_v49 = vld [vmem:[#allocation17 + $0x30] sm:$0xff] }
 0x472   : > { %3473 = vmatpush2.bf16.msra.mxu0 %v5283_v11  ;;  %3514 = vmatpush2.bf16.msra.mxu1 %v5411_v12  ;;  %v2004_v11 = vld [vmem:[#allocation17 + $0x550] sm:$0xff] }
 0x473   : > { %3474 = vmatprep.subr.bf16.mxu0 %v5276_v15  ;;  %3515 = vmatprep.subr.bf16.mxu1 %v5404_v16  ;;  %v2008_v12 = vld [vmem:[#allocation17 + $0x570] sm:$0xff]  ;;  %v5229_v15 = vcombine.low %v1884_v1, %v1888_v2  ;;  %v5357_v16 = vcombine.low %v2012_v3, %v2016_v5  ;;  %v5182_v1 = vcombine.high %v1836_v47, %v1840_v49 }
 0x474   : > { %v5350_v18 = vcombine.high %v2004_v11, %v2008_v12  ;;  %v1956_v3 = vld [vmem:[#allocation17 + $0x3d0] sm:$0xff] }
 0x475   : > { %v1960_v5 = vld [vmem:[#allocation17 + $0x3f0] sm:$0xff] }
 0x476   : > { %3475 = vmatpush2.bf16.msra.mxu0 %v5275_v51  ;;  %3516 = vmatpush2.bf16.msra.mxu1 %v5403_v44  ;;  %v1996_v51 = vld [vmem:[#allocation17 + $0x510] sm:$0xff] }
 0x477   : > { %3476 = vmatprep.subr.bf16.mxu0 %v5268_v52  ;;  %3517 = vmatprep.subr.bf16.mxu1 %v5396_v20  ;;  %v2000_v44 = vld [vmem:[#allocation17 + $0x530] sm:$0xff]  ;;  %v5221_v52 = vcombine.low %v1876_v4, %v1880_v8  ;;  %v5349_v20 = vcombine.low %v2004_v11, %v2008_v12  ;;  %v5302_v4 = vcombine.high %v1956_v3, %v1960_v5 }
 0x478   : > { %v5342_v22 = vcombine.high %v1996_v51, %v2000_v44  ;;  %v1948_v11 = vld [vmem:[#allocation17 + $0x390] sm:$0xff] }
 0x479   : > { %v1952_v12 = vld [vmem:[#allocation17 + $0x3b0] sm:$0xff] }
 0x47a   : > { %3477 = vmatpush2.bf16.msra.mxu0 %v5267_v26  ;;  %3518 = vmatpush2.bf16.msra.mxu1 %v5395_v28  ;;  %v1988_v26 = vld [vmem:[#allocation17 + $0x4d0] sm:$0xff] }
 0x47b   : > { %3478 = vmatprep.subr.bf16.mxu0 %v5260_v14  ;;  %3519 = vmatprep.subr.bf16.mxu1 %v5388_v13  ;;  %v1992_v28 = vld [vmem:[#allocation17 + $0x4f0] sm:$0xff]  ;;  %v5213_v14 = vcombine.low %v1868_v19, %v1872_v43  ;;  %v5341_v13 = vcombine.low %v1996_v51, %v2000_v44  ;;  %v5294_v19 = vcombine.high %v1948_v11, %v1952_v12 }
 0x47c   : > { %v5334_v9 = vcombine.high %v1988_v26, %v1992_v28  ;;  %v1940_v51 = vld [vmem:[#allocation17 + $0x350] sm:$0xff] }
 0x47d   : > { %v1944_v44 = vld [vmem:[#allocation17 + $0x370] sm:$0xff] }
 0x47e   : > { %3479 = vmatpush2.bf16.msra.mxu0 %v5259_v31  ;;  %3520 = vmatpush2.bf16.msra.mxu1 %v5387_v32  ;;  %v1980_v31 = vld [vmem:[#allocation17 + $0x490] sm:$0xff] }
 0x47f   : > { %3480 = vmatprep.subr.bf16.mxu0 %v5252_v35  ;;  %3521 = vmatprep.subr.bf16.mxu1 %v5380_v36  ;;  %v1984_v32 = vld [vmem:[#allocation17 + $0x4b0] sm:$0xff]  ;;  %v5205_v35 = vcombine.low %v1860_v23, %v1864_v24  ;;  %v5333_v36 = vcombine.low %v1988_v26, %v1992_v28  ;;  %v5286_v23 = vcombine.high %v1940_v51, %v1944_v44 }
 0x480   : > { %v5326_v40 = vcombine.high %v1980_v31, %v1984_v32  ;;  %v1932_v26 = vld [vmem:[#allocation17 + $0x310] sm:$0xff] }
 0x481   : > { %v1936_v28 = vld [vmem:[#allocation17 + $0x330] sm:$0xff] }
 0x482   : > { %3481 = vmatpush2.bf16.msra.mxu0 %v5251_v48  ;;  %3522 = vmatpush2.bf16.msra.mxu1 %v5379_v50  ;;  %v1972_v48 = vld [vmem:[#allocation17 + $0x450] sm:$0xff] }
 0x483   : > { %3482 = vmatprep.subr.bf16.mxu0 %v5244_v53  ;;  %3523 = vmatprep.subr.bf16.mxu1 %v5372_v54  ;;  %v1976_v50 = vld [vmem:[#allocation17 + $0x470] sm:$0xff]  ;;  %v5197_v53 = vcombine.low %v1852_v10, %v1856_v30  ;;  %v5325_v54 = vcombine.low %v1980_v31, %v1984_v32  ;;  %v5278_v10 = vcombine.high %v1932_v26, %v1936_v28 }
 0x484   : > { %v5318_v58 = vcombine.high %v1972_v48, %v1976_v50  ;;  %v1924_v31 = vld [vmem:[#allocation17 + $0x2d0] sm:$0xff] }
 0x485   : > { %v1928_v32 = vld [vmem:[#allocation17 + $0x2f0] sm:$0xff] }
 0x486   : > { %3483 = vmatpush2.bf16.msra.mxu0 %v5243_v59  ;;  %3524 = vmatpush2.bf16.msra.mxu1 %v5371_v60  ;;  %v1964_v59 = vld [vmem:[#allocation17 + $0x410] sm:$0xff] }
 0x487   : > { %3534 = vmatprep.subr.bf16.mxu0 %v5238_v61  ;;  %3575 = vmatprep.subr.bf16.mxu1 %v5366_v62  ;;  %v1968_v60 = vld [vmem:[#allocation17 + $0x430] sm:$0xff]  ;;  %v5189_v61 = vcombine.low %v1844_v45, %v1848_v46  ;;  %v5317_v62 = vcombine.low %v1972_v48, %v1976_v50  ;;  %v5270_v45 = vcombine.high %v1924_v31, %v1928_v32 }
 0x488   : > { %v5310_v2 = vcombine.high %v1964_v59, %v1968_v60  ;;  %v1916_v48 = vld [vmem:[#allocation17 + $0x290] sm:$0xff] }
 0x489   : > { %3485 = vmatmul.mubr.bf16.vlgmr.msra.gmra.mxu0 %v7039_v41  ;;  %3526 = vmatmul.mubr.bf16.vlgmr.msra.gmra.mxu1 %v7041_v42  ;;  %v1920_v50 = vld [vmem:[#allocation17 + $0x2b0] sm:$0xff] }
 0x48a   : > { %3535 = vmatpush1.bf16.msra.mxu0 %v5237_v6  ;;  %3566 = vmatprep.mubr.bf16.mxu0 %v7035_v37  ;;  %v2084_v6 = vld [vmem:[#allocation17 + $0x7d0] sm:$0xff] }
 0x48b   : > { %3576 = vmatpush1.bf16.msra.mxu1 %v5365_v7  ;;  %3607 = vmatprep.mubr.bf16.mxu1 %v7037_v38  ;;  %v2088_v7 = vld [vmem:[#allocation17 + $0x7f0] sm:$0xff] }
 0x48c   : > { %3536 = vmatprep.subr.bf16.mxu0 %v5230_v63  ;;  %3577 = vmatprep.subr.bf16.mxu1 %v5358_v0  ;;  %v5181_v63 = vcombine.low %v1836_v47, %v1840_v49  ;;  %v5309_v0 = vcombine.low %v1964_v59, %v1968_v60  ;;  %v5430_v8 = vcombine.high %v2084_v6, %v2088_v7  ;;  %v1908_v59 = vld [vmem:[#allocation17 + $0x250] sm:$0xff] }
 0x48d   : > { %v5262_v47 = vcombine.high %v1916_v48, %v1920_v50  ;;  %v1912_v60 = vld [vmem:[#allocation17 + $0x270] sm:$0xff] }
 0x48e   : > { %3537 = vmatpush1.bf16.msra.mxu0 %v5229_v15  ;;  %v2076_v15 = vld [vmem:[#allocation17 + $0x790] sm:$0xff] }
 0x48f   : > { %3578 = vmatpush1.bf16.msra.mxu1 %v5357_v16  ;;  %3538 = vmatprep.subr.bf16.mxu0 %v5222_v17  ;;  %v2080_v16 = vld [vmem:[#allocation17 + $0x7b0] sm:$0xff]  ;;  %v5301_v17 = vcombine.low %v1956_v3, %v1960_v5  ;;  %v5254_v3 = vcombine.high %v1908_v59, %v1912_v60 }
 0x490   : > { %3579 = vmatprep.subr.bf16.mxu1 %v5350_v18  ;;  %v5429_v18 = vcombine.low %v2084_v6, %v2088_v7  ;;  %v5422_v43 = vcombine.high %v2076_v15, %v2080_v16  ;;  %v1900_v6 = vld [vmem:[#allocation17 + $0x210] sm:$0xff] }
 0x491   : > { %v1904_v7 = vld [vmem:[#allocation17 + $0x230] sm:$0xff] }
 0x492   : > { %3539 = vmatpush1.bf16.msra.mxu0 %v5221_v52  ;;  %v2068_v52 = vld [vmem:[#allocation17 + $0x750] sm:$0xff] }
 0x493   : > { %3580 = vmatpush1.bf16.msra.mxu1 %v5349_v20  ;;  %3540 = vmatprep.subr.bf16.mxu0 %v5214_v21  ;;  %v2072_v20 = vld [vmem:[#allocation17 + $0x770] sm:$0xff]  ;;  %v5293_v21 = vcombine.low %v1948_v11, %v1952_v12  ;;  %v5246_v11 = vcombine.high %v1900_v6, %v1904_v7 }
 0x494   : > { %3581 = vmatprep.subr.bf16.mxu1 %v5342_v22  ;;  %v5421_v22 = vcombine.low %v2076_v15, %v2080_v16  ;;  %v5414_v24 = vcombine.high %v2068_v52, %v2072_v20  ;;  %v1893_v15 = vld [vmem:[#allocation17 + $0x1d8] sm:$0xff] }
 0x495   : > { %v1897_v16 = vld [vmem:[#allocation17 + $0x1f8] sm:$0xff] }
 0x496   : > { %3541 = vmatpush1.bf16.msra.mxu0 %v5213_v14  ;;  %v2060_v14 = vld [vmem:[#allocation17 + $0x710] sm:$0xff] }
 0x497   : > { %3582 = vmatpush1.bf16.msra.mxu1 %v5341_v13  ;;  %3542 = vmatprep.subr.bf16.mxu0 %v5206_v29  ;;  %v2064_v13 = vld [vmem:[#allocation17 + $0x730] sm:$0xff]  ;;  %v5285_v29 = vcombine.low %v1940_v51, %v1944_v44  ;;  %v5240_v51 = vcombine.high %v1893_v15, %v1897_v16 }
 0x498   : > { %3583 = vmatprep.subr.bf16.mxu1 %v5334_v9  ;;  %v5413_v9 = vcombine.low %v2068_v52, %v2072_v20  ;;  %v5406_v30 = vcombine.high %v2060_v14, %v2064_v13  ;;  %v1885_v52 = vld [vmem:[#allocation17 + $0x198] sm:$0xff] }
 0x499   : > { %v1889_v20 = vld [vmem:[#allocation17 + $0x1b8] sm:$0xff] }
 0x49a   : > { %3543 = vmatpush1.bf16.msra.mxu0 %v5205_v35  ;;  %v2052_v35 = vld [vmem:[#allocation17 + $0x6d0] sm:$0xff] }
 0x49b   : > { %3584 = vmatpush1.bf16.msra.mxu1 %v5333_v36  ;;  %3544 = vmatprep.subr.bf16.mxu0 %v5198_v39  ;;  %v2056_v36 = vld [vmem:[#allocation17 + $0x6f0] sm:$0xff]  ;;  %v5277_v39 = vcombine.low %v1932_v26, %v1936_v28  ;;  %v5232_v26 = vcombine.high %v1885_v52, %v1889_v20  ;;  %v1877_v28 = vld [vmem:[#allocation17 + $0x158] sm:$0xff] }
 0x49c   : > { %3585 = vmatprep.subr.bf16.mxu1 %v5326_v40  ;;  %v5405_v40 = vcombine.low %v2060_v14, %v2064_v13  ;;  %v5398_v46 = vcombine.high %v2052_v35, %v2056_v36  ;;  %v1881_v14 = vld [vmem:[#allocation17 + $0x178] sm:$0xff] }
 0x49e   : > { %3545 = vmatpush1.bf16.msra.mxu0 %v5197_v53  ;;  %v2044_v53 = vld [vmem:[#allocation17 + $0x690] sm:$0xff] }
 0x49f   : > { %3586 = vmatpush1.bf16.msra.mxu1 %v5325_v54  ;;  %3546 = vmatprep.subr.bf16.mxu0 %v5190_v55  ;;  %v2048_v54 = vld [vmem:[#allocation17 + $0x6b0] sm:$0xff]  ;;  %v5269_v55 = vcombine.low %v1924_v31, %v1928_v32  ;;  %v5224_v31 = vcombine.high %v1877_v28, %v1881_v14 }
 0x4a0   : > { %3587 = vmatprep.subr.bf16.mxu1 %v5318_v58  ;;  %v5397_v58 = vcombine.low %v2052_v35, %v2056_v36  ;;  %v5390_v49 = vcombine.high %v2044_v53, %v2048_v54  ;;  %v1869_v35 = vld [vmem:[#allocation17 + $0x118] sm:$0xff] }
 0x4a1   : > { %v1873_v36 = vld [vmem:[#allocation17 + $0x138] sm:$0xff] }
 0x4a2   : > { %3547 = vmatpush1.bf16.msra.mxu0 %v5189_v61  ;;  %v2036_v61 = vld [vmem:[#allocation17 + $0x650] sm:$0xff] }
 0x4a3   : > { %3588 = vmatpush1.bf16.msra.mxu1 %v5317_v62  ;;  %3548 = vmatprep.subr.bf16.mxu0 %v5182_v1  ;;  %v2040_v62 = vld [vmem:[#allocation17 + $0x670] sm:$0xff]  ;;  %v5261_v1 = vcombine.low %v1916_v48, %v1920_v50  ;;  %v5216_v48 = vcombine.high %v1869_v35, %v1873_v36  ;;  %v1861_v50 = vld [vmem:[#allocation17 + $0xd8] sm:$0xff] }
 0x4a4   : > { %3589 = vmatprep.subr.bf16.mxu1 %v5310_v2  ;;  %v5389_v2 = vcombine.low %v2044_v53, %v2048_v54  ;;  %v5382_v5 = vcombine.high %v2036_v61, %v2040_v62  ;;  %v1865_v53 = vld [vmem:[#allocation17 + $0xf8] sm:$0xff] }
 0x4a5   : > { %v1989_v54 = vld [vmem:[#allocation17 + $0x4d8] sm:$0xff] }
 0x4a6   : > { %3549 = vmatpush1.bf16.msra.mxu0 %v5181_v63  ;;  %v2028_v63 = vld [vmem:[#allocation17 + $0x610] sm:$0xff] }
 0x4a7   : > { %3590 = vmatpush1.bf16.msra.mxu1 %v5309_v0  ;;  %3550 = vmatprep.subr.bf16.mxu0 %v5302_v4  ;;  %v2032_v0 = vld [vmem:[#allocation17 + $0x630] sm:$0xff]  ;;  %v5253_v4 = vcombine.low %v1908_v59, %v1912_v60  ;;  %v1853_v59 = vld [vmem:[#allocation17 + $0x98] sm:$0xff] }
 0x4a8   : > { %3591 = vmatprep.subr.bf16.mxu1 %v5430_v8  ;;  %v5381_v8 = vcombine.low %v2036_v61, %v2040_v62  ;;  %v5374_v12 = vcombine.high %v2028_v63, %v2032_v0  ;;  %v1857_v60 = vld [vmem:[#allocation17 + $0xb8] sm:$0xff] }
 0x4a9   : > { %v1981_v61 = vld [vmem:[#allocation17 + $0x498] sm:$0xff] }
 0x4aa   : > { %3551 = vmatpush2.bf16.msra.mxu0 %v5301_v17  ;;  %v2021_v17 = vld [vmem:[#allocation17 + $0x5d8] sm:$0xff] }
 0x4ab   : > { %3592 = vmatpush2.bf16.msra.mxu1 %v5429_v18  ;;  %3552 = vmatprep.subr.bf16.mxu0 %v5294_v19  ;;  %v2025_v18 = vld [vmem:[#allocation17 + $0x5f8] sm:$0xff]  ;;  %v5245_v19 = vcombine.low %v1900_v6, %v1904_v7 }
 0x4ac   : > { %3593 = vmatprep.subr.bf16.mxu1 %v5422_v43  ;;  %v5373_v43 = vcombine.low %v2028_v63, %v2032_v0  ;;  %v5368_v44 = vcombine.high %v2021_v17, %v2025_v18  ;;  %v1985_v62 = vld [vmem:[#allocation17 + $0x4b8] sm:$0xff] }
 0x4ad   : > { %v1845_v6 = vld [vmem:[#allocation17 + $0x58] sm:$0xff] }
 0x4ae   : > { %3553 = vmatpush2.bf16.msra.mxu0 %v5293_v21  ;;  %v5239_v21 = vcombine.low %v1893_v15, %v1897_v16  ;;  %v1849_v7 = vld [vmem:[#allocation17 + $0x78] sm:$0xff] }
 0x4af   : > { %3594 = vmatpush2.bf16.msra.mxu1 %v5421_v22  ;;  %3554 = vmatprep.subr.bf16.mxu0 %v5286_v23  ;;  %v2013_v22 = vld [vmem:[#allocation17 + $0x598] sm:$0xff] }
 0x4b0   : > { %3595 = vmatprep.subr.bf16.mxu1 %v5414_v24  ;;  %v2017_v23 = vld [vmem:[#allocation17 + $0x5b8] sm:$0xff]  ;;  %v5367_v24 = vcombine.low %v2021_v17, %v2025_v18 }
 0x4b1   : > { %v5360_v13 = vcombine.high %v2013_v22, %v2017_v23  ;;  %v1973_v63 = vld [vmem:[#allocation17 + $0x458] sm:$0xff] }
 0x4b2   : > { %3555 = vmatpush2.bf16.msra.mxu0 %v5285_v29  ;;  %v2005_v29 = vld [vmem:[#allocation17 + $0x558] sm:$0xff] }
 0x4b3   : > { %3596 = vmatpush2.bf16.msra.mxu1 %v5413_v9  ;;  %3556 = vmatprep.subr.bf16.mxu0 %v5278_v10  ;;  %v2009_v9 = vld [vmem:[#allocation17 + $0x578] sm:$0xff]  ;;  %v5231_v10 = vcombine.low %v1885_v52, %v1889_v20 }
 0x4b4   : > { %3597 = vmatprep.subr.bf16.mxu1 %v5406_v30  ;;  %v5359_v30 = vcombine.low %v2013_v22, %v2017_v23  ;;  %v5352_v32 = vcombine.high %v2005_v29, %v2009_v9  ;;  %v1977_v0 = vld [vmem:[#allocation17 + $0x478] sm:$0xff] }
 0x4b5   : > { %v1837_v15 = vld [vmem:[#allocation17 + $0x18] sm:$0xff] }
 0x4b6   : > { %3557 = vmatpush2.bf16.msra.mxu0 %v5277_v39  ;;  %v1997_v39 = vld [vmem:[#allocation17 + $0x518] sm:$0xff] }
 0x4b7   : > { %3598 = vmatpush2.bf16.msra.mxu1 %v5405_v40  ;;  %3558 = vmatprep.subr.bf16.mxu0 %v5270_v45  ;;  %v2001_v40 = vld [vmem:[#allocation17 + $0x538] sm:$0xff]  ;;  %v5223_v45 = vcombine.low %v1877_v28, %v1881_v14 }
 0x4b8   : > { %3599 = vmatprep.subr.bf16.mxu1 %v5398_v46  ;;  %v5351_v46 = vcombine.low %v2005_v29, %v2009_v9  ;;  %v1841_v16 = vld [vmem:[#allocation17 + $0x38] sm:$0xff] }
 0x4b9   : > { %v1965_v17 = vld [vmem:[#allocation17 + $0x418] sm:$0xff]  ;;  %v5183_v23 = vcombine.low %v1837_v15, %v1841_v16 }
 0x4ba   : > { %3559 = vmatpush2.bf16.msra.mxu0 %v5269_v55  ;;  %v1993_v55 = vld [vmem:[#allocation17 + $0x4f8] sm:$0xff] }
 0x4bb   : > { %3600 = vmatpush2.bf16.msra.mxu1 %v5397_v58  ;;  %3560 = vmatprep.subr.bf16.mxu0 %v5262_v47  ;;  %v5343_v58 = vcombine.low %v1997_v39, %v2001_v40  ;;  %v5208_v47 = vcombine.high %v1861_v50, %v1865_v53  ;;  %v1969_v18 = vld [vmem:[#allocation17 + $0x438] sm:$0xff] }
 0x4bc   : > { %3601 = vmatprep.subr.bf16.mxu1 %v5390_v49  ;;  %v5336_v49 = vcombine.high %v1989_v54, %v1993_v55  ;;  %v1957_v52 = vld [vmem:[#allocation17 + $0x3d8] sm:$0xff] }
 0x4bd   : > { %v1961_v20 = vld [vmem:[#allocation17 + $0x3f8] sm:$0xff] }
 0x4be   : > { %3561 = vmatpush2.bf16.msra.mxu0 %v5261_v1  ;;  %v5207_v1 = vcombine.low %v1861_v50, %v1865_v53  ;;  %v2089_v22 = vld [vmem:[#allocation17 + $0x7f8] sm:$0xff] }
 0x4bf   : > { %3602 = vmatpush2.bf16.msra.mxu1 %v5389_v2  ;;  %3562 = vmatprep.subr.bf16.mxu0 %v5254_v3  ;;  %v5335_v2 = vcombine.low %v1989_v54, %v1993_v55  ;;  %v5200_v3 = vcombine.high %v1853_v59, %v1857_v60  ;;  %v1949_v14 = vld [vmem:[#allocation17 + $0x398] sm:$0xff] }
 0x4c0   : > { %3603 = vmatprep.subr.bf16.mxu1 %v5382_v5  ;;  %v5328_v5 = vcombine.high %v1981_v61, %v1985_v62  ;;  %v2077_v29 = vld [vmem:[#allocation17 + $0x798] sm:$0xff] }
 0x4c1   : > { %v2081_v9 = vld [vmem:[#allocation17 + $0x7b8] sm:$0xff] }
 0x4c2   : > { %3563 = vmatpush2.bf16.msra.mxu0 %v5253_v4  ;;  %v5199_v4 = vcombine.low %v1853_v59, %v1857_v60  ;;  %v1933_v50 = vld [vmem:[#allocation17 + $0x318] sm:$0xff] }
 0x4c3   : > { %3604 = vmatpush2.bf16.msra.mxu1 %v5381_v8  ;;  %3564 = vmatprep.subr.bf16.mxu0 %v5246_v11  ;;  %v5327_v8 = vcombine.low %v1981_v61, %v1985_v62  ;;  %v5192_v11 = vcombine.high %v1845_v6, %v1849_v7  ;;  %v1937_v53 = vld [vmem:[#allocation17 + $0x338] sm:$0xff] }
 0x4c4   : > { %3605 = vmatprep.subr.bf16.mxu1 %v5374_v12  ;;  %v5320_v12 = vcombine.high %v1973_v63, %v1977_v0  ;;  %v2061_v54 = vld [vmem:[#allocation17 + $0x718] sm:$0xff] }
 0x4c5   : > { %v2065_v55 = vld [vmem:[#allocation17 + $0x738] sm:$0xff] }
 0x4c6   : > { %3565 = vmatpush2.bf16.msra.mxu0 %v5245_v19  ;;  %v5191_v19 = vcombine.low %v1845_v6, %v1849_v7  ;;  %v1925_v59 = vld [vmem:[#allocation17 + $0x2d8] sm:$0xff] }
 0x4c7   : > { %3606 = vmatpush2.bf16.msra.mxu1 %v5373_v43  ;;  %3616 = vmatprep.subr.bf16.mxu0 %v5240_v51  ;;  %v5319_v43 = vcombine.low %v1973_v63, %v1977_v0  ;;  %v5184_v51 = vcombine.high %v1837_v15, %v1841_v16  ;;  %v1929_v60 = vld [vmem:[#allocation17 + $0x2f8] sm:$0xff] }
 0x4c8   : > { %3657 = vmatprep.subr.bf16.mxu1 %v5368_v44  ;;  %v5312_v44 = vcombine.high %v1965_v17, %v1969_v18  ;;  %v2053_v61 = vld [vmem:[#allocation17 + $0x6d8] sm:$0xff] }
 0x4c9   : > { %3567 = vmatmul.mubr.bf16.vlgmr.msra.gmra.mxu0 %v7039_v41  ;;  %v2057_v62 = vld [vmem:[#allocation17 + $0x6f8] sm:$0xff] }
 0x4ca   : > { %3608 = vmatmul.mubr.bf16.vlgmr.msra.gmra.mxu1 %v7041_v42  ;;  %3617 = vmatpush1.bf16.msra.mxu0 %v5239_v21  ;;  %v2085_v21 = vld [vmem:[#allocation17 + $0x7d8] sm:$0xff] }
 0x4cb   : > { %3648 = vmatprep.mubr.bf16.mxu0 %v7035_v37  ;;  %3658 = vmatpush1.bf16.msra.mxu1 %v5367_v24  ;;  %v5344_v37 = vcombine.high %v1997_v39, %v2001_v40  ;;  %v5311_v24 = vcombine.low %v1965_v17, %v1969_v18  ;;  %v5432_v28 = vcombine.high %v2085_v21, %v2089_v22  ;;  %v2069_v39 = vld [vmem:[#allocation17 + $0x758] sm:$0xff] }
 0x4cc   : > { %3689 = vmatprep.mubr.bf16.mxu1 %v7037_v38  ;;  %3618 = vmatprep.subr.bf16.mxu0 %v5232_v26  ;;  %v5215_v38 = vcombine.low %v1869_v35, %v1873_v36  ;;  %v5304_v26 = vcombine.high %v1957_v52, %v1961_v20  ;;  %v1941_v35 = vld [vmem:[#allocation17 + $0x358] sm:$0xff] }
 0x4cd   : > { %3659 = vmatprep.subr.bf16.mxu1 %v5360_v13  ;;  %v1953_v13 = vld [vmem:[#allocation17 + $0x3b8] sm:$0xff] }
 0x4ce   : > { %3619 = vmatpush1.bf16.msra.mxu0 %v5231_v10  ;;  %v5303_v10 = vcombine.low %v1957_v52, %v1961_v20  ;;  %v1945_v36 = vld [vmem:[#allocation17 + $0x378] sm:$0xff] }
 0x4cf   : > { %3660 = vmatpush1.bf16.msra.mxu1 %v5359_v30  ;;  %3620 = vmatprep.subr.bf16.mxu0 %v5224_v31  ;;  %v5431_v30 = vcombine.low %v2085_v21, %v2089_v22  ;;  %v5296_v31 = vcombine.high %v1949_v14, %v1953_v13  ;;  %v2073_v40 = vld [vmem:[#allocation17 + $0x778] sm:$0xff] }
 0x4d0   : > { %3661 = vmatprep.subr.bf16.mxu1 %v5352_v32  ;;  %v5424_v32 = vcombine.high %v2077_v29, %v2081_v9  ;;  %v1917_v6 = vld [vmem:[#allocation17 + $0x298] sm:$0xff] }
 0x4d1   : > { %v1921_v7 = vld [vmem:[#allocation17 + $0x2b8] sm:$0xff] }
 0x4d2   : > { %3621 = vmatpush1.bf16.msra.mxu0 %v5223_v45  ;;  %v5295_v45 = vcombine.low %v1949_v14, %v1953_v13  ;;  %v2045_v63 = vld [vmem:[#allocation17 + $0x698] sm:$0xff] }
 0x4d3   : > { %3662 = vmatpush1.bf16.msra.mxu1 %v5351_v46  ;;  %3622 = vmatprep.subr.bf16.mxu0 %v5216_v48  ;;  %v5423_v46 = vcombine.low %v2077_v29, %v2081_v9  ;;  %v5288_v48 = vcombine.high %v1941_v35, %v1945_v36  ;;  %v2049_v0 = vld [vmem:[#allocation17 + $0x6b8] sm:$0xff] }
 0x4d4   : > { %3663 = vmatprep.subr.bf16.mxu1 %v5344_v37  ;;  %v5416_v37 = vcombine.high %v2069_v39, %v2073_v40  ;;  %v1909_v15 = vld [vmem:[#allocation17 + $0x258] sm:$0xff] }
 0x4d5   : > { %v1913_v16 = vld [vmem:[#allocation17 + $0x278] sm:$0xff] }
 0x4d6   : > { %3623 = vmatpush1.bf16.msra.mxu0 %v5215_v38  ;;  %v5287_v38 = vcombine.low %v1941_v35, %v1945_v36  ;;  %v2037_v17 = vld [vmem:[#allocation17 + $0x658] sm:$0xff] }
 0x4d7   : > { %3664 = vmatpush1.bf16.msra.mxu1 %v5343_v58  ;;  %3624 = vmatprep.subr.bf16.mxu0 %v5208_v47  ;;  %v5415_v58 = vcombine.low %v2069_v39, %v2073_v40  ;;  %v5280_v47 = vcombine.high %v1933_v50, %v1937_v53  ;;  %v2041_v18 = vld [vmem:[#allocation17 + $0x678] sm:$0xff] }
 0x4d8   : > { %3665 = vmatprep.subr.bf16.mxu1 %v5336_v49  ;;  %v5408_v49 = vcombine.high %v2061_v54, %v2065_v55  ;;  %v1901_v52 = vld [vmem:[#allocation17 + $0x218] sm:$0xff] }
 0x4d9   : > { %v1905_v20 = vld [vmem:[#allocation17 + $0x238] sm:$0xff] }
 0x4da   : > { %3625 = vmatpush1.bf16.msra.mxu0 %v5207_v1  ;;  %v5279_v1 = vcombine.low %v1933_v50, %v1937_v53  ;;  %v2029_v21 = vld [vmem:[#allocation17 + $0x618] sm:$0xff]  ;;  %v5247_v14 = vcombine.low %v1901_v52, %v1905_v20 }
 0x4db   : > { %3666 = vmatpush1.bf16.msra.mxu1 %v5335_v2  ;;  %3626 = vmatprep.subr.bf16.mxu0 %v5200_v3  ;;  %v5407_v2 = vcombine.low %v2061_v54, %v2065_v55  ;;  %v5272_v3 = vcombine.high %v1925_v59, %v1929_v60  ;;  %v2033_v22 = vld [vmem:[#allocation17 + $0x638] sm:$0xff] }
 0x4dc   : > { %3667 = vmatprep.subr.bf16.mxu1 %v5328_v5  ;;  %v5400_v5 = vcombine.high %v2053_v61, %v2057_v62  ;;  %v5375_v13 = vcombine.low %v2029_v21, %v2033_v22 }
 0x4de   : > { %3627 = vmatpush1.bf16.msra.mxu0 %v5199_v4  ;;  %v5271_v4 = vcombine.low %v1925_v59, %v1929_v60  ;;  %v5939_v59 = vld [vmem:[%s6922_s28 + $0x70] sm:$0xff]  }
 0x4df   : > { %3668 = vmatpush1.bf16.msra.mxu1 %v5327_v8  ;;  %3628 = vmatprep.subr.bf16.mxu0 %v5192_v11  ;;  %v5399_v8 = vcombine.low %v2053_v61, %v2057_v62  ;;  %v5264_v11 = vcombine.high %v1917_v6, %v1921_v7  ;;  %v5940_v60 = vld [vmem:[%s6922_s28 + $0xf0] sm:$0xff]  }
 0x4e0   : > { %3669 = vmatprep.subr.bf16.mxu1 %v5320_v12  ;;  %v5392_v12 = vcombine.high %v2045_v63, %v2049_v0  ;;  %v5941_v61 = vld [vmem:[%s6922_s28 + $0x30] sm:$0xff]  }
 0x4e1   : > { %v5942_v62 = vld [vmem:[%s6922_s28 + $0xb0] sm:$0xff]  }
 0x4e2   : > { %3629 = vmatpush1.bf16.msra.mxu0 %v5191_v19  ;;  %v5263_v19 = vcombine.low %v1917_v6, %v1921_v7  ;;  %v5943_v6 = vld [vmem:[%s6922_s28 + $0x68] sm:$0xff]  }
 0x4e3   : > { %3670 = vmatpush1.bf16.msra.mxu1 %v5319_v43  ;;  %3630 = vmatprep.subr.bf16.mxu0 %v5184_v51  ;;  %v5391_v43 = vcombine.low %v2045_v63, %v2049_v0  ;;  %v5256_v51 = vcombine.high %v1909_v15, %v1913_v16  ;;  %v5944_v7 = vld [vmem:[%s6922_s28 + $0xe8] sm:$0xff]  }
 0x4e4   : > { %3671 = vmatprep.subr.bf16.mxu1 %v5312_v44  ;;  %v5384_v44 = vcombine.high %v2037_v17, %v2041_v18  ;;  %v5945_v0 = vld [vmem:[%s6922_s28 + $0x28] sm:$0xff]  }
 0x4e6   : > { %3631 = vmatpush1.bf16.msra.mxu0 %v5183_v23  ;;  %v5255_v23 = vcombine.low %v1909_v15, %v1913_v16  ;;  %v5947_v16 = vld [vmem:[%s6922_s28 + $0x60] sm:$0xff]  }
 0x4e7   : > { %3672 = vmatpush1.bf16.msra.mxu1 %v5311_v24  ;;  %3632 = vmatprep.subr.bf16.mxu0 %v5304_v26  ;;  %v5383_v24 = vcombine.low %v2037_v17, %v2041_v18  ;;  %v5248_v26 = vcombine.high %v1901_v52, %v1905_v20  ;;  %v5948_v17 = vld [vmem:[%s6922_s28 + $0xe0] sm:$0xff]   ;;  %v5953_v52 = vld [vmem:[%s6922_s28 + $0x18] sm:$0xff]  }
 0x4e8   : > { %3673 = vmatprep.subr.bf16.mxu1 %v5432_v28  ;;  %v5376_v28 = vcombine.high %v2029_v21, %v2033_v22  ;;  %v5954_v20 = vld [vmem:[%s6922_s28 + $0x98] sm:$0xff]   ;;  %v5955_v21 = vld [vmem:[%s6922_s28 + $0x50] sm:$0xff]  }
 0x4e9   : > { %v5956_v22 = vld [vmem:[%s6922_s28 + $0xd0] sm:$0xff]  }
 0x4ea   : > { %3633 = vmatpush2.bf16.msra.mxu0 %v5303_v10 }
 0x4eb   : > { %3674 = vmatpush2.bf16.msra.mxu1 %v5431_v30  ;;  %3634 = vmatprep.subr.bf16.mxu0 %v5296_v31 }
 0x4ec   : > { %3675 = vmatprep.subr.bf16.mxu1 %v5424_v32 }
 0x4ee   : > { %3635 = vmatpush2.bf16.msra.mxu0 %v5295_v45 }
 0x4ef   : > { %3676 = vmatpush2.bf16.msra.mxu1 %v5423_v46  ;;  %3636 = vmatprep.subr.bf16.mxu0 %v5288_v48 }
 0x4f0   : > { %3677 = vmatprep.subr.bf16.mxu1 %v5416_v37 }
 0x4f2   : > { %3637 = vmatpush2.bf16.msra.mxu0 %v5287_v38  ;;  %v5935_v38 = vld [vmem:[%s6922_s28 + $0x78] sm:$0xff]  }
 0x4f3   : > { %3678 = vmatpush2.bf16.msra.mxu1 %v5415_v58  ;;  %3638 = vmatprep.subr.bf16.mxu0 %v5280_v47  ;;  %v5936_v58 = vld [vmem:[%s6922_s28 + $0xf8] sm:$0xff]  }
 0x4f4   : > { %3679 = vmatprep.subr.bf16.mxu1 %v5408_v49  ;;  %v5937_v47 = vld [vmem:[%s6922_s28 + $0x38] sm:$0xff]  }
 0x4f5   : > { %v5938_v49 = vld [vmem:[%s6922_s28 + $0xb8] sm:$0xff]  }
 0x4f6   : > { %3639 = vmatpush2.bf16.msra.mxu0 %v5279_v1 }
 0x4f7   : > { %3680 = vmatpush2.bf16.msra.mxu1 %v5407_v2  ;;  %3640 = vmatprep.subr.bf16.mxu0 %v5272_v3 }
 0x4f8   : > { %3681 = vmatprep.subr.bf16.mxu1 %v5400_v5 }
 0x4fa   : > { %3641 = vmatpush2.bf16.msra.mxu0 %v5271_v4  ;;  %v5946_v4 = vld [vmem:[%s6922_s28 + $0xa8] sm:$0xff]  }
 0x4fb   : > { %3682 = vmatpush2.bf16.msra.mxu1 %v5399_v8  ;;  %3642 = vmatprep.subr.bf16.mxu0 %v5264_v11 }
 0x4fc   : > { %3683 = vmatprep.subr.bf16.mxu1 %v5392_v12 }
 0x4fe   : > { %3643 = vmatpush2.bf16.msra.mxu0 %v5263_v19  ;;  %v5949_v19 = vld [vmem:[%s6922_s28 + $0x20] sm:$0xff]  }
 0x4ff   : > { %3684 = vmatpush2.bf16.msra.mxu1 %v5391_v43  ;;  %3644 = vmatprep.subr.bf16.mxu0 %v5256_v51  ;;  %v5950_v43 = vld [vmem:[%s6922_s28 + $0xa0] sm:$0xff]   ;;  %v5951_v51 = vld [vmem:[%s6922_s28 + $0x58] sm:$0xff]  }
 0x500   : > { %3685 = vmatprep.subr.bf16.mxu1 %v5384_v44  ;;  %v5952_v44 = vld [vmem:[%s6922_s28 + $0xd8] sm:$0xff]  }
 0x502   : > { %3645 = vmatpush2.bf16.msra.mxu0 %v5255_v23  ;;  %v5957_v23 = vld [vmem:[%s6922_s28 + $0x10] sm:$0xff]  }
 0x503   : > { %3686 = vmatpush2.bf16.msra.mxu1 %v5383_v24  ;;  %3646 = vmatprep.subr.bf16.mxu0 %v5248_v26  ;;  %v5958_v24 = vld [vmem:[%s6922_s28 + $0x90] sm:$0xff]   ;;  %v5959_v26 = vld [vmem:[%s6922_s28 + $0x48] sm:$0xff]  }
 0x504   : > { %3687 = vmatprep.subr.bf16.mxu1 %v5376_v28  ;;  %v5960_v28 = vld [vmem:[%s6922_s28 + $0xc8] sm:$0xff]  }
 0x506   : > { %3647 = vmatpush2.bf16.msra.mxu0 %v5247_v14  ;;  %v5961_v14 = vld [vmem:[%s6922_s28 + $0x8] sm:$0xff]  }
 0x507   : > { %3688 = vmatpush2.bf16.msra.mxu1 %v5375_v13  ;;  %5523 = vmatprep.subr.bf16.mxu0 %v5935_v38  ;;  %v5962_v13 = vld [vmem:[%s6922_s28 + $0x88] sm:$0xff]  }
 0x508   : > { %5545 = vmatprep.subr.bf16.mxu1 %v5936_v58 }
 0x509   : > { %3649 = vmatmul.mubr.bf16.vlgmr.msra.gmra.mxu0 %v7039_v41  ;;  %v3404_v29 = vpop.f32.mrf.mxu0  ;;  %v3445_v9 = vpop.f32.mrf.mxu1 }
 0x50a   : > { %3690 = vmatmul.mubr.bf16.vlgmr.msra.gmra.mxu1 %v7041_v42  ;;  %v7065_v10 = vadd.f32 %v3445_v9, %v3404_v29  ;;  %5524 = vmatpush3.bf16.msra.mxu0 %v5937_v47  ;;  %v5963_v29 = vld [vmem:[%s6922_s28 + $0x40] sm:$0xff]  }
 0x50b   : > { %v3406_v30 = vpop.f32.mrf.mxu0  ;;  %v3447_v31 = vpop.f32.mrf.mxu1  ;;  %5546 = vmatpush3.bf16.msra.mxu1 %v5938_v49  ;;  %5525 = vmatprep.subr.bf16.mxu0 %v5939_v59  ;;  %v5964_v9 = vld [vmem:[%s6922_s28 + $0xc0] sm:$0xff]  }
 0x50c   : > { %v7067_v32 = vadd.f32 %v3447_v31, %v3406_v30  ;;  %5547 = vmatprep.subr.bf16.mxu1 %v5940_v60  ;;  %v5965_v30 = vld [vmem:[%s6922_s28] sm:$0xff]  }
 0x50d   : > { %v3408_v35 = vpop.f32.mrf.mxu0  ;;  %v3449_v36 = vpop.f32.mrf.mxu1  ;;  %v5966_v31 = vld [vmem:[%s6922_s28 + $0x80] sm:$0xff]  }
 0x50e   : > { %5526 = vmatpush3.bf16.msra.mxu0 %v5941_v61  ;;  %v5967_v36 = vld [vmem:[%s6922_s28 + $0x178] sm:$0xff]  }
 0x50f   : > { %v3409_v39 = vpop.f32.mrf.mxu0  ;;  %v3450_v40 = vpop.f32.mrf.mxu1  ;;  %5548 = vmatpush3.bf16.msra.mxu1 %v5942_v62  ;;  %5527 = vmatprep.subr.bf16.mxu0 %v5943_v6 }
 0x510   : > { %5549 = vmatprep.subr.bf16.mxu1 %v5944_v7  ;;  %v5968_v39 = vld [vmem:[%s6922_s28 + $0x1f8] sm:$0xff]   ;;  %v3704_v40 = vrot.slane %v7067_v32, 4 }
 0x512   : > { %5528 = vmatpush3.bf16.msra.mxu0 %v5945_v0 }
 0x513   : > { %5550 = vmatpush3.bf16.msra.mxu1 %v5946_v4  ;;  %5529 = vmatprep.subr.bf16.mxu0 %v5947_v16 }
 0x514   : > { %5551 = vmatprep.subr.bf16.mxu1 %v5948_v17 }
 0x516   : > { %5530 = vmatpush3.bf16.msra.mxu0 %v5949_v19 }
 0x517   : > { %5552 = vmatpush3.bf16.msra.mxu1 %v5950_v43  ;;  %5531 = vmatprep.subr.bf16.mxu0 %v5951_v51 }
 0x518   : > { %5553 = vmatprep.subr.bf16.mxu1 %v5952_v44 }
 0x51a   : > { %5532 = vmatpush3.bf16.msra.mxu0 %v5953_v52 }
 0x51b   : > { %5554 = vmatpush3.bf16.msra.mxu1 %v5954_v20  ;;  %5533 = vmatprep.subr.bf16.mxu0 %v5955_v21 }
 0x51c   : > { %5555 = vmatprep.subr.bf16.mxu1 %v5956_v22 }
 0x51e   : > { %5534 = vmatpush3.bf16.msra.mxu0 %v5957_v23 }
 0x51f   : > { %5556 = vmatpush3.bf16.msra.mxu1 %v5958_v24  ;;  %5535 = vmatprep.subr.bf16.mxu0 %v5959_v26 }
 0x520   : > { %5557 = vmatprep.subr.bf16.mxu1 %v5960_v28 }
 0x522   : > { %5536 = vmatpush3.bf16.msra.mxu0 %v5961_v14 }
 0x523   : > { %5558 = vmatpush3.bf16.msra.mxu1 %v5962_v13  ;;  %5537 = vmatprep.subr.bf16.mxu0 %v5963_v29 }
 0x524   : > { %5559 = vmatprep.subr.bf16.mxu1 %v5964_v9 }
 0x526   : > { %5538 = vmatpush3.bf16.msra.mxu0 %v5965_v30 }
 0x527   : > { %5560 = vmatpush3.bf16.msra.mxu1 %v5966_v31  ;;  %5567 = vmatprep.subr.bf16.mxu0 %v5967_v36 }
 0x528   : > { %5589 = vmatprep.subr.bf16.mxu1 %v5968_v39 }
 0x549   : > { %v3486_v45 = vpop.f32.mrf.mxu0  ;;  %v3527_v41 = vpop.f32.mrf.mxu1 }
 0x54a   : > { %v7069_v46 = vadd.f32 %v3527_v41, %v3486_v45  ;;  %v3698_v41 = vrot.slane %v7065_v10, 4 }
 0x54b   : > { %v3488_v42 = vpop.f32.mrf.mxu0  ;;  %v3529_v48 = vpop.f32.mrf.mxu1 }
 0x54c   : > { %v7071_v37 = vadd.f32 %v3529_v48, %v3488_v42  ;;  %v3710_v45 = vrot.slane %v7069_v46, 4 }
 0x54d   : > { %v3490_v50 = vpop.f32.mrf.mxu0  ;;  %v3531_v53 = vpop.f32.mrf.mxu1 }
 0x54e   : > { %v3716_v35 = vrot.slane %v7071_v37, 4  ;;  %v3705_v50 = vadd.f32 %v3704_v40, %v7067_v32  ;;  %v3711_v53 = vadd.f32 %v3710_v45, %v7069_v46 }
 0x54f   : > { %v3491_v54 = vpop.f32.mrf.mxu0  ;;  %v3532_v55 = vpop.f32.mrf.mxu1 }
 0x550   : > { %v3717_v42 = vadd.f32 %v3716_v35, %v7071_v37  ;;  %v3699_v55 = vadd.f32 %v3698_v41, %v7065_v10  ;;  %v3706_v47 = vrot.slane %v3705_v50, 2  ;;  %v3712_v49 = vrot.slane %v3711_v53, 2 }
 0x552   : > { %v3718_v38 = vrot.slane %v3717_v42, 2  ;;  %v3700_v60 = vrot.slane %v3699_v55, 2 }
 0x554   : > { %v3719_v61 = vadd.f32 %v3718_v38, %v3717_v42  ;;  %v3701_v6 = vadd.f32 %v3700_v60, %v3699_v55 }
 0x556   : > { %v3720_v7 = vrot.slane %v3719_v61, 1 }
 0x589   : > { %v3568_v1 = vpop.f32.mrf.mxu0 }
 0x58a   : > { %v3609_v2 = vpop.f32.mrf.mxu1 }
 0x58b   : > { %v7081_v3 = vadd.f32 %v3609_v2, %v3568_v1  ;;  %v3570_v5 = vpop.f32.mrf.mxu0  ;;  %v3707_v1 = vadd.f32 %v3706_v47, %v3705_v50  ;;  %v3713_v2 = vadd.f32 %v3712_v49, %v3711_v53 }
 0x58c   : > { %v3611_v63 = vpop.f32.mrf.mxu1 }
 0x58d   : > { %v7087_v8 = vadd.f32 %v3611_v63, %v3570_v5  ;;  %v3572_v11 = vpop.f32.mrf.mxu0  ;;  %v3722_v54 = vrot.slane %v7081_v3, 4  ;;  %v3708_v0 = vrot.slane %v3707_v1, 1  ;;  %v3714_v4 = vrot.slane %v3713_v2, 1 }
 0x58e   : > { %v3613_v12 = vpop.f32.mrf.mxu1 }
 0x58f   : > { %v3573_v15 = vpop.f32.mrf.mxu0  ;;  %v3728_v48 = vrot.slane %v7087_v8, 4  ;;  %v3723_v59 = vadd.f32 %v3722_v54, %v7081_v3  ;;  %v3702_v12 = vrot.slane %v3701_v6, 1  ;;  %v3709_v17 = vadd.f32 %v3708_v0, %v3707_v1 }
 0x590   : > { %v3614_v18 = vpop.f32.mrf.mxu1  ;;  %v3721_v15 = vadd.f32 %v3720_v7, %v3719_v61 }
 0x591   : > { %v3729_v58 = vadd.f32 %v3728_v48, %v7087_v8  ;;  %v3724_v5 = vrot.slane %v3723_v59, 2  ;;  %v3715_v18 = vadd.f32 %v3714_v4, %v3713_v2  ;;  %v3703_v43 = vadd.f32 %v3702_v12, %v3701_v6 }
 0x592   : > { %v7123_v51 = vmul.f32 0.125, %v3721_v15  ;;  %v7125_v52 = vmul.f32 0.125, %v3709_v17 }
 0x593   : > { %v3730_v62 = vrot.slane %v3729_v58, 2  ;;  %v3725_v11 = vadd.f32 %v3724_v5, %v3723_v59  ;;  %v7127_v20 = vmul.f32 0.125, %v3715_v18  ;;  %v7129_v22 = vmul.f32 0.125, %v3703_v43 }
 0x594   : > { %v3757_v23 = vsub.f32 %v7071_v37, %v7123_v51  ;;  %v3755_v26 = vsub.f32 %v7067_v32, %v7125_v52 }
 0x595   : > { %v3731_v63 = vadd.f32 %v3730_v62, %v3729_v58  ;;  %v3726_v19 = vrot.slane %v3725_v11, 1  ;;  %v3756_v28 = vsub.f32 %v7069_v46, %v7127_v20  ;;  %v3754_v13 = vsub.f32 %v7065_v10, %v7129_v22 }
 0x596   : > { %v3765_v29 = vmul.f32 %v3757_v23, %v3757_v23  ;;  %v3763_v30 = vmul.f32 %v3755_v26, %v3755_v26 }
 0x597   : > { %v3732_v16 = vrot.slane %v3731_v63, 1  ;;  %v3727_v21 = vadd.f32 %v3726_v19, %v3725_v11  ;;  %v3764_v31 = vmul.f32 %v3756_v28, %v3756_v28  ;;  %v3762_v36 = vmul.f32 %v3754_v13, %v3754_v13 }
 0x598   : > { %v3788_v39 = vrot.slane %v3765_v29, 4  ;;  %v3776_v41 = vrot.slane %v3763_v30, 4 }
 0x599   : > { %v3733_v44 = vadd.f32 %v3732_v16, %v3731_v63  ;;  %v7139_v14 = vmul.f32 0.125, %v3727_v21  ;;  %v3782_v48 = vrot.slane %v3764_v31, 4  ;;  %v3770_v55 = vrot.slane %v3762_v36, 4 }
 0x59a   : > { %v3789_v58 = vadd.f32 %v3788_v39, %v3765_v29  ;;  %v3777_v61 = vadd.f32 %v3776_v41, %v3763_v30 }
 0x59b   : > { %v7133_v24 = vmul.f32 0.125, %v3733_v44  ;;  %v3758_v35 = vsub.f32 %v7081_v3, %v7139_v14  ;;  %v3783_v1 = vadd.f32 %v3782_v48, %v3764_v31  ;;  %v3771_v63 = vadd.f32 %v3770_v55, %v3762_v36 }
 0x59c   : > { %v3790_v4 = vrot.slane %v3789_v58, 2  ;;  %v3778_v16 = vrot.slane %v3777_v61, 2 }
 0x59d   : > { %v3759_v9 = vsub.f32 %v7087_v8, %v7133_v24  ;;  %v3766_v50 = vmul.f32 %v3758_v35, %v3758_v35  ;;  %v3784_v17 = vrot.slane %v3783_v1, 2  ;;  %v3772_v44 = vrot.slane %v3771_v63, 2 }
 0x59e   : > { %v3791_v21 = vadd.f32 %v3790_v4, %v3789_v58  ;;  %v3779_v13 = vadd.f32 %v3778_v16, %v3777_v61 }
 0x59f   : > { %v3767_v40 = vmul.f32 %v3759_v9, %v3759_v9  ;;  %v3794_v2 = vrot.slane %v3766_v50, 4  ;;  %v3785_v29 = vadd.f32 %v3784_v17, %v3783_v1  ;;  %v3773_v35 = vadd.f32 %v3772_v44, %v3771_v63 }
 0x5a0   : > { %v3792_v36 = vrot.slane %v3791_v21, 1  ;;  %v3780_v41 = vrot.slane %v3779_v13, 1 }
 0x5a1   : > { %v3800_v47 = vrot.slane %v3767_v40, 4  ;;  %v3795_v18 = vadd.f32 %v3794_v2, %v3766_v50  ;;  %v3774_v55 = vrot.slane %v3773_v35, 1 }
 0x5a3   : > { %v3801_v11 = vadd.f32 %v3800_v47, %v3767_v40  ;;  %v3796_v9 = vrot.slane %v3795_v18, 2 }
 0x5a5   : > { %v3802_v23 = vrot.slane %v3801_v11, 2  ;;  %v3797_v48 = vadd.f32 %v3796_v9, %v3795_v18 }
 0x5a7   : > { %v3803_v39 = vadd.f32 %v3802_v23, %v3801_v11 }
 0x5a9   : > { %v3804_v58 = vrot.slane %v3803_v39, 1 }
 0x5c9   : > { %v3650_v45 = vpop.f32.mrf.mxu0 }
 0x5ca   : > { %v3691_v42 = vpop.f32.mrf.mxu1 }
 0x5cb   : > { %v7147_v53 = vadd.f32 %v3691_v42, %v3650_v45  ;;  %v3652_v54 = vpop.f32.mrf.mxu0  ;;  %v3786_v42 = vrot.slane %v3785_v29, 1 }
 0x5cc   : > { %v3693_v38 = vpop.f32.mrf.mxu1 }
 0x5cd   : > { %v3734_v49 = vrot.slane %v7147_v53, 4  ;;  %v7150_v59 = vadd.f32 %v3693_v38, %v3652_v54  ;;  %v3654_v60 = vpop.f32.mrf.mxu0  ;;  %v3793_v38 = vadd.f32 %v3792_v36, %v3791_v21  ;;  %v3787_v61 = vadd.f32 %v3786_v42, %v3785_v29 }
 0x5ce   : > { %v3695_v62 = vpop.f32.mrf.mxu1  ;;  %v3781_v60 = vadd.f32 %v3780_v41, %v3779_v13 }
 0x5cf   : > { %v3735_v5 = vadd.f32 %v3734_v49, %v7147_v53  ;;  %v3740_v6 = vrot.slane %v7150_v59, 4  ;;  %v3655_v7 = vpop.f32.mrf.mxu0  ;;  %v3798_v62 = vrot.slane %v3797_v48, 1  ;;  %v3820_v11 = vmul.f32 0.125, %v3787_v61 }
 0x5d0   : > { %v3696_v0 = vpop.f32.mrf.mxu1  ;;  %v3805_v7 = vadd.f32 %v3804_v58, %v3803_v39  ;;  %v3819_v4 = vmul.f32 0.125, %v3781_v60 }
 0x5d1   : > { %v3736_v12 = vrot.slane %v3735_v5, 2  ;;  %v3741_v15 = vadd.f32 %v3740_v6, %v7150_v59  ;;  %v3821_v6 = vmul.f32 0.125, %v3793_v38  ;;  %v3829_v23 = vadd.f32 0.8, %v3820_v11 }
 0x5d2   : > { %v3828_v21 = vadd.f32 0.8, %v3819_v4 }
 0x5d3   : > { %v3737_v19 = vadd.f32 %v3736_v12, %v3735_v5  ;;  %v3742_v43 = vrot.slane %v3741_v15, 2  ;;  %v3775_v5 = vadd.f32 %v3774_v55, %v3773_v35  ;;  %v3799_v12 = vadd.f32 %v3798_v62, %v3797_v48 }
 0x5d4   : > { %v3830_v18 = vadd.f32 0.8, %v3821_v6 }
 0x5d5   : > { %v3738_v26 = vrot.slane %v3737_v19, 1  ;;  %v3743_v28 = vadd.f32 %v3742_v43, %v3741_v15  ;;  %v3818_v17 = vmul.f32 0.125, %v3775_v5 }
 0x5d6   : > { %6011 = vrsqrt.f32 %v3830_v18  ;;  %v3926_v18 = vsub.s32 5, %v6938_v25 }
 0x5d7   : > { %v3739_v30 = vadd.f32 %v3738_v26, %v3737_v19  ;;  %v3744_v31 = vrot.slane %v3743_v28, 1  ;;  %v3823_v19 = vmul.f32 0.125, %v3805_v7  ;;  %v3822_v26 = vmul.f32 0.125, %v3799_v12 }
 0x5d8   : > { %v3827_v29 = vadd.f32 0.8, %v3818_v17  ;;  %6013 = vrsqrt.f32 %v3828_v21 }
 0x5d9   : > { %v7155_v40 = vmul.f32 0.125, %v3739_v30  ;;  %v3745_v45 = vadd.f32 %v3744_v31, %v3743_v28  ;;  %v3832_v9 = vadd.f32 0.8, %v3823_v19  ;;  %6015 = vrsqrt.f32 %v3829_v23 }
 0x5da   : > { %v3831_v35 = vadd.f32 0.8, %v3822_v26  ;;  %6017 = vrsqrt.f32 %v3827_v29  ;;  %v3930_v19 = vsub.s32 6, %v6938_v25 }
 0x5db   : > { %v3760_v50 = vsub.f32 %v7147_v53, %v7155_v40  ;;  %v7159_v54 = vmul.f32 0.125, %v3745_v45  ;;  %6019 = vrsqrt.f32 %v3832_v9 }
 0x5dc   : > { %6021 = vrsqrt.f32 %v3831_v35 }
 0x5dd   : > { %v3768_v47 = vmul.f32 %v3760_v50, %v3760_v50  ;;  %v3761_v49 = vsub.f32 %v7150_v59, %v7159_v54 }
 0x5df   : > { %v3806_v1 = vrot.slane %v3768_v47, 4  ;;  %v3769_v2 = vmul.f32 %v3761_v49, %v3761_v49 }
 0x5e1   : > { %v3807_v63 = vadd.f32 %v3806_v1, %v3768_v47  ;;  %v3812_v0 = vrot.slane %v3769_v2, 4 }
 0x5e3   : > { %v3808_v15 = vrot.slane %v3807_v63, 2  ;;  %v3813_v16 = vadd.f32 %v3812_v0, %v3769_v2  ;;  %v6012_v48 = vpop.eup %6011 }
 0x5e5   : > { %v3809_v43 = vadd.f32 %v3808_v15, %v3807_v63  ;;  %v3814_v44 = vrot.slane %v3813_v16, 2  ;;  %v6014_v50 = vpop.eup %6013  ;;  %v3826_v15 = vld [vmem:[#allocation19] sm:$0xff] }
 0x5e6   : > { %v6016_v55 = vpop.eup %6015 }
 0x5e7   : > { %v3810_v28 = vrot.slane %v3809_v43, 1  ;;  %v3815_v13 = vadd.f32 %v3814_v44, %v3813_v16  ;;  %v6018_v38 = vpop.eup %6017  ;;  %v3852_v58 = vcombine.low %v6016_v55, %v6012_v48  ;;  %v3922_v16 = vsub.s32 4, %v6938_v25 }
 0x5e8   : > { %v6020_v47 = vpop.eup %6019  ;;  %v3851_v49 = vcombine.low %v6018_v38, %v6014_v50 }
 0x5e9   : > { %v3811_v30 = vadd.f32 %v3810_v28, %v3809_v43  ;;  %v3816_v31 = vrot.slane %v3815_v13, 1  ;;  %v6022_v60 = vpop.eup %6021  ;;  %v3868_v62 = vrot.slane %v3852_v58, %v6941_v27  ;;  %v3934_v43 = vsub.s32 7, %v6938_v25  ;;  %v5992_v25 = vld [vmem:[%s6922_s28 + $0x1c8] sm:$0xff]  }
 0x5ea   : > { %v3853_v1 = vcombine.low %v6022_v60, %v6020_v47  ;;  %v3861_v5 = vrot.slane %v3851_v49, %v6941_v27  ;;  %v3902_v49 = vld [vmem:[#allocation20] sm:$0xff] }
 0x5eb   : > { %v3824_v36 = vmul.f32 0.125, %v3811_v30  ;;  %v3817_v39 = vadd.f32 %v3816_v31, %v3815_v13 }
 0x5ec   : > { %v3883_v7 = vcombine.low %v3861_v5, %v3868_v62  ;;  %v3875_v63 = vrot.slane %v3853_v1, %v6941_v27 }
 0x5ed   : > { %v3833_v45 = vadd.f32 0.8, %v3824_v36  ;;  %v3825_v41 = vmul.f32 0.125, %v3817_v39 }
 0x5ee   : > { %v3891_v11 = vrot.slane %v3883_v7, %v6941_v27 }
 0x5ef   : > { %v3834_v42 = vadd.f32 0.8, %v3825_v41  ;;  %6023 = vrsqrt.f32 %v3833_v45 }
 0x5f1   : > { %6025 = vrsqrt.f32 %v3834_v42 }
 0x5fc   : > { %v6024_v61 = vpop.eup %6023 }
 0x5fe   : > { %v6026_v2 = vpop.eup %6025 }
 0x5ff   : > { %v3854_v6 = vcombine.low %v6024_v61, %v6026_v2 }
 0x601   : > { %v3882_v0 = vrot.slane %v3854_v6, %v6941_v27 }
 0x603   : > { %v3884_v4 = vcombine.low %v3875_v63, %v3882_v0 }
 0x605   : > { %v3898_v12 = vrot.slane %v3884_v4, %v6941_v27 }
 0x607   : > { %v3899_v17 = vcombine.low %v3891_v11, %v3898_v12 }
 0x609   : > { %v3901_v44 = vmul.f32 %v3899_v17, %v3826_v15 }
 0x60b   : > { %v7175_v21 = vrot.slane %v3901_v44, %v3922_v16  ;;  %v3927_v23 = vrot.slane %v3901_v44, %v3926_v18  ;;  %v7179_v26 = vrot.slane %v3901_v44, %v3930_v19  ;;  %v3935_v28 = vrot.slane %v3901_v44, %v3934_v43 }
 0x60c   : > { %v3907_v13 = vrot.slane %v3901_v44, %v6946_v33  ;;  %v3911_v29 = vrot.slane %v3901_v44, %v6949_v34  ;;  %v3915_v9 = vrot.slane %v3901_v44, %v7011_v56  ;;  %v3919_v30 = vrot.slane %v3901_v44, %v7014_v57 }
 0x60d   : > { %v3948_v31 = vmul.f32 %v7175_v21, %v7139_v14  ;;  %v3949_v35 = vmul.f32 %v3927_v23, %v7133_v24  ;;  %v3950_v36 = vmul.f32 %v7179_v26, %v7155_v40  ;;  %v3951_v39 = vmul.f32 %v3935_v28, %v7159_v54 }
 0x60e   : > { %v3944_v45 = vmul.f32 %v3907_v13, %v7129_v22  ;;  %v3945_v41 = vmul.f32 %v3911_v29, %v7125_v52  ;;  %v3946_v42 = vmul.f32 %v3915_v9, %v7127_v20  ;;  %v3947_v55 = vmul.f32 %v3919_v30, %v7123_v51 }
 0x60f   : > { %v3962_v48 = vcombine.low %v3948_v31, %v3949_v35  ;;  %v3963_v50 = vcombine.low %v3950_v36, %v3951_v39  ;;  %v4012_v51 = vmul.f32 %v3911_v29, %v7067_v32  ;;  %v4014_v62 = vmul.f32 %v3919_v30, %v7071_v37  ;;  %v5970_v29 = vld [vmem:[%s6922_s28 + $0x1b8] sm:$0xff]   ;;  %v5971_v35 = vld [vmem:[%s6922_s28 + $0x170] sm:$0xff]  }
 0x610   : > { %v3960_v38 = vcombine.low %v3944_v45, %v3945_v41  ;;  %v3961_v58 = vcombine.low %v3946_v42, %v3947_v55  ;;  %v4011_v1 = vmul.f32 %v3907_v13, %v7065_v10  ;;  %v4013_v2 = vmul.f32 %v3915_v9, %v7069_v46  ;;  %v5969_v13 = vld [vmem:[%s6922_s28 + $0x138] sm:$0xff]   ;;  %v5972_v39 = vld [vmem:[%s6922_s28 + $0x1f0] sm:$0xff]   ;;  %v5975_v55 = vld [vmem:[%s6922_s28 + $0x168] sm:$0xff]  }
 0x611   : > { %v3984_v14 = vrot.slane %v3962_v48, %v6941_v27  ;;  %v3991_v24 = vrot.slane %v3963_v50, %v6941_v27  ;;  %v4018_v32 = vmul.f32 %v3935_v28, %v7150_v59  ;;  %v4016_v37 = vmul.f32 %v3927_v23, %v7087_v8  ;;  %v5973_v42 = vld [vmem:[%s6922_s28 + $0x130] sm:$0xff]  }
 0x612   : > { %v3970_v40 = vrot.slane %v3960_v38, %v6941_v27  ;;  %v3977_v54 = vrot.slane %v3961_v58, %v6941_v27  ;;  %v5974_v48 = vld [vmem:[%s6922_s28 + $0x1b0] sm:$0xff]   ;;  %v5976_v38 = vld [vmem:[%s6922_s28 + $0x1e8] sm:$0xff]   ;;  %v5979_v58 = vld [vmem:[%s6922_s28 + $0x160] sm:$0xff]  }
 0x613   : > { %v3993_v47 = vcombine.low %v3984_v14, %v3991_v24  ;;  %v5977_v14 = vld [vmem:[%s6922_s28 + $0x128] sm:$0xff]  }
 0x614   : > { %v3992_v52 = vcombine.low %v3970_v40, %v3977_v54  ;;  %v5978_v24 = vld [vmem:[%s6922_s28 + $0x1a8] sm:$0xff]   ;;  %v5980_v40 = vld [vmem:[%s6922_s28 + $0x1e0] sm:$0xff]  }
 0x615   : > { %v4007_v22 = vrot.slane %v3993_v47, %v6941_v27  ;;  %v5981_v47 = vld [vmem:[%s6922_s28 + $0x120] sm:$0xff]  }
 0x616   : > { %v4000_v20 = vrot.slane %v3992_v52, %v6941_v27  ;;  %v5982_v54 = vld [vmem:[%s6922_s28 + $0x1a0] sm:$0xff]   ;;  %v5984_v52 = vld [vmem:[%s6922_s28 + $0x1d8] sm:$0xff]  }
 0x618   : > { %v4008_v60 = vcombine.low %v4000_v20, %v4007_v22  ;;  %v5983_v22 = vld [vmem:[%s6922_s28 + $0x158] sm:$0xff]  }
 0x619   : > { %v5985_v20 = vld [vmem:[%s6922_s28 + $0x118] sm:$0xff]  }
 0x61a   : > { %v7201_v61 = vsub.f32 %v3902_v49, %v4008_v60  ;;  %v5986_v49 = vld [vmem:[%s6922_s28 + $0x198] sm:$0xff]   ;;  %v5987_v60 = vld [vmem:[%s6922_s28 + $0x150] sm:$0xff]  }
 0x61c   : > { %v4027_v5 = vrot.slane %v7201_v61, %v6949_v34  ;;  %v4035_v6 = vrot.slane %v7201_v61, %v7014_v57  ;;  %v4023_v27 = vrot.slane %v7201_v61, %v6946_v33  ;;  %v4031_v7 = vrot.slane %v7201_v61, %v7011_v56 }
 0x61d   : > { %v4043_v10 = vrot.slane %v7201_v61, %v3926_v18  ;;  %v4051_v46 = vrot.slane %v7201_v61, %v3934_v43 }
 0x61e   : > { %v4061_v63 = vadd.f32 %v4027_v5, %v4012_v51  ;;  %v4063_v0 = vadd.f32 %v4035_v6, %v4014_v62  ;;  %v4060_v34 = vadd.f32 %v4023_v27, %v4011_v1  ;;  %v4062_v4 = vadd.f32 %v4031_v7, %v4013_v2  ;;  %v5988_v51 = vld [vmem:[%s6922_s28 + $0x1d0] sm:$0xff]  }
 0x61f   : > { %v4065_v11 = vadd.f32 %v4043_v10, %v4016_v37  ;;  %v4067_v57 = vadd.f32 %v4051_v46, %v4018_v32  ;;  %v4039_v62 = vrot.slane %v7201_v61, %v3922_v16  ;;  %v4047_v1 = vrot.slane %v7201_v61, %v3930_v19  ;;  %v5989_v2 = vld [vmem:[%s6922_s28 + $0x110] sm:$0xff]   ;;  %v5991_v16 = vld [vmem:[%s6922_s28 + $0x148] sm:$0xff]   ;;  %v5995_v37 = vld [vmem:[%s6922_s28 + $0x140] sm:$0xff]  }
 0x620   : > { %vm4069_vm7 = vcmp.gt.f32.partialorder %v4061_v63, 0.0  ;;  %v4077_v12 = vmul.f32 0.2, %v4061_v63  ;;  %vm4071_vm8 = vcmp.gt.f32.partialorder %v4063_v0, 0.0  ;;  %v4079_v56 = vmul.f32 0.2, %v4063_v0 }
 0x621   : > { %vm4068_vm9 = vcmp.gt.f32.partialorder %v4060_v34, 0.0  ;;  %v4076_v59 = vmul.f32 0.2, %v4060_v34  ;;  %vm4070_vm10 = vcmp.gt.f32.partialorder %v4062_v4, 0.0  ;;  %v4078_v8 = vmul.f32 0.2, %v4062_v4 }
 0x622   : > { %v4085_v15 = vsel %vm4069_vm7, %v4061_v63, %v4077_v12  ;;  %v4087_v17 = vsel %vm4071_vm8, %v4063_v0, %v4079_v56  ;;  %vm4073_vm11 = vcmp.gt.f32.partialorder %v4065_v11, 0.0  ;;  %v4081_v18 = vmul.f32 0.2, %v4065_v11  ;;  %v5990_v5 = vld [vmem:[%s6922_s28 + $0x190] sm:$0xff]   ;;  %v5993_v61 = vld [vmem:[%s6922_s28 + $0x108] sm:$0xff]   ;;  %v5996_v10 = vld [vmem:[%s6922_s28 + $0x1c0] sm:$0xff]  }
 0x623   : > { %v4093_v43 = vpack.c.bf16 %v4085_v15, %v4085_v15  ;;  %v4095_v44 = vpack.c.bf16 %v4087_v17, %v4087_v17  ;;  %v4084_v23 = vsel %vm4068_vm9, %v4060_v34, %v4076_v59  ;;  %v4086_v28 = vsel %vm4070_vm10, %v4062_v4, %v4078_v8  ;;  %v5994_v32 = vld [vmem:[%s6922_s28 + $0x188] sm:$0xff]  }
 0x624   : > { %v4092_v9 = vpack.c.bf16 %v4084_v23, %v4084_v23  ;;  %v4094_v30 = vpack.c.bf16 %v4086_v28, %v4086_v28  ;;  %v4089_v31 = vsel %vm4073_vm11, %v4065_v11, %v4081_v18  ;;  %vm4075_vm12 = vcmp.gt.f32.partialorder %v4067_v57, 0.0 }
 0x625   : > { %4644 = vmatprep.mubr.bf16.mxu0 %v4093_v43  ;;  %4684 = vmatprep.mubr.bf16.mxu1 %v4095_v44  ;;  %v4083_v36 = vmul.f32 0.2, %v4067_v57  ;;  %v4097_v45 = vpack.c.bf16 %v4089_v31, %v4089_v31  ;;  %v4015_v6 = vmul.f32 %v7175_v21, %v7081_v3  ;;  %v4017_v27 = vmul.f32 %v7179_v26, %v7147_v53  ;;  %v5997_v53 = vld [vmem:[%s6922_s28 + $0x100] sm:$0xff]  }
 0x626   : > { %4645 = vmatmul.mubr.bf16.vlgmr.msra.gmra.mxu0 %v4092_v9  ;;  %4685 = vmatmul.mubr.bf16.vlgmr.msra.gmra.mxu1 %v4094_v30  ;;  %v5998_v26 = vld [vmem:[%s6922_s28 + $0x180] sm:$0xff]  }
 0x627   : > { %5568 = vmatpush3.bf16.msra.mxu0 %v5969_v13  ;;  %5590 = vmatpush3.bf16.msra.mxu1 %v5970_v29  ;;  %v4091_v41 = vsel %vm4075_vm12, %v4067_v57, %v4083_v36  ;;  %v4064_v7 = vadd.f32 %v4039_v62, %v4015_v6  ;;  %v4066_v19 = vadd.f32 %v4047_v1, %v4017_v27 }
 0x628   : > { %4724 = vmatprep.mubr.bf16.mxu0 %v4097_v45  ;;  %v4099_v50 = vpack.c.bf16 %v4091_v41, %v4091_v41  ;;  %5569 = vmatprep.subr.bf16.mxu0 %v5971_v35 }
 0x629   : > { %5591 = vmatprep.subr.bf16.mxu1 %v5972_v39  ;;  %v4080_v3 = vmul.f32 0.2, %v4064_v7  ;;  %v4082_v21 = vmul.f32 0.2, %v4066_v19  ;;  %vm4072_vm13 = vcmp.gt.f32.partialorder %v4064_v7, 0.0  ;;  %vm4074_vm14 = vcmp.gt.f32.partialorder %v4066_v19, 0.0 }
 0x62a   : > { %4764 = vmatprep.mubr.bf16.mxu1 %v4099_v50 }
 0x62b   : > { %5570 = vmatpush3.bf16.msra.mxu0 %v5973_v42  ;;  %5592 = vmatpush3.bf16.msra.mxu1 %v5974_v48  ;;  %v4088_v46 = vsel %vm4072_vm13, %v4064_v7, %v4080_v3  ;;  %v4090_v63 = vsel %vm4074_vm14, %v4066_v19, %v4082_v21 }
 0x62c   : > { %5571 = vmatprep.subr.bf16.mxu0 %v5975_v55  ;;  %5593 = vmatprep.subr.bf16.mxu1 %v5976_v38  ;;  %v4096_v0 = vpack.c.bf16 %v4088_v46, %v4088_v46  ;;  %v4098_v34 = vpack.c.bf16 %v4090_v63, %v4090_v63 }
 0x62f   : > { %5572 = vmatpush3.bf16.msra.mxu0 %v5977_v14  ;;  %5594 = vmatpush3.bf16.msra.mxu1 %v5978_v24 }
 0x630   : > { %5573 = vmatprep.subr.bf16.mxu0 %v5979_v58  ;;  %5595 = vmatprep.subr.bf16.mxu1 %v5980_v40 }
 0x633   : > { %5574 = vmatpush3.bf16.msra.mxu0 %v5981_v47  ;;  %5596 = vmatpush3.bf16.msra.mxu1 %v5982_v54 }
 0x634   : > { %5575 = vmatprep.subr.bf16.mxu0 %v5983_v22  ;;  %5597 = vmatprep.subr.bf16.mxu1 %v5984_v52 }
 0x637   : > { %5576 = vmatpush3.bf16.msra.mxu0 %v5985_v20  ;;  %5598 = vmatpush3.bf16.msra.mxu1 %v5986_v49 }
 0x638   : > { %5577 = vmatprep.subr.bf16.mxu0 %v5987_v60  ;;  %5599 = vmatprep.subr.bf16.mxu1 %v5988_v51  ;;  %v4788_v51 = vld [vmem:[%s667_s19] sm:$0x1] }
 0x63b   : > { %5578 = vmatpush3.bf16.msra.mxu0 %v5989_v2  ;;  %5600 = vmatpush3.bf16.msra.mxu1 %v5990_v5  ;;  %v4792_v2 = vld [vmem:[%s675_s30] sm:$0x1] }
 0x63c   : > { %5579 = vmatprep.subr.bf16.mxu0 %v5991_v16  ;;  %5601 = vmatprep.subr.bf16.mxu1 %v5992_v25 }
 0x63f   : > { %5580 = vmatpush3.bf16.msra.mxu0 %v5993_v61  ;;  %5602 = vmatpush3.bf16.msra.mxu1 %v5994_v32 }
 0x640   : > { %5581 = vmatprep.subr.bf16.mxu0 %v5995_v37  ;;  %5603 = vmatprep.subr.bf16.mxu1 %v5996_v10 }
 0x643   : > { %5582 = vmatpush3.bf16.msra.mxu0 %v5997_v53  ;;  %5604 = vmatpush3.bf16.msra.mxu1 %v5998_v26 }
 0x646   : > { %4725 = vmatmul.mubr.bf16.vlgmr.msra.gmra.mxu0 %v4096_v0  ;;  %4765 = vmatmul.mubr.bf16.vlgmr.msra.gmra.mxu1 %v4098_v34 }
 0x6e6   : > { %v5539_v4 = vpop.f32.mrf.mxu0  ;;  %v5561_v11 = vpop.f32.mrf.mxu1 }
 0x6e8   : > { %v5540_v57 = vpop.f32.mrf.mxu0  ;;  %v5562_v12 = vpop.f32.mrf.mxu1 }
 0x6e9   : > { %v5541_v17 = vadd.f32 %v5540_v57, %v5539_v4  ;;  %v5563_v18 = vadd.f32 %v5562_v12, %v5561_v11 }
 0x6ea   : > { %v5542_v56 = vpop.f32.mrf.mxu0  ;;  %v5564_v59 = vpop.f32.mrf.mxu1 }
 0x6eb   : > { %v4687_v13 = vadd.f32 %v5563_v18, %v5541_v17 }
 0x6ec   : > { %v5543_v8 = vpop.f32.mrf.mxu0  ;;  %v5565_v15 = vpop.f32.mrf.mxu1 }
 0x706   : > { %v5583_v43 = vpop.f32.mrf.mxu0  ;;  %v5605_v44 = vpop.f32.mrf.mxu1 }
 0x708   : > { %v5584_v23 = vpop.f32.mrf.mxu0  ;;  %v5606_v28 = vpop.f32.mrf.mxu1 }
 0x709   : > { %v5585_v29 = vadd.f32 %v5584_v23, %v5583_v43  ;;  %v5607_v35 = vadd.f32 %v5606_v28, %v5605_v44 }
 0x70a   : > { %v5586_v9 = vpop.f32.mrf.mxu0  ;;  %v5608_v30 = vpop.f32.mrf.mxu1 }
 0x70b   : > { %v4727_v31 = vadd.f32 %v5585_v29, %v4687_v13 }
 0x70c   : > { %v5587_v36 = vpop.f32.mrf.mxu0  ;;  %v5609_v39 = vpop.f32.mrf.mxu1 }
 0x70d   : > { %v4767_v45 = vadd.f32 %v5607_v35, %v4727_v31 }
 0x70f   : > { %v4772_v41 = vrot.slane %v4767_v45, 4 }
 0x711   : > { %v4773_v42 = vadd.f32 %v4772_v41, %v4767_v45 }
 0x713   : > { %v4774_v48 = vrot.slane %v4773_v42, 2 }
 0x715   : > { %v4775_v50 = vadd.f32 %v4774_v48, %v4773_v42 }
 0x717   : > { %v4776_v55 = vrot.slane %v4775_v50, 1 }
 0x719   : > { %v4777_v38 = vadd.f32 %v4776_v55, %v4775_v50 }
 0x71b   : > { %v4778_v14 = vmul.f32 0.125, %v4777_v38 }
 0x71d   : > { %v4779_v24 = vsub.f32 %v4767_v45, %v4778_v14 }
 0x71f   : > { %v4780_v58 = vmul.f32 %v4779_v24, %v4779_v24 }
 0x721   : > { %v4781_v40 = vrot.slane %v4780_v58, 4 }
 0x723   : > { %v4782_v47 = vadd.f32 %v4781_v40, %v4780_v58 }
 0x725   : > { %v4783_v54 = vrot.slane %v4782_v47, 2 }
 0x727   : > { %v4784_v22 = vadd.f32 %v4783_v54, %v4782_v47 }
 0x729   : > { %v4785_v52 = vrot.slane %v4784_v22, 1 }
 0x72b   : > { %v4786_v20 = vadd.f32 %v4785_v52, %v4784_v22 }
 0x72d   : > { %v4787_v49 = vmul.f32 0.125, %v4786_v20 }
 0x72f   : > { %v4789_v60 = vadd.f32 0.8, %v4787_v49 }
 0x731   : > { %6027 = vrsqrt.f32 %v4789_v60 }
 0x73e   : > { %v6028_v62 = vpop.eup %6027 }
 0x73f   : > { %v4791_v1 = vmul.f32 %v6028_v62, %v4788_v51 }
 0x741   : > { %v4793_v5 = vmul.f32 %v4791_v1, %v4778_v14  ;;  %v4799_v6 = vrot.slane %v4791_v1, %v6946_v33 }
 0x743   : > { %v4794_v27 = vsub.f32 %v4792_v2, %v4793_v5  ;;  %v4801_v16 = vmul.f32 %v4799_v6, %v4767_v45 }
 0x745   : > { %v4806_v25 = vrot.slane %v4794_v27, %v6946_v33 }
 0x747   : > { %v4808_v7 = vadd.f32 %v4806_v25, %v4801_v16 }
 0x749   : > { %vm4809_vm15 = vcmp.gt.f32.partialorder %v4808_v7, 0.0  ;;  %v4810_v19 = vmul.f32 0.2, %v4808_v7 }
 0x74b   : > { %v4811_v61 = vsel %vm4809_vm15, %v4808_v7, %v4810_v19 }
 0x74c   : > { %6029 = vtanh.f32 %v4811_v61 }
 0x759   : > { %v6030_v32 = vpop.eup %6029 }
 0x75a   : > { %4813 = vst [vmem:[%s729_s26] sm:$0xff] %v6030_v32 }
 0x75b   : > { %6440 = shalt.err (!%p6437_p4)
}
 0x75c   : > { %s6441_s11 = scalar_lea.hbm %s7268_s3, 128  ;;  %s6445_s27 = scalar_lea.hbm %s7410_s1, 896 }
 0x75d   : > { %p6442_p9 = scmp.ne.s32.totalorder %s7268_s3, %s6441_s11  ;;  %p6446_p13 = scmp.lt.s32.totalorder %s7268_s3, %s7410_s1 }
 0x75e   : > { %p6447_p12 = scmp.lt.s32.totalorder %s6445_s27, %s6441_s11 }
 0x75f   : > { %p6443_p10 = pnand %p6442_p9, %p7411_p8 }
 0x760   : > { %p6448_p1 = por %p6447_p12, %p6446_p13 }
 0x761   : > { %p6444_p6 = pneg %p6443_p10 }
 0x763   : > { %p6449_p3 = pnand %p6448_p1, %p6444_p6 }
 0x765   : > { %6452 = shalt.err (!%p6449_p3)
}
 0x766   : > { %5665 = dma.vmem_to_hbm [thread:$0]  (%p7411_p8), %s4829_s22, 128, %s7268_s3, %s4815_s5  }
 0x767 PF: > { %s7412_s30 = sld [smem:[#allocation35_spill]]  ;;  %p5743_p7 = scmp.ge.s32.totalorder %s6519_s21, 2 }
 0x768   : > { %s7413_s20 = sld [smem:[#allocation44_spill]] }
 0x76d   : > { %s4840_s16 = sand.u32 1, %s7412_s30  }
 0x76e   : > { %p7414_p5 = scmp.ne.s32.totalorder %s7413_s20, 0  ;;  %s4841_s26 = scalar_lea.sflag [#allocation4], %s4840_s16 }
 0x770   : > { %p5715_p2 = pnand %p5743_p7, %p7414_p5 }
 0x772   : > { %p5716_p11 = pneg %p5715_p2 }
 0x774   : > { %6502 = dma.done.wait (%p5716_p11), %s4841_s26, 128  }
 0x775   : > { %6504 = vsyncadd (%p5716_p11), %s4841_s26, 4294967168  ;;  %s7415_s21 = sld [smem:[#allocation40_spill]] }
 0x776   : > { %s7416_s18 = sld [smem:[#allocation36_spill]] }
 0x777   : > { %s7417_s19 = sld [smem:[#allocation37_spill]] }
 0x778   : > { %s7418_s20 = sld [smem:[#allocation41_spill]] }
 0x77b   : > { %p32_p0 = scmp.ge.s32.totalorder %s7415_s21, 9  }
 0x77d   :  { %34 = sbr.rel (!%p32_p0) target bundleno = 18 (0x12), region = 194 }
 0x782   :  { %4846 = vsyncpa [#allocation3], 1 }
 0x783   :  { %4848 = vsyncpa [#allocation3 + $0x1], 1 }
 0x784   :  { %4849 = vsyncpa [#allocation6], 1 }
 0x785   :  { %4850 = vsyncpa [#allocation9], 1 }
 0x786   :  { %4851 = vsyncpa [#allocation12], 1 }
 0x787   :  { %4852 = vsyncpa [#allocation15], 1 }
 0x788   :  { %4853 = vsyncpa [#allocation18], 1 }
 0x789   :  { %4854 = vsyncpa [#allocation21], 1 }
 0x78a   :  { %4855 = vsyncpa [#allocation4], 1 }
 0x78b   :  { %4857 = vsyncpa [#allocation4 + $0x1], 1 }

</bundles_post_ra>
